<compile_context>
chip_gen: v7x
topology: tpu7x:2x2x1
jax: 0.10.0
libtpu: 0.0.40
codegen_flags: <defaults>
</compile_context>

<pallas_src>
import functools

import jax
import jax.numpy as jnp
from jax.experimental import pallas as pl
from jax.experimental.pallas import tpu as pltpu


# ------------------------------ fused kernel ---------------------------------

def _make_encoder_kernel(T, B, H, num_layers):
    """Build the fused bi-GRU(+attention) kernel for static (T, B, H, layers)."""
    H2, H4, H6 = 2 * H, 4 * H, 6 * H

    def kernel(*refs):
        x_ref = refs[0]
        layer_refs = refs[1:1 + 4 * num_layers]
        attn_w_ref = refs[1 + 4 * num_layers]
        attn_b_ref = refs[2 + 4 * num_layers]
        ctx_ref = refs[3 + 4 * num_layers]
        attn_ref = refs[4 + 4 * num_layers]
        act_ref = refs[5 + 4 * num_layers]          # (T*B, 2H) VMEM activation scratch

        # Lane selector for the merged gate layout [r_f, r_b, z_f, z_b, n_f, n_b]:
        # True on forward-direction columns.  Built once, reused by every layer.
        col = jax.lax.broadcasted_iota(jnp.int32, (1, H6), 1)
        is_fwd_col = (col % H2) < H

        x2 = x_ref[...]                             # (T*B, D_in) dense 2-D layer input
        for layer in range(num_layers):
            wi_ref, wh_ref, bi_ref, bhn_ref = layer_refs[4 * layer: 4 * layer + 4]
            wh = wh_ref[...]                        # (2H, 6H) block-diagonal fwd/bwd
            bhn = bhn_ref[...]                      # (1, 2H)  = [b_hn_f | b_hn_b]

            # Input projection for all T steps and BOTH directions: one MXU matmul,
            # hoisted off the serial recurrence.  Columns are already in the merged
            # gate layout; biases (b_i? [+ b_h? for r,z]) folded in.
            gi = jnp.dot(x2, wi_ref[...], preferred_element_type=jnp.float32) + bi_ref[...]

            h = jnp.zeros((B, H2), jnp.float32)     # merged state [h_fwd | h_bwd]
            for s in range(T):                      # fully unrolled static time loop
                # fwd gates come from time s, bwd gates from time T-1-s.  Static row
                # slices + a lane select; independent of h, so off the latency chain.
                gi_s = jnp.where(is_fwd_col,
                                 gi[s * B:(s + 1) * B, :],
                                 gi[(T - 1 - s) * B:(T - s) * B, :])
                # Single MXU push per step for all 3 gates x 2 directions.
                gh = jnp.dot(h, wh, preferred_element_type=jnp.float32)   # (B, 6H)
                rz = jax.nn.sigmoid(gi_s[:, 0:H4] + gh[:, 0:H4])          # [r_f,r_b,z_f,z_b]
                r = rz[:, 0:H2]
                z = rz[:, H2:H4]
                n = jnp.tanh(gi_s[:, H4:H6] + r * (gh[:, H4:H6] + bhn))
                h = (1.0 - z) * n + z * h
                # Stream the step state straight into the VMEM activation scratch:
                # forward half at time s, backward half at time T-1-s.
                act_ref[s * B:(s + 1) * B, 0:H] = h[:, 0:H]
                act_ref[(T - 1 - s) * B:(T - s) * B, H:H2] = h[:, H:H2]

            x2 = act_ref[...]                       # next layer / attention input (VMEM only)
            # TODO(synk): inter-layer GRU dropout (p=0.3) is a training-time op;
            # inference semantics (identity) are implemented here.

        # ---------------- fused temporal attention epilogue ----------------
        o = x2                                      # (T*B, 2H) final GRU output
        w = attn_w_ref[...]                         # (1, 2H)
        scores = jnp.sum(o * w, axis=-1, keepdims=True) + attn_b_ref[...]   # (T*B, 1)
        sc = [scores[s * B:(s + 1) * B, :] for s in range(T)]               # T x (B, 1)
        m = sc[0]
        for s in range(1, T):
            m = jnp.maximum(m, sc[s])
        e = [jnp.exp(sc[s] - m) for s in range(T)]
        den = e[0]
        for s in range(1, T):
            den = den + e[s]
        inv = 1.0 / den                             # (B, 1)

        ctx = jnp.zeros((B, H2), jnp.float32)
        a_cols = []
        for s in range(T):
            a_s = e[s] * inv                        # (B, 1) attention weight at time s
            a_cols.append(a_s)
            ctx = ctx + a_s * o[s * B:(s + 1) * B, :]
        ctx_ref[...] = ctx.astype(ctx_ref.dtype)                            # (B, 2H)
        attn_ref[...] = jnp.concatenate(a_cols, axis=1).astype(attn_ref.dtype)  # (B, T)

    return kernel


# ----------------------------- weight packing ---------------------------------

def pack_params(params, hidden_dim, num_layers):
    """One-time repack of PyTorch-layout GRU/attention weights into the fused,
    direction-merged kernel layout (gate columns [r_f, r_b, z_f, z_b, n_f, n_b])."""
    H = hidden_dim
    zeros = jnp.zeros((H, H), jnp.float32)

    def gates_T(w):            # (3H, D) -> [(D, H)] x 3, PyTorch gate order (r, z, n)
        return [w[g * H:(g + 1) * H, :].T for g in range(3)]

    def blockdiag(f, b):       # (2H, 2H) = [[f, 0], [0, b]]
        return jnp.concatenate(
            [jnp.concatenate([f, zeros], axis=1),
             jnp.concatenate([zeros, b], axis=1)], axis=0)

    packed = {"gru": []}
    for layer in range(num_layers):
        pf = params["gru"][layer]["fwd"]
        pb = params["gru"][layer]["bwd"]
        wif, whf = gates_T(pf[0]), gates_T(pf[1])
        wib, whb = gates_T(pb[0]), gates_T(pb[1])
        b_ih_f, b_hh_f = pf[2], pf[3]
        b_ih_b, b_hh_b = pb[2], pb[3]

        wi = jnp.concatenate([wif[0], wib[0], wif[1], wib[1], wif[2], wib[2]], axis=1)
        wh = jnp.concatenate([blockdiag(whf[0], whb[0]),
                              blockdiag(whf[1], whb[1]),
                              blockdiag(whf[2], whb[2])], axis=1)
        bi = jnp.concatenate([
            b_ih_f[0:H] + b_hh_f[0:H],           b_ih_b[0:H] + b_hh_b[0:H],
            b_ih_f[H:2 * H] + b_hh_f[H:2 * H],   b_ih_b[H:2 * H] + b_hh_b[H:2 * H],
            b_ih_f[2 * H:3 * H],                 b_ih_b[2 * H:3 * H],
        ]).reshape(1, 6 * H)
        bhn = jnp.concatenate([b_hh_f[2 * H:3 * H], b_hh_b[2 * H:3 * H]]).reshape(1, 2 * H)
        packed["gru"].append((wi, wh, bi, bhn))

    packed["attn_w"] = params["attn_w"]            # (1, 2H)
    packed["attn_b"] = params["attn_b"]            # (1, 1)
    return packed


# -------------------------------- forward -------------------------------------

@functools.partial(jax.jit, static_argnames=("num_layers", "hidden_dim"))
def temporal_encoder_forward(x, packed, *, num_layers, hidden_dim):
    """x: (B, T, input_dim) batch-first -> (context (B, 2H), attention (B, T, 1))."""
    B, T, D = x.shape
    H = hidden_dim
    # Single transpose at the API boundary; the kernel sees a dense 2-D slab.
    x2 = jnp.transpose(x, (1, 0, 2)).reshape(T * B, D)

    args = [x2]
    for layer in range(num_layers):
        args.extend(packed["gru"][layer])
    args.append(packed["attn_w"])
    args.append(packed["attn_b"])

    def full(shape):           # whole-array block (grid=(1,)): all operands are 2-D
        return pl.BlockSpec(shape, lambda i: (0, 0))

    ctx, attn_bt = pl.pallas_call(
        _make_encoder_kernel(T, B, H, num_layers),
        out_shape=(jax.ShapeDtypeStruct((B, 2 * H), jnp.float32),
                   jax.ShapeDtypeStruct((B, T), jnp.float32)),
        grid=(1,),
        in_specs=[full(a.shape) for a in args],
        out_specs=(full((B, 2 * H)), full((B, T))),
        scratch_shapes=[pltpu.VMEM((T * B, 2 * H), jnp.float32)],
        compiler_params=pltpu.CompilerParams(dimension_semantics=("arbitrary",)),
    )(*args)
    return ctx, attn_bt[:, :, None]                # (B, 2H), (B, T, 1)


# --------------------------------- Reference ----------------------------------

def _gru_dir_ref(x_tbd, w_ih, w_hh, b_ih, b_hh):
    B = x_tbd.shape[1]
    H = w_hh.shape[1]

    def step(h, x):
        gi = x @ w_ih.T + b_ih
        gh = h @ w_hh.T + b_hh
        r = jax.nn.sigmoid(gi[:, :H] + gh[:, :H])
        z = jax.nn.sigmoid(gi[:, H:2 * H] + gh[:, H:2 * H])
        n = jnp.tanh(gi[:, 2 * H:] + r * gh[:, 2 * H:])
        h_new = (1.0 - z) * n + z * h
        return h_new, h_new

    _, outs = jax.lax.scan(step, jnp.zeros((B, H), jnp.float32), x_tbd)
    return outs


def _forward_ref(x, params, num_layers):
    h = x
    for layer in range(num_layers):
        x_t = jnp.transpose(h, (1, 0, 2))
        out_f = _gru_dir_ref(x_t, *params["gru"][layer]["fwd"])
        out_b = _gru_dir_ref(x_t[::-1], *params["gru"][layer]["bwd"])[::-1]
        h = jnp.transpose(jnp.concatenate([out_f, out_b], axis=-1), (1, 0, 2))
    o = h                                                            # (B, T, 2H)
    scores = jnp.einsum("bth,oh->bto", o, params["attn_w"]) + params["attn_b"][0, 0]
    attn = jax.nn.softmax(scores, axis=1)                            # (B, T, 1)
    ctx = jnp.sum(attn * o, axis=1)                                  # (B, 2H)
    return ctx, attn


# --------------------------------- Param init ----------------------------------

def init_params(key, input_dim, hidden_dim, num_layers=2):
    params = {"gru": []}
    scale = 1.0 / jnp.sqrt(hidden_dim)
    for layer in range(num_layers):
        d_in = input_dim if layer == 0 else 2 * hidden_dim
        layer_params = {}
        for direction in ("fwd", "bwd"):
            key, k1, k2, k3, k4 = jax.random.split(key, 5)
            w_ih = jax.random.uniform(k1, (3 * hidden_dim, d_in), jnp.float32, -scale, scale)
            w_hh = jax.random.uniform(k2, (3 * hidden_dim, hidden_dim), jnp.float32, -scale, scale)
            b_ih = jax.random.uniform(k3, (3 * hidden_dim,), jnp.float32, -scale, scale)
            b_hh = jax.random.uniform(k4, (3 * hidden_dim,), jnp.float32, -scale, scale)
            layer_params[direction] = (w_ih, w_hh, b_ih, b_hh)
        params["gru"].append(layer_params)
    key, k1, k2 = jax.random.split(key, 3)
    a_scale = 1.0 / jnp.sqrt(2 * hidden_dim)
    params["attn_w"] = jax.random.uniform(k1, (1, 2 * hidden_dim), jnp.float32, -a_scale, a_scale)
    params["attn_b"] = jax.random.uniform(k2, (1, 1), jnp.float32, -a_scale, a_scale)
    return params


# ------------------------------------ Main -------------------------------------

if __name__ == "__main__":
    B, T, INPUT_DIM, HIDDEN_DIM, NUM_LAYERS = 2, 8, 16, 32, 2

    key = jax.random.PRNGKey(0)
    key, kx = jax.random.split(key)
    x = jax.random.normal(kx, (B, T, INPUT_DIM), jnp.float32)
    params = init_params(key, INPUT_DIM, HIDDEN_DIM, NUM_LAYERS)

    packed = pack_params(params, HIDDEN_DIM, NUM_LAYERS)     # one-time weight repack

    ctx, attn = temporal_encoder_forward(x, packed,
                                         num_layers=NUM_LAYERS, hidden_dim=HIDDEN_DIM)
    ctx, attn = jax.block_until_ready((ctx, attn))

    ctx_ref, attn_ref = _forward_ref(x, params, NUM_LAYERS)
    assert ctx.shape == (B, 2 * HIDDEN_DIM)
    assert attn.shape == (B, T, 1)
    assert jnp.allclose(ctx, ctx_ref, rtol=1e-4, atol=1e-4)
    assert jnp.allclose(attn, attn_ref, rtol=1e-4, atol=1e-4)

    print("KERNEL_OK")
</pallas_src>

<mosaic_0001>
module attributes {stable_mosaic.version = 11 : i64} {
  func.func @kernel(%arg0: i32, %arg1: memref<16x16xf32, #tpu.memory_space<vmem>>, %arg2: memref<16x192xf32, #tpu.memory_space<vmem>>, %arg3: memref<64x192xf32, #tpu.memory_space<vmem>>, %arg4: memref<1x192xf32, #tpu.memory_space<vmem>>, %arg5: memref<1x64xf32, #tpu.memory_space<vmem>>, %arg6: memref<64x192xf32, #tpu.memory_space<vmem>>, %arg7: memref<64x192xf32, #tpu.memory_space<vmem>>, %arg8: memref<1x192xf32, #tpu.memory_space<vmem>>, %arg9: memref<1x64xf32, #tpu.memory_space<vmem>>, %arg10: memref<1x64xf32, #tpu.memory_space<vmem>>, %arg11: memref<1x1xf32, #tpu.memory_space<vmem>>, %arg12: memref<2x64xf32, #tpu.memory_space<vmem>>, %arg13: memref<2x8xf32, #tpu.memory_space<vmem>>, %arg14: memref<16x64xf32, #tpu.memory_space<vmem>>) attributes {dimension_semantics = [#tpu.dimension_semantics<arbitrary>], iteration_bounds = array<i64: 1>, scalar_prefetch = 0 : i64, scratch_operands = 1 : i64, tpu.core_type = #tpu.core_type<tc>, window_params = [{pipeline_mode = #tpu.pipeline_mode<synchronous>, transform_indices = @transform_0, window_bounds = array<i64: 16, 16>}, {pipeline_mode = #tpu.pipeline_mode<synchronous>, transform_indices = @transform_1, window_bounds = array<i64: 16, 192>}, {pipeline_mode = #tpu.pipeline_mode<synchronous>, transform_indices = @transform_2, window_bounds = array<i64: 64, 192>}, {pipeline_mode = #tpu.pipeline_mode<synchronous>, transform_indices = @transform_3, window_bounds = array<i64: 1, 192>}, {pipeline_mode = #tpu.pipeline_mode<synchronous>, transform_indices = @transform_4, window_bounds = array<i64: 1, 64>}, {pipeline_mode = #tpu.pipeline_mode<synchronous>, transform_indices = @transform_5, window_bounds = array<i64: 64, 192>}, {pipeline_mode = #tpu.pipeline_mode<synchronous>, transform_indices = @transform_6, window_bounds = array<i64: 64, 192>}, {pipeline_mode = #tpu.pipeline_mode<synchronous>, transform_indices = @transform_7, window_bounds = array<i64: 1, 192>}, {pipeline_mode = #tpu.pipeline_mode<synchronous>, transform_indices = @transform_8, window_bounds = array<i64: 1, 64>}, {pipeline_mode = #tpu.pipeline_mode<synchronous>, transform_indices = @transform_9, window_bounds = array<i64: 1, 64>}, {pipeline_mode = #tpu.pipeline_mode<synchronous>, transform_indices = @transform_10, window_bounds = array<i64: 1, 1>}, {pipeline_mode = #tpu.pipeline_mode<synchronous>, transform_indices = @transform_11, window_bounds = array<i64: 2, 64>}, {pipeline_mode = #tpu.pipeline_mode<synchronous>, transform_indices = @transform_12, window_bounds = array<i64: 2, 8>}]} {
    %0 = tpu.iota {dimensions = array<i32: 1>} : vector<1x192xi32>
    %c64_i32 = arith.constant 64 : i32
    %c0_i32 = arith.constant 0 : i32
    %1 = arith.cmpi eq, %c64_i32, %c0_i32 : i32
    %c1_i32 = arith.constant 1 : i32
    %2 = arith.select %1, %c1_i32, %c64_i32 : i32
    %3 = vector.broadcast %2 : i32 to vector<1x192xi32>
    %4 = arith.remsi %0, %3 : vector<1x192xi32>
    %c0_i32_0 = arith.constant 0 : i32
    %5 = vector.broadcast %c0_i32_0 : i32 to vector<1x192xi32>
    %6 = arith.cmpi ne, %4, %5 : vector<1x192xi32>
    %c0_i32_1 = arith.constant 0 : i32
    %7 = vector.broadcast %c0_i32_1 : i32 to vector<1x192xi32>
    %8 = arith.cmpi slt, %4, %7 : vector<1x192xi32>
    %c0_i32_2 = arith.constant 0 : i32
    %9 = arith.cmpi slt, %2, %c0_i32_2 : i32
    %10 = vector.broadcast %9 : i1 to vector<1x192xi1>
    %11 = vector.broadcast %10 : vector<1x192xi1> to vector<1x192xi1>
    %12 = arith.xori %8, %11 : vector<1x192xi1>
    %13 = arith.andi %12, %6 : vector<1x192xi1>
    %14 = vector.broadcast %2 : i32 to vector<1x192xi32>
    %15 = arith.addi %4, %14 : vector<1x192xi32>
    %16 = arith.select %13, %15, %4 : vector<1x192xi1>, vector<1x192xi32>
    %c32_i32 = arith.constant 32 : i32
    %17 = vector.broadcast %c32_i32 : i32 to vector<1x192xi32>
    %18 = arith.cmpi slt, %16, %17 : vector<1x192xi32>
    %c0 = arith.constant 0 : index
    %c0_3 = arith.constant 0 : index
    %19 = vector.load %arg1[%c0, %c0_3] : memref<16x16xf32, #tpu.memory_space<vmem>>, vector<16x16xf32>
    %c0_4 = arith.constant 0 : index
    %c0_5 = arith.constant 0 : index
    %20 = vector.load %arg3[%c0_4, %c0_5] : memref<64x192xf32, #tpu.memory_space<vmem>>, vector<64x192xf32>
    %c0_6 = arith.constant 0 : index
    %c0_7 = arith.constant 0 : index
    %21 = vector.load %arg5[%c0_6, %c0_7] : memref<1x64xf32, #tpu.memory_space<vmem>>, vector<1x64xf32>
    %c0_8 = arith.constant 0 : index
    %c0_9 = arith.constant 0 : index
    %22 = vector.load %arg2[%c0_8, %c0_9] : memref<16x192xf32, #tpu.memory_space<vmem>>, vector<16x192xf32>
    %cst = arith.constant dense<0.000000e+00> : vector<16x192xf32>
    %23 = tpu.matmul %19, %22, %cst {dimension_numbers = #tpu.dot_dimension_numbers<[1], [0], [0], [1], [0, 0, 1, 1], [], []>} : vector<16x16xf32>, vector<16x192xf32>, vector<16x192xf32> -> vector<16x192xf32>
    %c0_10 = arith.constant 0 : index
    %c0_11 = arith.constant 0 : index
    %24 = vector.load %arg4[%c0_10, %c0_11] : memref<1x192xf32, #tpu.memory_space<vmem>>, vector<1x192xf32>
    %25 = vector.broadcast %24 : vector<1x192xf32> to vector<16x192xf32>
    %26 = arith.addf %23, %25 : vector<16x192xf32>
    %cst_12 = arith.constant 0.000000e+00 : f32
    %27 = vector.broadcast %cst_12 : f32 to vector<2x64xf32>
    %28 = vector.extract_strided_slice %26 {offsets = [0, 0], sizes = [2, 192], strides = [1, 1]} : vector<16x192xf32> to vector<2x192xf32>
    %29 = vector.extract_strided_slice %26 {offsets = [14, 0], sizes = [2, 192], strides = [1, 1]} : vector<16x192xf32> to vector<2x192xf32>
    %30 = vector.shape_cast %18 : vector<1x192xi1> to vector<1x192xi1>
    %31 = vector.broadcast %30 : vector<1x192xi1> to vector<2x192xi1>
    %32 = arith.select %31, %28, %29 : vector<2x192xi1>, vector<2x192xf32>
    %cst_13 = arith.constant dense<0.000000e+00> : vector<2x192xf32>
    %33 = tpu.matmul %27, %20, %cst_13 {dimension_numbers = #tpu.dot_dimension_numbers<[1], [0], [0], [1], [0, 0, 1, 1], [], []>} : vector<2x64xf32>, vector<64x192xf32>, vector<2x192xf32> -> vector<2x192xf32>
    %34 = vector.extract_strided_slice %32 {offsets = [0, 0], sizes = [2, 128], strides = [1, 1]} : vector<2x192xf32> to vector<2x128xf32>
    %35 = vector.extract_strided_slice %33 {offsets = [0, 0], sizes = [2, 128], strides = [1, 1]} : vector<2x192xf32> to vector<2x128xf32>
    %36 = arith.addf %34, %35 : vector<2x128xf32>
    %37 = arith.negf %36 : vector<2x128xf32>
    %38 = math.exp %37 : vector<2x128xf32>
    %cst_14 = arith.constant 1.000000e+00 : f32
    %39 = vector.broadcast %cst_14 : f32 to vector<2x128xf32>
    %40 = arith.addf %39, %38 : vector<2x128xf32>
    %41 = arith.divf %39, %40 : vector<2x128xf32>
    %42 = vector.extract_strided_slice %41 {offsets = [0, 0], sizes = [2, 64], strides = [1, 1]} : vector<2x128xf32> to vector<2x64xf32>
    %43 = vector.extract_strided_slice %41 {offsets = [0, 64], sizes = [2, 64], strides = [1, 1]} : vector<2x128xf32> to vector<2x64xf32>
    %44 = vector.extract_strided_slice %32 {offsets = [0, 128], sizes = [2, 64], strides = [1, 1]} : vector<2x192xf32> to vector<2x64xf32>
    %45 = vector.extract_strided_slice %33 {offsets = [0, 128], sizes = [2, 64], strides = [1, 1]} : vector<2x192xf32> to vector<2x64xf32>
    %46 = vector.broadcast %21 : vector<1x64xf32> to vector<2x64xf32>
    %47 = arith.addf %45, %46 : vector<2x64xf32>
    %48 = arith.mulf %42, %47 : vector<2x64xf32>
    %49 = arith.addf %44, %48 : vector<2x64xf32>
    %50 = math.tanh %49 : vector<2x64xf32>
    %cst_15 = arith.constant 1.000000e+00 : f32
    %51 = vector.broadcast %cst_15 : f32 to vector<2x64xf32>
    %52 = arith.subf %51, %43 : vector<2x64xf32>
    %53 = arith.mulf %52, %50 : vector<2x64xf32>
    %54 = arith.mulf %43, %27 : vector<2x64xf32>
    %55 = arith.addf %53, %54 : vector<2x64xf32>
    %56 = vector.extract_strided_slice %55 {offsets = [0, 0], sizes = [2, 32], strides = [1, 1]} : vector<2x64xf32> to vector<2x32xf32>
    %c0_16 = arith.constant 0 : index
    %c0_17 = arith.constant 0 : index
    %57 = vector.load %arg14[%c0_16, %c0_17] : memref<16x64xf32, #tpu.memory_space<vmem>>, vector<2x32xf32>
    tpu.vector_store %arg14[%c0_16, %c0_17], %56 {strides = array<i32>} : memref<16x64xf32, #tpu.memory_space<vmem>>, vector<2x32xf32>,
    %58 = vector.extract_strided_slice %55 {offsets = [0, 32], sizes = [2, 32], strides = [1, 1]} : vector<2x64xf32> to vector<2x32xf32>
    %c14 = arith.constant 14 : index
    %c32 = arith.constant 32 : index
    %59 = vector.load %arg14[%c14, %c32] : memref<16x64xf32, #tpu.memory_space<vmem>>, vector<2x32xf32>
    tpu.vector_store %arg14[%c14, %c32], %58 {strides = array<i32>} : memref<16x64xf32, #tpu.memory_space<vmem>>, vector<2x32xf32>,
    %60 = vector.extract_strided_slice %26 {offsets = [2, 0], sizes = [2, 192], strides = [1, 1]} : vector<16x192xf32> to vector<2x192xf32>
    %61 = vector.extract_strided_slice %26 {offsets = [12, 0], sizes = [2, 192], strides = [1, 1]} : vector<16x192xf32> to vector<2x192xf32>
    %62 = vector.shape_cast %18 : vector<1x192xi1> to vector<1x192xi1>
    %63 = vector.broadcast %62 : vector<1x192xi1> to vector<2x192xi1>
    %64 = arith.select %63, %60, %61 : vector<2x192xi1>, vector<2x192xf32>
    %cst_18 = arith.constant dense<0.000000e+00> : vector<2x192xf32>
    %65 = tpu.matmul %55, %20, %cst_18 {dimension_numbers = #tpu.dot_dimension_numbers<[1], [0], [0], [1], [0, 0, 1, 1], [], []>} : vector<2x64xf32>, vector<64x192xf32>, vector<2x192xf32> -> vector<2x192xf32>
    %66 = vector.extract_strided_slice %64 {offsets = [0, 0], sizes = [2, 128], strides = [1, 1]} : vector<2x192xf32> to vector<2x128xf32>
    %67 = vector.extract_strided_slice %65 {offsets = [0, 0], sizes = [2, 128], strides = [1, 1]} : vector<2x192xf32> to vector<2x128xf32>
    %68 = arith.addf %66, %67 : vector<2x128xf32>
    %69 = arith.negf %68 : vector<2x128xf32>
    %70 = math.exp %69 : vector<2x128xf32>
    %cst_19 = arith.constant 1.000000e+00 : f32
    %71 = vector.broadcast %cst_19 : f32 to vector<2x128xf32>
    %72 = arith.addf %71, %70 : vector<2x128xf32>
    %73 = arith.divf %71, %72 : vector<2x128xf32>
    %74 = vector.extract_strided_slice %73 {offsets = [0, 0], sizes = [2, 64], strides = [1, 1]} : vector<2x128xf32> to vector<2x64xf32>
    %75 = vector.extract_strided_slice %73 {offsets = [0, 64], sizes = [2, 64], strides = [1, 1]} : vector<2x128xf32> to vector<2x64xf32>
    %76 = vector.extract_strided_slice %64 {offsets = [0, 128], sizes = [2, 64], strides = [1, 1]} : vector<2x192xf32> to vector<2x64xf32>
    %77 = vector.extract_strided_slice %65 {offsets = [0, 128], sizes = [2, 64], strides = [1, 1]} : vector<2x192xf32> to vector<2x64xf32>
    %78 = vector.broadcast %21 : vector<1x64xf32> to vector<2x64xf32>
    %79 = arith.addf %77, %78 : vector<2x64xf32>
    %80 = arith.mulf %74, %79 : vector<2x64xf32>
    %81 = arith.addf %76, %80 : vector<2x64xf32>
    %82 = math.tanh %81 : vector<2x64xf32>
    %cst_20 = arith.constant 1.000000e+00 : f32
    %83 = vector.broadcast %cst_20 : f32 to vector<2x64xf32>
    %84 = arith.subf %83, %75 : vector<2x64xf32>
    %85 = arith.mulf %84, %82 : vector<2x64xf32>
    %86 = arith.mulf %75, %55 : vector<2x64xf32>
    %87 = arith.addf %85, %86 : vector<2x64xf32>
    %88 = vector.extract_strided_slice %87 {offsets = [0, 0], sizes = [2, 32], strides = [1, 1]} : vector<2x64xf32> to vector<2x32xf32>
    %c2 = arith.constant 2 : index
    %c0_21 = arith.constant 0 : index
    %89 = vector.load %arg14[%c2, %c0_21] : memref<16x64xf32, #tpu.memory_space<vmem>>, vector<2x32xf32>
    tpu.vector_store %arg14[%c2, %c0_21], %88 {strides = array<i32>} : memref<16x64xf32, #tpu.memory_space<vmem>>, vector<2x32xf32>,
    %90 = vector.extract_strided_slice %87 {offsets = [0, 32], sizes = [2, 32], strides = [1, 1]} : vector<2x64xf32> to vector<2x32xf32>
    %c12 = arith.constant 12 : index
    %c32_22 = arith.constant 32 : index
    %91 = vector.load %arg14[%c12, %c32_22] : memref<16x64xf32, #tpu.memory_space<vmem>>, vector<2x32xf32>
    tpu.vector_store %arg14[%c12, %c32_22], %90 {strides = array<i32>} : memref<16x64xf32, #tpu.memory_space<vmem>>, vector<2x32xf32>,
    %92 = vector.extract_strided_slice %26 {offsets = [4, 0], sizes = [2, 192], strides = [1, 1]} : vector<16x192xf32> to vector<2x192xf32>
    %93 = vector.extract_strided_slice %26 {offsets = [10, 0], sizes = [2, 192], strides = [1, 1]} : vector<16x192xf32> to vector<2x192xf32>
    %94 = vector.shape_cast %18 : vector<1x192xi1> to vector<1x192xi1>
    %95 = vector.broadcast %94 : vector<1x192xi1> to vector<2x192xi1>
    %96 = arith.select %95, %92, %93 : vector<2x192xi1>, vector<2x192xf32>
    %cst_23 = arith.constant dense<0.000000e+00> : vector<2x192xf32>
    %97 = tpu.matmul %87, %20, %cst_23 {dimension_numbers = #tpu.dot_dimension_numbers<[1], [0], [0], [1], [0, 0, 1, 1], [], []>} : vector<2x64xf32>, vector<64x192xf32>, vector<2x192xf32> -> vector<2x192xf32>
    %98 = vector.extract_strided_slice %96 {offsets = [0, 0], sizes = [2, 128], strides = [1, 1]} : vector<2x192xf32> to vector<2x128xf32>
    %99 = vector.extract_strided_slice %97 {offsets = [0, 0], sizes = [2, 128], strides = [1, 1]} : vector<2x192xf32> to vector<2x128xf32>
    %100 = arith.addf %98, %99 : vector<2x128xf32>
    %101 = arith.negf %100 : vector<2x128xf32>
    %102 = math.exp %101 : vector<2x128xf32>
    %cst_24 = arith.constant 1.000000e+00 : f32
    %103 = vector.broadcast %cst_24 : f32 to vector<2x128xf32>
    %104 = arith.addf %103, %102 : vector<2x128xf32>
    %105 = arith.divf %103, %104 : vector<2x128xf32>
    %106 = vector.extract_strided_slice %105 {offsets = [0, 0], sizes = [2, 64], strides = [1, 1]} : vector<2x128xf32> to vector<2x64xf32>
    %107 = vector.extract_strided_slice %105 {offsets = [0, 64], sizes = [2, 64], strides = [1, 1]} : vector<2x128xf32> to vector<2x64xf32>
    %108 = vector.extract_strided_slice %96 {offsets = [0, 128], sizes = [2, 64], strides = [1, 1]} : vector<2x192xf32> to vector<2x64xf32>
    %109 = vector.extract_strided_slice %97 {offsets = [0, 128], sizes = [2, 64], strides = [1, 1]} : vector<2x192xf32> to vector<2x64xf32>
    %110 = vector.broadcast %21 : vector<1x64xf32> to vector<2x64xf32>
    %111 = arith.addf %109, %110 : vector<2x64xf32>
    %112 = arith.mulf %106, %111 : vector<2x64xf32>
    %113 = arith.addf %108, %112 : vector<2x64xf32>
    %114 = math.tanh %113 : vector<2x64xf32>
    %cst_25 = arith.constant 1.000000e+00 : f32
    %115 = vector.broadcast %cst_25 : f32 to vector<2x64xf32>
    %116 = arith.subf %115, %107 : vector<2x64xf32>
    %117 = arith.mulf %116, %114 : vector<2x64xf32>
    %118 = arith.mulf %107, %87 : vector<2x64xf32>
    %119 = arith.addf %117, %118 : vector<2x64xf32>
    %120 = vector.extract_strided_slice %119 {offsets = [0, 0], sizes = [2, 32], strides = [1, 1]} : vector<2x64xf32> to vector<2x32xf32>
    %c4 = arith.constant 4 : index
    %c0_26 = arith.constant 0 : index
    %121 = vector.load %arg14[%c4, %c0_26] : memref<16x64xf32, #tpu.memory_space<vmem>>, vector<2x32xf32>
    tpu.vector_store %arg14[%c4, %c0_26], %120 {strides = array<i32>} : memref<16x64xf32, #tpu.memory_space<vmem>>, vector<2x32xf32>,
    %122 = vector.extract_strided_slice %119 {offsets = [0, 32], sizes = [2, 32], strides = [1, 1]} : vector<2x64xf32> to vector<2x32xf32>
    %c10 = arith.constant 10 : index
    %c32_27 = arith.constant 32 : index
    %123 = vector.load %arg14[%c10, %c32_27] : memref<16x64xf32, #tpu.memory_space<vmem>>, vector<2x32xf32>
    tpu.vector_store %arg14[%c10, %c32_27], %122 {strides = array<i32>} : memref<16x64xf32, #tpu.memory_space<vmem>>, vector<2x32xf32>,
    %124 = vector.extract_strided_slice %26 {offsets = [6, 0], sizes = [2, 192], strides = [1, 1]} : vector<16x192xf32> to vector<2x192xf32>
    %125 = vector.extract_strided_slice %26 {offsets = [8, 0], sizes = [2, 192], strides = [1, 1]} : vector<16x192xf32> to vector<2x192xf32>
    %126 = vector.shape_cast %18 : vector<1x192xi1> to vector<1x192xi1>
    %127 = vector.broadcast %126 : vector<1x192xi1> to vector<2x192xi1>
    %128 = arith.select %127, %124, %125 : vector<2x192xi1>, vector<2x192xf32>
    %cst_28 = arith.constant dense<0.000000e+00> : vector<2x192xf32>
    %129 = tpu.matmul %119, %20, %cst_28 {dimension_numbers = #tpu.dot_dimension_numbers<[1], [0], [0], [1], [0, 0, 1, 1], [], []>} : vector<2x64xf32>, vector<64x192xf32>, vector<2x192xf32> -> vector<2x192xf32>
    %130 = vector.extract_strided_slice %128 {offsets = [0, 0], sizes = [2, 128], strides = [1, 1]} : vector<2x192xf32> to vector<2x128xf32>
    %131 = vector.extract_strided_slice %129 {offsets = [0, 0], sizes = [2, 128], strides = [1, 1]} : vector<2x192xf32> to vector<2x128xf32>
    %132 = arith.addf %130, %131 : vector<2x128xf32>
    %133 = arith.negf %132 : vector<2x128xf32>
    %134 = math.exp %133 : vector<2x128xf32>
    %cst_29 = arith.constant 1.000000e+00 : f32
    %135 = vector.broadcast %cst_29 : f32 to vector<2x128xf32>
    %136 = arith.addf %135, %134 : vector<2x128xf32>
    %137 = arith.divf %135, %136 : vector<2x128xf32>
    %138 = vector.extract_strided_slice %137 {offsets = [0, 0], sizes = [2, 64], strides = [1, 1]} : vector<2x128xf32> to vector<2x64xf32>
    %139 = vector.extract_strided_slice %137 {offsets = [0, 64], sizes = [2, 64], strides = [1, 1]} : vector<2x128xf32> to vector<2x64xf32>
    %140 = vector.extract_strided_slice %128 {offsets = [0, 128], sizes = [2, 64], strides = [1, 1]} : vector<2x192xf32> to vector<2x64xf32>
    %141 = vector.extract_strided_slice %129 {offsets = [0, 128], sizes = [2, 64], strides = [1, 1]} : vector<2x192xf32> to vector<2x64xf32>
    %142 = vector.broadcast %21 : vector<1x64xf32> to vector<2x64xf32>
    %143 = arith.addf %141, %142 : vector<2x64xf32>
    %144 = arith.mulf %138, %143 : vector<2x64xf32>
    %145 = arith.addf %140, %144 : vector<2x64xf32>
    %146 = math.tanh %145 : vector<2x64xf32>
    %cst_30 = arith.constant 1.000000e+00 : f32
    %147 = vector.broadcast %cst_30 : f32 to vector<2x64xf32>
    %148 = arith.subf %147, %139 : vector<2x64xf32>
    %149 = arith.mulf %148, %146 : vector<2x64xf32>
    %150 = arith.mulf %139, %119 : vector<2x64xf32>
    %151 = arith.addf %149, %150 : vector<2x64xf32>
    %152 = vector.extract_strided_slice %151 {offsets = [0, 0], sizes = [2, 32], strides = [1, 1]} : vector<2x64xf32> to vector<2x32xf32>
    %c6 = arith.constant 6 : index
    %c0_31 = arith.constant 0 : index
    %153 = vector.load %arg14[%c6, %c0_31] : memref<16x64xf32, #tpu.memory_space<vmem>>, vector<2x32xf32>
    tpu.vector_store %arg14[%c6, %c0_31], %152 {strides = array<i32>} : memref<16x64xf32, #tpu.memory_space<vmem>>, vector<2x32xf32>,
    %154 = vector.extract_strided_slice %151 {offsets = [0, 32], sizes = [2, 32], strides = [1, 1]} : vector<2x64xf32> to vector<2x32xf32>
    %c8 = arith.constant 8 : index
    %c32_32 = arith.constant 32 : index
    %155 = vector.load %arg14[%c8, %c32_32] : memref<16x64xf32, #tpu.memory_space<vmem>>, vector<2x32xf32>
    tpu.vector_store %arg14[%c8, %c32_32], %154 {strides = array<i32>} : memref<16x64xf32, #tpu.memory_space<vmem>>, vector<2x32xf32>,
    %156 = vector.extract_strided_slice %26 {offsets = [8, 0], sizes = [2, 192], strides = [1, 1]} : vector<16x192xf32> to vector<2x192xf32>
    %157 = vector.extract_strided_slice %26 {offsets = [6, 0], sizes = [2, 192], strides = [1, 1]} : vector<16x192xf32> to vector<2x192xf32>
    %158 = vector.shape_cast %18 : vector<1x192xi1> to vector<1x192xi1>
    %159 = vector.broadcast %158 : vector<1x192xi1> to vector<2x192xi1>
    %160 = arith.select %159, %156, %157 : vector<2x192xi1>, vector<2x192xf32>
    %cst_33 = arith.constant dense<0.000000e+00> : vector<2x192xf32>
    %161 = tpu.matmul %151, %20, %cst_33 {dimension_numbers = #tpu.dot_dimension_numbers<[1], [0], [0], [1], [0, 0, 1, 1], [], []>} : vector<2x64xf32>, vector<64x192xf32>, vector<2x192xf32> -> vector<2x192xf32>
    %162 = vector.extract_strided_slice %160 {offsets = [0, 0], sizes = [2, 128], strides = [1, 1]} : vector<2x192xf32> to vector<2x128xf32>
    %163 = vector.extract_strided_slice %161 {offsets = [0, 0], sizes = [2, 128], strides = [1, 1]} : vector<2x192xf32> to vector<2x128xf32>
    %164 = arith.addf %162, %163 : vector<2x128xf32>
    %165 = arith.negf %164 : vector<2x128xf32>
    %166 = math.exp %165 : vector<2x128xf32>
    %cst_34 = arith.constant 1.000000e+00 : f32
    %167 = vector.broadcast %cst_34 : f32 to vector<2x128xf32>
    %168 = arith.addf %167, %166 : vector<2x128xf32>
    %169 = arith.divf %167, %168 : vector<2x128xf32>
    %170 = vector.extract_strided_slice %169 {offsets = [0, 0], sizes = [2, 64], strides = [1, 1]} : vector<2x128xf32> to vector<2x64xf32>
    %171 = vector.extract_strided_slice %169 {offsets = [0, 64], sizes = [2, 64], strides = [1, 1]} : vector<2x128xf32> to vector<2x64xf32>
    %172 = vector.extract_strided_slice %160 {offsets = [0, 128], sizes = [2, 64], strides = [1, 1]} : vector<2x192xf32> to vector<2x64xf32>
    %173 = vector.extract_strided_slice %161 {offsets = [0, 128], sizes = [2, 64], strides = [1, 1]} : vector<2x192xf32> to vector<2x64xf32>
    %174 = vector.broadcast %21 : vector<1x64xf32> to vector<2x64xf32>
    %175 = arith.addf %173, %174 : vector<2x64xf32>
    %176 = arith.mulf %170, %175 : vector<2x64xf32>
    %177 = arith.addf %172, %176 : vector<2x64xf32>
    %178 = math.tanh %177 : vector<2x64xf32>
    %cst_35 = arith.constant 1.000000e+00 : f32
    %179 = vector.broadcast %cst_35 : f32 to vector<2x64xf32>
    %180 = arith.subf %179, %171 : vector<2x64xf32>
    %181 = arith.mulf %180, %178 : vector<2x64xf32>
    %182 = arith.mulf %171, %151 : vector<2x64xf32>
    %183 = arith.addf %181, %182 : vector<2x64xf32>
    %184 = vector.extract_strided_slice %183 {offsets = [0, 0], sizes = [2, 32], strides = [1, 1]} : vector<2x64xf32> to vector<2x32xf32>
    %c8_36 = arith.constant 8 : index
    %c0_37 = arith.constant 0 : index
    %185 = vector.load %arg14[%c8_36, %c0_37] : memref<16x64xf32, #tpu.memory_space<vmem>>, vector<2x32xf32>
    tpu.vector_store %arg14[%c8_36, %c0_37], %184 {strides = array<i32>} : memref<16x64xf32, #tpu.memory_space<vmem>>, vector<2x32xf32>,
    %186 = vector.extract_strided_slice %183 {offsets = [0, 32], sizes = [2, 32], strides = [1, 1]} : vector<2x64xf32> to vector<2x32xf32>
    %c6_38 = arith.constant 6 : index
    %c32_39 = arith.constant 32 : index
    %187 = vector.load %arg14[%c6_38, %c32_39] : memref<16x64xf32, #tpu.memory_space<vmem>>, vector<2x32xf32>
    tpu.vector_store %arg14[%c6_38, %c32_39], %186 {strides = array<i32>} : memref<16x64xf32, #tpu.memory_space<vmem>>, vector<2x32xf32>,
    %188 = vector.extract_strided_slice %26 {offsets = [10, 0], sizes = [2, 192], strides = [1, 1]} : vector<16x192xf32> to vector<2x192xf32>
    %189 = vector.extract_strided_slice %26 {offsets = [4, 0], sizes = [2, 192], strides = [1, 1]} : vector<16x192xf32> to vector<2x192xf32>
    %190 = vector.shape_cast %18 : vector<1x192xi1> to vector<1x192xi1>
    %191 = vector.broadcast %190 : vector<1x192xi1> to vector<2x192xi1>
    %192 = arith.select %191, %188, %189 : vector<2x192xi1>, vector<2x192xf32>
    %cst_40 = arith.constant dense<0.000000e+00> : vector<2x192xf32>
    %193 = tpu.matmul %183, %20, %cst_40 {dimension_numbers = #tpu.dot_dimension_numbers<[1], [0], [0], [1], [0, 0, 1, 1], [], []>} : vector<2x64xf32>, vector<64x192xf32>, vector<2x192xf32> -> vector<2x192xf32>
    %194 = vector.extract_strided_slice %192 {offsets = [0, 0], sizes = [2, 128], strides = [1, 1]} : vector<2x192xf32> to vector<2x128xf32>
    %195 = vector.extract_strided_slice %193 {offsets = [0, 0], sizes = [2, 128], strides = [1, 1]} : vector<2x192xf32> to vector<2x128xf32>
    %196 = arith.addf %194, %195 : vector<2x128xf32>
    %197 = arith.negf %196 : vector<2x128xf32>
    %198 = math.exp %197 : vector<2x128xf32>
    %cst_41 = arith.constant 1.000000e+00 : f32
    %199 = vector.broadcast %cst_41 : f32 to vector<2x128xf32>
    %200 = arith.addf %199, %198 : vector<2x128xf32>
    %201 = arith.divf %199, %200 : vector<2x128xf32>
    %202 = vector.extract_strided_slice %201 {offsets = [0, 0], sizes = [2, 64], strides = [1, 1]} : vector<2x128xf32> to vector<2x64xf32>
    %203 = vector.extract_strided_slice %201 {offsets = [0, 64], sizes = [2, 64], strides = [1, 1]} : vector<2x128xf32> to vector<2x64xf32>
    %204 = vector.extract_strided_slice %192 {offsets = [0, 128], sizes = [2, 64], strides = [1, 1]} : vector<2x192xf32> to vector<2x64xf32>
    %205 = vector.extract_strided_slice %193 {offsets = [0, 128], sizes = [2, 64], strides = [1, 1]} : vector<2x192xf32> to vector<2x64xf32>
    %206 = vector.broadcast %21 : vector<1x64xf32> to vector<2x64xf32>
    %207 = arith.addf %205, %206 : vector<2x64xf32>
    %208 = arith.mulf %202, %207 : vector<2x64xf32>
    %209 = arith.addf %204, %208 : vector<2x64xf32>
    %210 = math.tanh %209 : vector<2x64xf32>
    %cst_42 = arith.constant 1.000000e+00 : f32
    %211 = vector.broadcast %cst_42 : f32 to vector<2x64xf32>
    %212 = arith.subf %211, %203 : vector<2x64xf32>
    %213 = arith.mulf %212, %210 : vector<2x64xf32>
    %214 = arith.mulf %203, %183 : vector<2x64xf32>
    %215 = arith.addf %213, %214 : vector<2x64xf32>
    %216 = vector.extract_strided_slice %215 {offsets = [0, 0], sizes = [2, 32], strides = [1, 1]} : vector<2x64xf32> to vector<2x32xf32>
    %c10_43 = arith.constant 10 : index
    %c0_44 = arith.constant 0 : index
    %217 = vector.load %arg14[%c10_43, %c0_44] : memref<16x64xf32, #tpu.memory_space<vmem>>, vector<2x32xf32>
    tpu.vector_store %arg14[%c10_43, %c0_44], %216 {strides = array<i32>} : memref<16x64xf32, #tpu.memory_space<vmem>>, vector<2x32xf32>,
    %218 = vector.extract_strided_slice %215 {offsets = [0, 32], sizes = [2, 32], strides = [1, 1]} : vector<2x64xf32> to vector<2x32xf32>
    %c4_45 = arith.constant 4 : index
    %c32_46 = arith.constant 32 : index
    %219 = vector.load %arg14[%c4_45, %c32_46] : memref<16x64xf32, #tpu.memory_space<vmem>>, vector<2x32xf32>
    tpu.vector_store %arg14[%c4_45, %c32_46], %218 {strides = array<i32>} : memref<16x64xf32, #tpu.memory_space<vmem>>, vector<2x32xf32>,
    %220 = vector.extract_strided_slice %26 {offsets = [12, 0], sizes = [2, 192], strides = [1, 1]} : vector<16x192xf32> to vector<2x192xf32>
    %221 = vector.extract_strided_slice %26 {offsets = [2, 0], sizes = [2, 192], strides = [1, 1]} : vector<16x192xf32> to vector<2x192xf32>
    %222 = vector.shape_cast %18 : vector<1x192xi1> to vector<1x192xi1>
    %223 = vector.broadcast %222 : vector<1x192xi1> to vector<2x192xi1>
    %224 = arith.select %223, %220, %221 : vector<2x192xi1>, vector<2x192xf32>
    %cst_47 = arith.constant dense<0.000000e+00> : vector<2x192xf32>
    %225 = tpu.matmul %215, %20, %cst_47 {dimension_numbers = #tpu.dot_dimension_numbers<[1], [0], [0], [1], [0, 0, 1, 1], [], []>} : vector<2x64xf32>, vector<64x192xf32>, vector<2x192xf32> -> vector<2x192xf32>
    %226 = vector.extract_strided_slice %224 {offsets = [0, 0], sizes = [2, 128], strides = [1, 1]} : vector<2x192xf32> to vector<2x128xf32>
    %227 = vector.extract_strided_slice %225 {offsets = [0, 0], sizes = [2, 128], strides = [1, 1]} : vector<2x192xf32> to vector<2x128xf32>
    %228 = arith.addf %226, %227 : vector<2x128xf32>
    %229 = arith.negf %228 : vector<2x128xf32>
    %230 = math.exp %229 : vector<2x128xf32>
    %cst_48 = arith.constant 1.000000e+00 : f32
    %231 = vector.broadcast %cst_48 : f32 to vector<2x128xf32>
    %232 = arith.addf %231, %230 : vector<2x128xf32>
    %233 = arith.divf %231, %232 : vector<2x128xf32>
    %234 = vector.extract_strided_slice %233 {offsets = [0, 0], sizes = [2, 64], strides = [1, 1]} : vector<2x128xf32> to vector<2x64xf32>
    %235 = vector.extract_strided_slice %233 {offsets = [0, 64], sizes = [2, 64], strides = [1, 1]} : vector<2x128xf32> to vector<2x64xf32>
    %236 = vector.extract_strided_slice %224 {offsets = [0, 128], sizes = [2, 64], strides = [1, 1]} : vector<2x192xf32> to vector<2x64xf32>
    %237 = vector.extract_strided_slice %225 {offsets = [0, 128], sizes = [2, 64], strides = [1, 1]} : vector<2x192xf32> to vector<2x64xf32>
    %238 = vector.broadcast %21 : vector<1x64xf32> to vector<2x64xf32>
    %239 = arith.addf %237, %238 : vector<2x64xf32>
    %240 = arith.mulf %234, %239 : vector<2x64xf32>
    %241 = arith.addf %236, %240 : vector<2x64xf32>
    %242 = math.tanh %241 : vector<2x64xf32>
    %cst_49 = arith.constant 1.000000e+00 : f32
    %243 = vector.broadcast %cst_49 : f32 to vector<2x64xf32>
    %244 = arith.subf %243, %235 : vector<2x64xf32>
    %245 = arith.mulf %244, %242 : vector<2x64xf32>
    %246 = arith.mulf %235, %215 : vector<2x64xf32>
    %247 = arith.addf %245, %246 : vector<2x64xf32>
    %248 = vector.extract_strided_slice %247 {offsets = [0, 0], sizes = [2, 32], strides = [1, 1]} : vector<2x64xf32> to vector<2x32xf32>
    %c12_50 = arith.constant 12 : index
    %c0_51 = arith.constant 0 : index
    %249 = vector.load %arg14[%c12_50, %c0_51] : memref<16x64xf32, #tpu.memory_space<vmem>>, vector<2x32xf32>
    tpu.vector_store %arg14[%c12_50, %c0_51], %248 {strides = array<i32>} : memref<16x64xf32, #tpu.memory_space<vmem>>, vector<2x32xf32>,
    %250 = vector.extract_strided_slice %247 {offsets = [0, 32], sizes = [2, 32], strides = [1, 1]} : vector<2x64xf32> to vector<2x32xf32>
    %c2_52 = arith.constant 2 : index
    %c32_53 = arith.constant 32 : index
    %251 = vector.load %arg14[%c2_52, %c32_53] : memref<16x64xf32, #tpu.memory_space<vmem>>, vector<2x32xf32>
    tpu.vector_store %arg14[%c2_52, %c32_53], %250 {strides = array<i32>} : memref<16x64xf32, #tpu.memory_space<vmem>>, vector<2x32xf32>,
    %252 = vector.extract_strided_slice %26 {offsets = [14, 0], sizes = [2, 192], strides = [1, 1]} : vector<16x192xf32> to vector<2x192xf32>
    %253 = vector.extract_strided_slice %26 {offsets = [0, 0], sizes = [2, 192], strides = [1, 1]} : vector<16x192xf32> to vector<2x192xf32>
    %254 = vector.shape_cast %18 : vector<1x192xi1> to vector<1x192xi1>
    %255 = vector.broadcast %254 : vector<1x192xi1> to vector<2x192xi1>
    %256 = arith.select %255, %252, %253 : vector<2x192xi1>, vector<2x192xf32>
    %cst_54 = arith.constant dense<0.000000e+00> : vector<2x192xf32>
    %257 = tpu.matmul %247, %20, %cst_54 {dimension_numbers = #tpu.dot_dimension_numbers<[1], [0], [0], [1], [0, 0, 1, 1], [], []>} : vector<2x64xf32>, vector<64x192xf32>, vector<2x192xf32> -> vector<2x192xf32>
    %258 = vector.extract_strided_slice %256 {offsets = [0, 0], sizes = [2, 128], strides = [1, 1]} : vector<2x192xf32> to vector<2x128xf32>
    %259 = vector.extract_strided_slice %257 {offsets = [0, 0], sizes = [2, 128], strides = [1, 1]} : vector<2x192xf32> to vector<2x128xf32>
    %260 = arith.addf %258, %259 : vector<2x128xf32>
    %261 = arith.negf %260 : vector<2x128xf32>
    %262 = math.exp %261 : vector<2x128xf32>
    %cst_55 = arith.constant 1.000000e+00 : f32
    %263 = vector.broadcast %cst_55 : f32 to vector<2x128xf32>
    %264 = arith.addf %263, %262 : vector<2x128xf32>
    %265 = arith.divf %263, %264 : vector<2x128xf32>
    %266 = vector.extract_strided_slice %265 {offsets = [0, 0], sizes = [2, 64], strides = [1, 1]} : vector<2x128xf32> to vector<2x64xf32>
    %267 = vector.extract_strided_slice %265 {offsets = [0, 64], sizes = [2, 64], strides = [1, 1]} : vector<2x128xf32> to vector<2x64xf32>
    %268 = vector.extract_strided_slice %256 {offsets = [0, 128], sizes = [2, 64], strides = [1, 1]} : vector<2x192xf32> to vector<2x64xf32>
    %269 = vector.extract_strided_slice %257 {offsets = [0, 128], sizes = [2, 64], strides = [1, 1]} : vector<2x192xf32> to vector<2x64xf32>
    %270 = vector.broadcast %21 : vector<1x64xf32> to vector<2x64xf32>
    %271 = arith.addf %269, %270 : vector<2x64xf32>
    %272 = arith.mulf %266, %271 : vector<2x64xf32>
    %273 = arith.addf %268, %272 : vector<2x64xf32>
    %274 = math.tanh %273 : vector<2x64xf32>
    %cst_56 = arith.constant 1.000000e+00 : f32
    %275 = vector.broadcast %cst_56 : f32 to vector<2x64xf32>
    %276 = arith.subf %275, %267 : vector<2x64xf32>
    %277 = arith.mulf %276, %274 : vector<2x64xf32>
    %278 = arith.mulf %267, %247 : vector<2x64xf32>
    %279 = arith.addf %277, %278 : vector<2x64xf32>
    %280 = vector.extract_strided_slice %279 {offsets = [0, 0], sizes = [2, 32], strides = [1, 1]} : vector<2x64xf32> to vector<2x32xf32>
    %c14_57 = arith.constant 14 : index
    %c0_58 = arith.constant 0 : index
    %281 = vector.load %arg14[%c14_57, %c0_58] : memref<16x64xf32, #tpu.memory_space<vmem>>, vector<2x32xf32>
    tpu.vector_store %arg14[%c14_57, %c0_58], %280 {strides = array<i32>} : memref<16x64xf32, #tpu.memory_space<vmem>>, vector<2x32xf32>,
    %282 = vector.extract_strided_slice %279 {offsets = [0, 32], sizes = [2, 32], strides = [1, 1]} : vector<2x64xf32> to vector<2x32xf32>
    %c0_59 = arith.constant 0 : index
    %c32_60 = arith.constant 32 : index
    %283 = vector.load %arg14[%c0_59, %c32_60] : memref<16x64xf32, #tpu.memory_space<vmem>>, vector<2x32xf32>
    tpu.vector_store %arg14[%c0_59, %c32_60], %282 {strides = array<i32>} : memref<16x64xf32, #tpu.memory_space<vmem>>, vector<2x32xf32>,
    %c0_61 = arith.constant 0 : index
    %c0_62 = arith.constant 0 : index
    %284 = vector.load %arg14[%c0_61, %c0_62] : memref<16x64xf32, #tpu.memory_space<vmem>>, vector<16x64xf32>
    %c0_63 = arith.constant 0 : index
    %c0_64 = arith.constant 0 : index
    %285 = vector.load %arg7[%c0_63, %c0_64] : memref<64x192xf32, #tpu.memory_space<vmem>>, vector<64x192xf32>
    %c0_65 = arith.constant 0 : index
    %c0_66 = arith.constant 0 : index
    %286 = vector.load %arg9[%c0_65, %c0_66] : memref<1x64xf32, #tpu.memory_space<vmem>>, vector<1x64xf32>
    %c0_67 = arith.constant 0 : index
    %c0_68 = arith.constant 0 : index
    %287 = vector.load %arg6[%c0_67, %c0_68] : memref<64x192xf32, #tpu.memory_space<vmem>>, vector<64x192xf32>
    %cst_69 = arith.constant dense<0.000000e+00> : vector<16x192xf32>
    %288 = tpu.matmul %284, %287, %cst_69 {dimension_numbers = #tpu.dot_dimension_numbers<[1], [0], [0], [1], [0, 0, 1, 1], [], []>} : vector<16x64xf32>, vector<64x192xf32>, vector<16x192xf32> -> vector<16x192xf32>
    %c0_70 = arith.constant 0 : index
    %c0_71 = arith.constant 0 : index
    %289 = vector.load %arg8[%c0_70, %c0_71] : memref<1x192xf32, #tpu.memory_space<vmem>>, vector<1x192xf32>
    %290 = vector.broadcast %289 : vector<1x192xf32> to vector<16x192xf32>
    %291 = arith.addf %288, %290 : vector<16x192xf32>
    %cst_72 = arith.constant 0.000000e+00 : f32
    %292 = vector.broadcast %cst_72 : f32 to vector<2x64xf32>
    %293 = vector.extract_strided_slice %291 {offsets = [0, 0], sizes = [2, 192], strides = [1, 1]} : vector<16x192xf32> to vector<2x192xf32>
    %294 = vector.extract_strided_slice %291 {offsets = [14, 0], sizes = [2, 192], strides = [1, 1]} : vector<16x192xf32> to vector<2x192xf32>
    %295 = vector.shape_cast %18 : vector<1x192xi1> to vector<1x192xi1>
    %296 = vector.broadcast %295 : vector<1x192xi1> to vector<2x192xi1>
    %297 = arith.select %296, %293, %294 : vector<2x192xi1>, vector<2x192xf32>
    %cst_73 = arith.constant dense<0.000000e+00> : vector<2x192xf32>
    %298 = tpu.matmul %292, %285, %cst_73 {dimension_numbers = #tpu.dot_dimension_numbers<[1], [0], [0], [1], [0, 0, 1, 1], [], []>} : vector<2x64xf32>, vector<64x192xf32>, vector<2x192xf32> -> vector<2x192xf32>
    %299 = vector.extract_strided_slice %297 {offsets = [0, 0], sizes = [2, 128], strides = [1, 1]} : vector<2x192xf32> to vector<2x128xf32>
    %300 = vector.extract_strided_slice %298 {offsets = [0, 0], sizes = [2, 128], strides = [1, 1]} : vector<2x192xf32> to vector<2x128xf32>
    %301 = arith.addf %299, %300 : vector<2x128xf32>
    %302 = arith.negf %301 : vector<2x128xf32>
    %303 = math.exp %302 : vector<2x128xf32>
    %cst_74 = arith.constant 1.000000e+00 : f32
    %304 = vector.broadcast %cst_74 : f32 to vector<2x128xf32>
    %305 = arith.addf %304, %303 : vector<2x128xf32>
    %306 = arith.divf %304, %305 : vector<2x128xf32>
    %307 = vector.extract_strided_slice %306 {offsets = [0, 0], sizes = [2, 64], strides = [1, 1]} : vector<2x128xf32> to vector<2x64xf32>
    %308 = vector.extract_strided_slice %306 {offsets = [0, 64], sizes = [2, 64], strides = [1, 1]} : vector<2x128xf32> to vector<2x64xf32>
    %309 = vector.extract_strided_slice %297 {offsets = [0, 128], sizes = [2, 64], strides = [1, 1]} : vector<2x192xf32> to vector<2x64xf32>
    %310 = vector.extract_strided_slice %298 {offsets = [0, 128], sizes = [2, 64], strides = [1, 1]} : vector<2x192xf32> to vector<2x64xf32>
    %311 = vector.broadcast %286 : vector<1x64xf32> to vector<2x64xf32>
    %312 = arith.addf %310, %311 : vector<2x64xf32>
    %313 = arith.mulf %307, %312 : vector<2x64xf32>
    %314 = arith.addf %309, %313 : vector<2x64xf32>
    %315 = math.tanh %314 : vector<2x64xf32>
    %cst_75 = arith.constant 1.000000e+00 : f32
    %316 = vector.broadcast %cst_75 : f32 to vector<2x64xf32>
    %317 = arith.subf %316, %308 : vector<2x64xf32>
    %318 = arith.mulf %317, %315 : vector<2x64xf32>
    %319 = arith.mulf %308, %292 : vector<2x64xf32>
    %320 = arith.addf %318, %319 : vector<2x64xf32>
    %321 = vector.extract_strided_slice %320 {offsets = [0, 0], sizes = [2, 32], strides = [1, 1]} : vector<2x64xf32> to vector<2x32xf32>
    %c0_76 = arith.constant 0 : index
    %c0_77 = arith.constant 0 : index
    %322 = vector.load %arg14[%c0_76, %c0_77] : memref<16x64xf32, #tpu.memory_space<vmem>>, vector<2x32xf32>
    tpu.vector_store %arg14[%c0_76, %c0_77], %321 {strides = array<i32>} : memref<16x64xf32, #tpu.memory_space<vmem>>, vector<2x32xf32>,
    %323 = vector.extract_strided_slice %320 {offsets = [0, 32], sizes = [2, 32], strides = [1, 1]} : vector<2x64xf32> to vector<2x32xf32>
    %c14_78 = arith.constant 14 : index
    %c32_79 = arith.constant 32 : index
    %324 = vector.load %arg14[%c14_78, %c32_79] : memref<16x64xf32, #tpu.memory_space<vmem>>, vector<2x32xf32>
    tpu.vector_store %arg14[%c14_78, %c32_79], %323 {strides = array<i32>} : memref<16x64xf32, #tpu.memory_space<vmem>>, vector<2x32xf32>,
    %325 = vector.extract_strided_slice %291 {offsets = [2, 0], sizes = [2, 192], strides = [1, 1]} : vector<16x192xf32> to vector<2x192xf32>
    %326 = vector.extract_strided_slice %291 {offsets = [12, 0], sizes = [2, 192], strides = [1, 1]} : vector<16x192xf32> to vector<2x192xf32>
    %327 = vector.shape_cast %18 : vector<1x192xi1> to vector<1x192xi1>
    %328 = vector.broadcast %327 : vector<1x192xi1> to vector<2x192xi1>
    %329 = arith.select %328, %325, %326 : vector<2x192xi1>, vector<2x192xf32>
    %cst_80 = arith.constant dense<0.000000e+00> : vector<2x192xf32>
    %330 = tpu.matmul %320, %285, %cst_80 {dimension_numbers = #tpu.dot_dimension_numbers<[1], [0], [0], [1], [0, 0, 1, 1], [], []>} : vector<2x64xf32>, vector<64x192xf32>, vector<2x192xf32> -> vector<2x192xf32>
    %331 = vector.extract_strided_slice %329 {offsets = [0, 0], sizes = [2, 128], strides = [1, 1]} : vector<2x192xf32> to vector<2x128xf32>
    %332 = vector.extract_strided_slice %330 {offsets = [0, 0], sizes = [2, 128], strides = [1, 1]} : vector<2x192xf32> to vector<2x128xf32>
    %333 = arith.addf %331, %332 : vector<2x128xf32>
    %334 = arith.negf %333 : vector<2x128xf32>
    %335 = math.exp %334 : vector<2x128xf32>
    %cst_81 = arith.constant 1.000000e+00 : f32
    %336 = vector.broadcast %cst_81 : f32 to vector<2x128xf32>
    %337 = arith.addf %336, %335 : vector<2x128xf32>
    %338 = arith.divf %336, %337 : vector<2x128xf32>
    %339 = vector.extract_strided_slice %338 {offsets = [0, 0], sizes = [2, 64], strides = [1, 1]} : vector<2x128xf32> to vector<2x64xf32>
    %340 = vector.extract_strided_slice %338 {offsets = [0, 64], sizes = [2, 64], strides = [1, 1]} : vector<2x128xf32> to vector<2x64xf32>
    %341 = vector.extract_strided_slice %329 {offsets = [0, 128], sizes = [2, 64], strides = [1, 1]} : vector<2x192xf32> to vector<2x64xf32>
    %342 = vector.extract_strided_slice %330 {offsets = [0, 128], sizes = [2, 64], strides = [1, 1]} : vector<2x192xf32> to vector<2x64xf32>
    %343 = vector.broadcast %286 : vector<1x64xf32> to vector<2x64xf32>
    %344 = arith.addf %342, %343 : vector<2x64xf32>
    %345 = arith.mulf %339, %344 : vector<2x64xf32>
    %346 = arith.addf %341, %345 : vector<2x64xf32>
    %347 = math.tanh %346 : vector<2x64xf32>
    %cst_82 = arith.constant 1.000000e+00 : f32
    %348 = vector.broadcast %cst_82 : f32 to vector<2x64xf32>
    %349 = arith.subf %348, %340 : vector<2x64xf32>
    %350 = arith.mulf %349, %347 : vector<2x64xf32>
    %351 = arith.mulf %340, %320 : vector<2x64xf32>
    %352 = arith.addf %350, %351 : vector<2x64xf32>
    %353 = vector.extract_strided_slice %352 {offsets = [0, 0], sizes = [2, 32], strides = [1, 1]} : vector<2x64xf32> to vector<2x32xf32>
    %c2_83 = arith.constant 2 : index
    %c0_84 = arith.constant 0 : index
    %354 = vector.load %arg14[%c2_83, %c0_84] : memref<16x64xf32, #tpu.memory_space<vmem>>, vector<2x32xf32>
    tpu.vector_store %arg14[%c2_83, %c0_84], %353 {strides = array<i32>} : memref<16x64xf32, #tpu.memory_space<vmem>>, vector<2x32xf32>,
    %355 = vector.extract_strided_slice %352 {offsets = [0, 32], sizes = [2, 32], strides = [1, 1]} : vector<2x64xf32> to vector<2x32xf32>
    %c12_85 = arith.constant 12 : index
    %c32_86 = arith.constant 32 : index
    %356 = vector.load %arg14[%c12_85, %c32_86] : memref<16x64xf32, #tpu.memory_space<vmem>>, vector<2x32xf32>
    tpu.vector_store %arg14[%c12_85, %c32_86], %355 {strides = array<i32>} : memref<16x64xf32, #tpu.memory_space<vmem>>, vector<2x32xf32>,
    %357 = vector.extract_strided_slice %291 {offsets = [4, 0], sizes = [2, 192], strides = [1, 1]} : vector<16x192xf32> to vector<2x192xf32>
    %358 = vector.extract_strided_slice %291 {offsets = [10, 0], sizes = [2, 192], strides = [1, 1]} : vector<16x192xf32> to vector<2x192xf32>
    %359 = vector.shape_cast %18 : vector<1x192xi1> to vector<1x192xi1>
    %360 = vector.broadcast %359 : vector<1x192xi1> to vector<2x192xi1>
    %361 = arith.select %360, %357, %358 : vector<2x192xi1>, vector<2x192xf32>
    %cst_87 = arith.constant dense<0.000000e+00> : vector<2x192xf32>
    %362 = tpu.matmul %352, %285, %cst_87 {dimension_numbers = #tpu.dot_dimension_numbers<[1], [0], [0], [1], [0, 0, 1, 1], [], []>} : vector<2x64xf32>, vector<64x192xf32>, vector<2x192xf32> -> vector<2x192xf32>
    %363 = vector.extract_strided_slice %361 {offsets = [0, 0], sizes = [2, 128], strides = [1, 1]} : vector<2x192xf32> to vector<2x128xf32>
    %364 = vector.extract_strided_slice %362 {offsets = [0, 0], sizes = [2, 128], strides = [1, 1]} : vector<2x192xf32> to vector<2x128xf32>
    %365 = arith.addf %363, %364 : vector<2x128xf32>
    %366 = arith.negf %365 : vector<2x128xf32>
    %367 = math.exp %366 : vector<2x128xf32>
    %cst_88 = arith.constant 1.000000e+00 : f32
    %368 = vector.broadcast %cst_88 : f32 to vector<2x128xf32>
    %369 = arith.addf %368, %367 : vector<2x128xf32>
    %370 = arith.divf %368, %369 : vector<2x128xf32>
    %371 = vector.extract_strided_slice %370 {offsets = [0, 0], sizes = [2, 64], strides = [1, 1]} : vector<2x128xf32> to vector<2x64xf32>
    %372 = vector.extract_strided_slice %370 {offsets = [0, 64], sizes = [2, 64], strides = [1, 1]} : vector<2x128xf32> to vector<2x64xf32>
    %373 = vector.extract_strided_slice %361 {offsets = [0, 128], sizes = [2, 64], strides = [1, 1]} : vector<2x192xf32> to vector<2x64xf32>
    %374 = vector.extract_strided_slice %362 {offsets = [0, 128], sizes = [2, 64], strides = [1, 1]} : vector<2x192xf32> to vector<2x64xf32>
    %375 = vector.broadcast %286 : vector<1x64xf32> to vector<2x64xf32>
    %376 = arith.addf %374, %375 : vector<2x64xf32>
    %377 = arith.mulf %371, %376 : vector<2x64xf32>
    %378 = arith.addf %373, %377 : vector<2x64xf32>
    %379 = math.tanh %378 : vector<2x64xf32>
    %cst_89 = arith.constant 1.000000e+00 : f32
    %380 = vector.broadcast %cst_89 : f32 to vector<2x64xf32>
    %381 = arith.subf %380, %372 : vector<2x64xf32>
    %382 = arith.mulf %381, %379 : vector<2x64xf32>
    %383 = arith.mulf %372, %352 : vector<2x64xf32>
    %384 = arith.addf %382, %383 : vector<2x64xf32>
    %385 = vector.extract_strided_slice %384 {offsets = [0, 0], sizes = [2, 32], strides = [1, 1]} : vector<2x64xf32> to vector<2x32xf32>
    %c4_90 = arith.constant 4 : index
    %c0_91 = arith.constant 0 : index
    %386 = vector.load %arg14[%c4_90, %c0_91] : memref<16x64xf32, #tpu.memory_space<vmem>>, vector<2x32xf32>
    tpu.vector_store %arg14[%c4_90, %c0_91], %385 {strides = array<i32>} : memref<16x64xf32, #tpu.memory_space<vmem>>, vector<2x32xf32>,
    %387 = vector.extract_strided_slice %384 {offsets = [0, 32], sizes = [2, 32], strides = [1, 1]} : vector<2x64xf32> to vector<2x32xf32>
    %c10_92 = arith.constant 10 : index
    %c32_93 = arith.constant 32 : index
    %388 = vector.load %arg14[%c10_92, %c32_93] : memref<16x64xf32, #tpu.memory_space<vmem>>, vector<2x32xf32>
    tpu.vector_store %arg14[%c10_92, %c32_93], %387 {strides = array<i32>} : memref<16x64xf32, #tpu.memory_space<vmem>>, vector<2x32xf32>,
    %389 = vector.extract_strided_slice %291 {offsets = [6, 0], sizes = [2, 192], strides = [1, 1]} : vector<16x192xf32> to vector<2x192xf32>
    %390 = vector.extract_strided_slice %291 {offsets = [8, 0], sizes = [2, 192], strides = [1, 1]} : vector<16x192xf32> to vector<2x192xf32>
    %391 = vector.shape_cast %18 : vector<1x192xi1> to vector<1x192xi1>
    %392 = vector.broadcast %391 : vector<1x192xi1> to vector<2x192xi1>
    %393 = arith.select %392, %389, %390 : vector<2x192xi1>, vector<2x192xf32>
    %cst_94 = arith.constant dense<0.000000e+00> : vector<2x192xf32>
    %394 = tpu.matmul %384, %285, %cst_94 {dimension_numbers = #tpu.dot_dimension_numbers<[1], [0], [0], [1], [0, 0, 1, 1], [], []>} : vector<2x64xf32>, vector<64x192xf32>, vector<2x192xf32> -> vector<2x192xf32>
    %395 = vector.extract_strided_slice %393 {offsets = [0, 0], sizes = [2, 128], strides = [1, 1]} : vector<2x192xf32> to vector<2x128xf32>
    %396 = vector.extract_strided_slice %394 {offsets = [0, 0], sizes = [2, 128], strides = [1, 1]} : vector<2x192xf32> to vector<2x128xf32>
    %397 = arith.addf %395, %396 : vector<2x128xf32>
    %398 = arith.negf %397 : vector<2x128xf32>
    %399 = math.exp %398 : vector<2x128xf32>
    %cst_95 = arith.constant 1.000000e+00 : f32
    %400 = vector.broadcast %cst_95 : f32 to vector<2x128xf32>
    %401 = arith.addf %400, %399 : vector<2x128xf32>
    %402 = arith.divf %400, %401 : vector<2x128xf32>
    %403 = vector.extract_strided_slice %402 {offsets = [0, 0], sizes = [2, 64], strides = [1, 1]} : vector<2x128xf32> to vector<2x64xf32>
    %404 = vector.extract_strided_slice %402 {offsets = [0, 64], sizes = [2, 64], strides = [1, 1]} : vector<2x128xf32> to vector<2x64xf32>
    %405 = vector.extract_strided_slice %393 {offsets = [0, 128], sizes = [2, 64], strides = [1, 1]} : vector<2x192xf32> to vector<2x64xf32>
    %406 = vector.extract_strided_slice %394 {offsets = [0, 128], sizes = [2, 64], strides = [1, 1]} : vector<2x192xf32> to vector<2x64xf32>
    %407 = vector.broadcast %286 : vector<1x64xf32> to vector<2x64xf32>
    %408 = arith.addf %406, %407 : vector<2x64xf32>
    %409 = arith.mulf %403, %408 : vector<2x64xf32>
    %410 = arith.addf %405, %409 : vector<2x64xf32>
    %411 = math.tanh %410 : vector<2x64xf32>
    %cst_96 = arith.constant 1.000000e+00 : f32
    %412 = vector.broadcast %cst_96 : f32 to vector<2x64xf32>
    %413 = arith.subf %412, %404 : vector<2x64xf32>
    %414 = arith.mulf %413, %411 : vector<2x64xf32>
    %415 = arith.mulf %404, %384 : vector<2x64xf32>
    %416 = arith.addf %414, %415 : vector<2x64xf32>
    %417 = vector.extract_strided_slice %416 {offsets = [0, 0], sizes = [2, 32], strides = [1, 1]} : vector<2x64xf32> to vector<2x32xf32>
    %c6_97 = arith.constant 6 : index
    %c0_98 = arith.constant 0 : index
    %418 = vector.load %arg14[%c6_97, %c0_98] : memref<16x64xf32, #tpu.memory_space<vmem>>, vector<2x32xf32>
    tpu.vector_store %arg14[%c6_97, %c0_98], %417 {strides = array<i32>} : memref<16x64xf32, #tpu.memory_space<vmem>>, vector<2x32xf32>,
    %419 = vector.extract_strided_slice %416 {offsets = [0, 32], sizes = [2, 32], strides = [1, 1]} : vector<2x64xf32> to vector<2x32xf32>
    %c8_99 = arith.constant 8 : index
    %c32_100 = arith.constant 32 : index
    %420 = vector.load %arg14[%c8_99, %c32_100] : memref<16x64xf32, #tpu.memory_space<vmem>>, vector<2x32xf32>
    tpu.vector_store %arg14[%c8_99, %c32_100], %419 {strides = array<i32>} : memref<16x64xf32, #tpu.memory_space<vmem>>, vector<2x32xf32>,
    %421 = vector.extract_strided_slice %291 {offsets = [8, 0], sizes = [2, 192], strides = [1, 1]} : vector<16x192xf32> to vector<2x192xf32>
    %422 = vector.extract_strided_slice %291 {offsets = [6, 0], sizes = [2, 192], strides = [1, 1]} : vector<16x192xf32> to vector<2x192xf32>
    %423 = vector.shape_cast %18 : vector<1x192xi1> to vector<1x192xi1>
    %424 = vector.broadcast %423 : vector<1x192xi1> to vector<2x192xi1>
    %425 = arith.select %424, %421, %422 : vector<2x192xi1>, vector<2x192xf32>
    %cst_101 = arith.constant dense<0.000000e+00> : vector<2x192xf32>
    %426 = tpu.matmul %416, %285, %cst_101 {dimension_numbers = #tpu.dot_dimension_numbers<[1], [0], [0], [1], [0, 0, 1, 1], [], []>} : vector<2x64xf32>, vector<64x192xf32>, vector<2x192xf32> -> vector<2x192xf32>
    %427 = vector.extract_strided_slice %425 {offsets = [0, 0], sizes = [2, 128], strides = [1, 1]} : vector<2x192xf32> to vector<2x128xf32>
    %428 = vector.extract_strided_slice %426 {offsets = [0, 0], sizes = [2, 128], strides = [1, 1]} : vector<2x192xf32> to vector<2x128xf32>
    %429 = arith.addf %427, %428 : vector<2x128xf32>
    %430 = arith.negf %429 : vector<2x128xf32>
    %431 = math.exp %430 : vector<2x128xf32>
    %cst_102 = arith.constant 1.000000e+00 : f32
    %432 = vector.broadcast %cst_102 : f32 to vector<2x128xf32>
    %433 = arith.addf %432, %431 : vector<2x128xf32>
    %434 = arith.divf %432, %433 : vector<2x128xf32>
    %435 = vector.extract_strided_slice %434 {offsets = [0, 0], sizes = [2, 64], strides = [1, 1]} : vector<2x128xf32> to vector<2x64xf32>
    %436 = vector.extract_strided_slice %434 {offsets = [0, 64], sizes = [2, 64], strides = [1, 1]} : vector<2x128xf32> to vector<2x64xf32>
    %437 = vector.extract_strided_slice %425 {offsets = [0, 128], sizes = [2, 64], strides = [1, 1]} : vector<2x192xf32> to vector<2x64xf32>
    %438 = vector.extract_strided_slice %426 {offsets = [0, 128], sizes = [2, 64], strides = [1, 1]} : vector<2x192xf32> to vector<2x64xf32>
    %439 = vector.broadcast %286 : vector<1x64xf32> to vector<2x64xf32>
    %440 = arith.addf %438, %439 : vector<2x64xf32>
    %441 = arith.mulf %435, %440 : vector<2x64xf32>
    %442 = arith.addf %437, %441 : vector<2x64xf32>
    %443 = math.tanh %442 : vector<2x64xf32>
    %cst_103 = arith.constant 1.000000e+00 : f32
    %444 = vector.broadcast %cst_103 : f32 to vector<2x64xf32>
    %445 = arith.subf %444, %436 : vector<2x64xf32>
    %446 = arith.mulf %445, %443 : vector<2x64xf32>
    %447 = arith.mulf %436, %416 : vector<2x64xf32>
    %448 = arith.addf %446, %447 : vector<2x64xf32>
    %449 = vector.extract_strided_slice %448 {offsets = [0, 0], sizes = [2, 32], strides = [1, 1]} : vector<2x64xf32> to vector<2x32xf32>
    %c8_104 = arith.constant 8 : index
    %c0_105 = arith.constant 0 : index
    %450 = vector.load %arg14[%c8_104, %c0_105] : memref<16x64xf32, #tpu.memory_space<vmem>>, vector<2x32xf32>
    tpu.vector_store %arg14[%c8_104, %c0_105], %449 {strides = array<i32>} : memref<16x64xf32, #tpu.memory_space<vmem>>, vector<2x32xf32>,
    %451 = vector.extract_strided_slice %448 {offsets = [0, 32], sizes = [2, 32], strides = [1, 1]} : vector<2x64xf32> to vector<2x32xf32>
    %c6_106 = arith.constant 6 : index
    %c32_107 = arith.constant 32 : index
    %452 = vector.load %arg14[%c6_106, %c32_107] : memref<16x64xf32, #tpu.memory_space<vmem>>, vector<2x32xf32>
    tpu.vector_store %arg14[%c6_106, %c32_107], %451 {strides = array<i32>} : memref<16x64xf32, #tpu.memory_space<vmem>>, vector<2x32xf32>,
    %453 = vector.extract_strided_slice %291 {offsets = [10, 0], sizes = [2, 192], strides = [1, 1]} : vector<16x192xf32> to vector<2x192xf32>
    %454 = vector.extract_strided_slice %291 {offsets = [4, 0], sizes = [2, 192], strides = [1, 1]} : vector<16x192xf32> to vector<2x192xf32>
    %455 = vector.shape_cast %18 : vector<1x192xi1> to vector<1x192xi1>
    %456 = vector.broadcast %455 : vector<1x192xi1> to vector<2x192xi1>
    %457 = arith.select %456, %453, %454 : vector<2x192xi1>, vector<2x192xf32>
    %cst_108 = arith.constant dense<0.000000e+00> : vector<2x192xf32>
    %458 = tpu.matmul %448, %285, %cst_108 {dimension_numbers = #tpu.dot_dimension_numbers<[1], [0], [0], [1], [0, 0, 1, 1], [], []>} : vector<2x64xf32>, vector<64x192xf32>, vector<2x192xf32> -> vector<2x192xf32>
    %459 = vector.extract_strided_slice %457 {offsets = [0, 0], sizes = [2, 128], strides = [1, 1]} : vector<2x192xf32> to vector<2x128xf32>
    %460 = vector.extract_strided_slice %458 {offsets = [0, 0], sizes = [2, 128], strides = [1, 1]} : vector<2x192xf32> to vector<2x128xf32>
    %461 = arith.addf %459, %460 : vector<2x128xf32>
    %462 = arith.negf %461 : vector<2x128xf32>
    %463 = math.exp %462 : vector<2x128xf32>
    %cst_109 = arith.constant 1.000000e+00 : f32
    %464 = vector.broadcast %cst_109 : f32 to vector<2x128xf32>
    %465 = arith.addf %464, %463 : vector<2x128xf32>
    %466 = arith.divf %464, %465 : vector<2x128xf32>
    %467 = vector.extract_strided_slice %466 {offsets = [0, 0], sizes = [2, 64], strides = [1, 1]} : vector<2x128xf32> to vector<2x64xf32>
    %468 = vector.extract_strided_slice %466 {offsets = [0, 64], sizes = [2, 64], strides = [1, 1]} : vector<2x128xf32> to vector<2x64xf32>
    %469 = vector.extract_strided_slice %457 {offsets = [0, 128], sizes = [2, 64], strides = [1, 1]} : vector<2x192xf32> to vector<2x64xf32>
    %470 = vector.extract_strided_slice %458 {offsets = [0, 128], sizes = [2, 64], strides = [1, 1]} : vector<2x192xf32> to vector<2x64xf32>
    %471 = vector.broadcast %286 : vector<1x64xf32> to vector<2x64xf32>
    %472 = arith.addf %470, %471 : vector<2x64xf32>
    %473 = arith.mulf %467, %472 : vector<2x64xf32>
    %474 = arith.addf %469, %473 : vector<2x64xf32>
    %475 = math.tanh %474 : vector<2x64xf32>
    %cst_110 = arith.constant 1.000000e+00 : f32
    %476 = vector.broadcast %cst_110 : f32 to vector<2x64xf32>
    %477 = arith.subf %476, %468 : vector<2x64xf32>
    %478 = arith.mulf %477, %475 : vector<2x64xf32>
    %479 = arith.mulf %468, %448 : vector<2x64xf32>
    %480 = arith.addf %478, %479 : vector<2x64xf32>
    %481 = vector.extract_strided_slice %480 {offsets = [0, 0], sizes = [2, 32], strides = [1, 1]} : vector<2x64xf32> to vector<2x32xf32>
    %c10_111 = arith.constant 10 : index
    %c0_112 = arith.constant 0 : index
    %482 = vector.load %arg14[%c10_111, %c0_112] : memref<16x64xf32, #tpu.memory_space<vmem>>, vector<2x32xf32>
    tpu.vector_store %arg14[%c10_111, %c0_112], %481 {strides = array<i32>} : memref<16x64xf32, #tpu.memory_space<vmem>>, vector<2x32xf32>,
    %483 = vector.extract_strided_slice %480 {offsets = [0, 32], sizes = [2, 32], strides = [1, 1]} : vector<2x64xf32> to vector<2x32xf32>
    %c4_113 = arith.constant 4 : index
    %c32_114 = arith.constant 32 : index
    %484 = vector.load %arg14[%c4_113, %c32_114] : memref<16x64xf32, #tpu.memory_space<vmem>>, vector<2x32xf32>
    tpu.vector_store %arg14[%c4_113, %c32_114], %483 {strides = array<i32>} : memref<16x64xf32, #tpu.memory_space<vmem>>, vector<2x32xf32>,
    %485 = vector.extract_strided_slice %291 {offsets = [12, 0], sizes = [2, 192], strides = [1, 1]} : vector<16x192xf32> to vector<2x192xf32>
    %486 = vector.extract_strided_slice %291 {offsets = [2, 0], sizes = [2, 192], strides = [1, 1]} : vector<16x192xf32> to vector<2x192xf32>
    %487 = vector.shape_cast %18 : vector<1x192xi1> to vector<1x192xi1>
    %488 = vector.broadcast %487 : vector<1x192xi1> to vector<2x192xi1>
    %489 = arith.select %488, %485, %486 : vector<2x192xi1>, vector<2x192xf32>
    %cst_115 = arith.constant dense<0.000000e+00> : vector<2x192xf32>
    %490 = tpu.matmul %480, %285, %cst_115 {dimension_numbers = #tpu.dot_dimension_numbers<[1], [0], [0], [1], [0, 0, 1, 1], [], []>} : vector<2x64xf32>, vector<64x192xf32>, vector<2x192xf32> -> vector<2x192xf32>
    %491 = vector.extract_strided_slice %489 {offsets = [0, 0], sizes = [2, 128], strides = [1, 1]} : vector<2x192xf32> to vector<2x128xf32>
    %492 = vector.extract_strided_slice %490 {offsets = [0, 0], sizes = [2, 128], strides = [1, 1]} : vector<2x192xf32> to vector<2x128xf32>
    %493 = arith.addf %491, %492 : vector<2x128xf32>
    %494 = arith.negf %493 : vector<2x128xf32>
    %495 = math.exp %494 : vector<2x128xf32>
    %cst_116 = arith.constant 1.000000e+00 : f32
    %496 = vector.broadcast %cst_116 : f32 to vector<2x128xf32>
    %497 = arith.addf %496, %495 : vector<2x128xf32>
    %498 = arith.divf %496, %497 : vector<2x128xf32>
    %499 = vector.extract_strided_slice %498 {offsets = [0, 0], sizes = [2, 64], strides = [1, 1]} : vector<2x128xf32> to vector<2x64xf32>
    %500 = vector.extract_strided_slice %498 {offsets = [0, 64], sizes = [2, 64], strides = [1, 1]} : vector<2x128xf32> to vector<2x64xf32>
    %501 = vector.extract_strided_slice %489 {offsets = [0, 128], sizes = [2, 64], strides = [1, 1]} : vector<2x192xf32> to vector<2x64xf32>
    %502 = vector.extract_strided_slice %490 {offsets = [0, 128], sizes = [2, 64], strides = [1, 1]} : vector<2x192xf32> to vector<2x64xf32>
    %503 = vector.broadcast %286 : vector<1x64xf32> to vector<2x64xf32>
    %504 = arith.addf %502, %503 : vector<2x64xf32>
    %505 = arith.mulf %499, %504 : vector<2x64xf32>
    %506 = arith.addf %501, %505 : vector<2x64xf32>
    %507 = math.tanh %506 : vector<2x64xf32>
    %cst_117 = arith.constant 1.000000e+00 : f32
    %508 = vector.broadcast %cst_117 : f32 to vector<2x64xf32>
    %509 = arith.subf %508, %500 : vector<2x64xf32>
    %510 = arith.mulf %509, %507 : vector<2x64xf32>
    %511 = arith.mulf %500, %480 : vector<2x64xf32>
    %512 = arith.addf %510, %511 : vector<2x64xf32>
    %513 = vector.extract_strided_slice %512 {offsets = [0, 0], sizes = [2, 32], strides = [1, 1]} : vector<2x64xf32> to vector<2x32xf32>
    %c12_118 = arith.constant 12 : index
    %c0_119 = arith.constant 0 : index
    %514 = vector.load %arg14[%c12_118, %c0_119] : memref<16x64xf32, #tpu.memory_space<vmem>>, vector<2x32xf32>
    tpu.vector_store %arg14[%c12_118, %c0_119], %513 {strides = array<i32>} : memref<16x64xf32, #tpu.memory_space<vmem>>, vector<2x32xf32>,
    %515 = vector.extract_strided_slice %512 {offsets = [0, 32], sizes = [2, 32], strides = [1, 1]} : vector<2x64xf32> to vector<2x32xf32>
    %c2_120 = arith.constant 2 : index
    %c32_121 = arith.constant 32 : index
    %516 = vector.load %arg14[%c2_120, %c32_121] : memref<16x64xf32, #tpu.memory_space<vmem>>, vector<2x32xf32>
    tpu.vector_store %arg14[%c2_120, %c32_121], %515 {strides = array<i32>} : memref<16x64xf32, #tpu.memory_space<vmem>>, vector<2x32xf32>,
    %517 = vector.extract_strided_slice %291 {offsets = [14, 0], sizes = [2, 192], strides = [1, 1]} : vector<16x192xf32> to vector<2x192xf32>
    %518 = vector.extract_strided_slice %291 {offsets = [0, 0], sizes = [2, 192], strides = [1, 1]} : vector<16x192xf32> to vector<2x192xf32>
    %519 = vector.shape_cast %18 : vector<1x192xi1> to vector<1x192xi1>
    %520 = vector.broadcast %519 : vector<1x192xi1> to vector<2x192xi1>
    %521 = arith.select %520, %517, %518 : vector<2x192xi1>, vector<2x192xf32>
    %cst_122 = arith.constant dense<0.000000e+00> : vector<2x192xf32>
    %522 = tpu.matmul %512, %285, %cst_122 {dimension_numbers = #tpu.dot_dimension_numbers<[1], [0], [0], [1], [0, 0, 1, 1], [], []>} : vector<2x64xf32>, vector<64x192xf32>, vector<2x192xf32> -> vector<2x192xf32>
    %523 = vector.extract_strided_slice %521 {offsets = [0, 0], sizes = [2, 128], strides = [1, 1]} : vector<2x192xf32> to vector<2x128xf32>
    %524 = vector.extract_strided_slice %522 {offsets = [0, 0], sizes = [2, 128], strides = [1, 1]} : vector<2x192xf32> to vector<2x128xf32>
    %525 = arith.addf %523, %524 : vector<2x128xf32>
    %526 = arith.negf %525 : vector<2x128xf32>
    %527 = math.exp %526 : vector<2x128xf32>
    %cst_123 = arith.constant 1.000000e+00 : f32
    %528 = vector.broadcast %cst_123 : f32 to vector<2x128xf32>
    %529 = arith.addf %528, %527 : vector<2x128xf32>
    %530 = arith.divf %528, %529 : vector<2x128xf32>
    %531 = vector.extract_strided_slice %530 {offsets = [0, 0], sizes = [2, 64], strides = [1, 1]} : vector<2x128xf32> to vector<2x64xf32>
    %532 = vector.extract_strided_slice %530 {offsets = [0, 64], sizes = [2, 64], strides = [1, 1]} : vector<2x128xf32> to vector<2x64xf32>
    %533 = vector.extract_strided_slice %521 {offsets = [0, 128], sizes = [2, 64], strides = [1, 1]} : vector<2x192xf32> to vector<2x64xf32>
    %534 = vector.extract_strided_slice %522 {offsets = [0, 128], sizes = [2, 64], strides = [1, 1]} : vector<2x192xf32> to vector<2x64xf32>
    %535 = vector.broadcast %286 : vector<1x64xf32> to vector<2x64xf32>
    %536 = arith.addf %534, %535 : vector<2x64xf32>
    %537 = arith.mulf %531, %536 : vector<2x64xf32>
    %538 = arith.addf %533, %537 : vector<2x64xf32>
    %539 = math.tanh %538 : vector<2x64xf32>
    %cst_124 = arith.constant 1.000000e+00 : f32
    %540 = vector.broadcast %cst_124 : f32 to vector<2x64xf32>
    %541 = arith.subf %540, %532 : vector<2x64xf32>
    %542 = arith.mulf %541, %539 : vector<2x64xf32>
    %543 = arith.mulf %532, %512 : vector<2x64xf32>
    %544 = arith.addf %542, %543 : vector<2x64xf32>
    %545 = vector.extract_strided_slice %544 {offsets = [0, 0], sizes = [2, 32], strides = [1, 1]} : vector<2x64xf32> to vector<2x32xf32>
    %c14_125 = arith.constant 14 : index
    %c0_126 = arith.constant 0 : index
    %546 = vector.load %arg14[%c14_125, %c0_126] : memref<16x64xf32, #tpu.memory_space<vmem>>, vector<2x32xf32>
    tpu.vector_store %arg14[%c14_125, %c0_126], %545 {strides = array<i32>} : memref<16x64xf32, #tpu.memory_space<vmem>>, vector<2x32xf32>,
    %547 = vector.extract_strided_slice %544 {offsets = [0, 32], sizes = [2, 32], strides = [1, 1]} : vector<2x64xf32> to vector<2x32xf32>
    %c0_127 = arith.constant 0 : index
    %c32_128 = arith.constant 32 : index
    %548 = vector.load %arg14[%c0_127, %c32_128] : memref<16x64xf32, #tpu.memory_space<vmem>>, vector<2x32xf32>
    tpu.vector_store %arg14[%c0_127, %c32_128], %547 {strides = array<i32>} : memref<16x64xf32, #tpu.memory_space<vmem>>, vector<2x32xf32>,
    %c0_129 = arith.constant 0 : index
    %c0_130 = arith.constant 0 : index
    %549 = vector.load %arg14[%c0_129, %c0_130] : memref<16x64xf32, #tpu.memory_space<vmem>>, vector<16x64xf32>
    %c0_131 = arith.constant 0 : index
    %c0_132 = arith.constant 0 : index
    %550 = vector.load %arg10[%c0_131, %c0_132] : memref<1x64xf32, #tpu.memory_space<vmem>>, vector<1x64xf32>
    %551 = vector.broadcast %550 : vector<1x64xf32> to vector<16x64xf32>
    %552 = arith.mulf %549, %551 : vector<16x64xf32>
    %cst_133 = arith.constant dense<0.000000e+00> : vector<16xf32>
    %553 = vector.multi_reduction <add>, %552, %cst_133 [1] : vector<16x64xf32> to vector<16xf32>
    %554 = vector.shape_cast %553 : vector<16xf32> to vector<16x1xf32>
    %c0_134 = arith.constant 0 : index
    %c0_135 = arith.constant 0 : index
    %555 = vector.load %arg11[%c0_134, %c0_135] : memref<1x1xf32, #tpu.memory_space<vmem>>, vector<1x1xf32>
    %556 = vector.broadcast %555 : vector<1x1xf32> to vector<16x1xf32>
    %557 = arith.addf %554, %556 : vector<16x1xf32>
    %558 = vector.extract_strided_slice %557 {offsets = [0, 0], sizes = [2, 1], strides = [1, 1]} : vector<16x1xf32> to vector<2x1xf32>
    %559 = vector.extract_strided_slice %557 {offsets = [2, 0], sizes = [2, 1], strides = [1, 1]} : vector<16x1xf32> to vector<2x1xf32>
    %560 = vector.extract_strided_slice %557 {offsets = [4, 0], sizes = [2, 1], strides = [1, 1]} : vector<16x1xf32> to vector<2x1xf32>
    %561 = vector.extract_strided_slice %557 {offsets = [6, 0], sizes = [2, 1], strides = [1, 1]} : vector<16x1xf32> to vector<2x1xf32>
    %562 = vector.extract_strided_slice %557 {offsets = [8, 0], sizes = [2, 1], strides = [1, 1]} : vector<16x1xf32> to vector<2x1xf32>
    %563 = vector.extract_strided_slice %557 {offsets = [10, 0], sizes = [2, 1], strides = [1, 1]} : vector<16x1xf32> to vector<2x1xf32>
    %564 = vector.extract_strided_slice %557 {offsets = [12, 0], sizes = [2, 1], strides = [1, 1]} : vector<16x1xf32> to vector<2x1xf32>
    %565 = vector.extract_strided_slice %557 {offsets = [14, 0], sizes = [2, 1], strides = [1, 1]} : vector<16x1xf32> to vector<2x1xf32>
    %566 = arith.maximumf %558, %559 : vector<2x1xf32>
    %567 = arith.maximumf %566, %560 : vector<2x1xf32>
    %568 = arith.maximumf %567, %561 : vector<2x1xf32>
    %569 = arith.maximumf %568, %562 : vector<2x1xf32>
    %570 = arith.maximumf %569, %563 : vector<2x1xf32>
    %571 = arith.maximumf %570, %564 : vector<2x1xf32>
    %572 = arith.maximumf %571, %565 : vector<2x1xf32>
    %573 = arith.subf %558, %572 : vector<2x1xf32>
    %574 = math.exp %573 : vector<2x1xf32>
    %575 = arith.subf %559, %572 : vector<2x1xf32>
    %576 = math.exp %575 : vector<2x1xf32>
    %577 = arith.subf %560, %572 : vector<2x1xf32>
    %578 = math.exp %577 : vector<2x1xf32>
    %579 = arith.subf %561, %572 : vector<2x1xf32>
    %580 = math.exp %579 : vector<2x1xf32>
    %581 = arith.subf %562, %572 : vector<2x1xf32>
    %582 = math.exp %581 : vector<2x1xf32>
    %583 = arith.subf %563, %572 : vector<2x1xf32>
    %584 = math.exp %583 : vector<2x1xf32>
    %585 = arith.subf %564, %572 : vector<2x1xf32>
    %586 = math.exp %585 : vector<2x1xf32>
    %587 = arith.subf %565, %572 : vector<2x1xf32>
    %588 = math.exp %587 : vector<2x1xf32>
    %589 = arith.addf %574, %576 : vector<2x1xf32>
    %590 = arith.addf %589, %578 : vector<2x1xf32>
    %591 = arith.addf %590, %580 : vector<2x1xf32>
    %592 = arith.addf %591, %582 : vector<2x1xf32>
    %593 = arith.addf %592, %584 : vector<2x1xf32>
    %594 = arith.addf %593, %586 : vector<2x1xf32>
    %595 = arith.addf %594, %588 : vector<2x1xf32>
    %cst_136 = arith.constant 1.000000e+00 : f32
    %596 = vector.broadcast %cst_136 : f32 to vector<2x1xf32>
    %597 = arith.divf %596, %595 : vector<2x1xf32>
    %cst_137 = arith.constant 0.000000e+00 : f32
    %598 = vector.broadcast %cst_137 : f32 to vector<2x64xf32>
    %599 = arith.mulf %574, %597 : vector<2x1xf32>
    %600 = vector.extract_strided_slice %549 {offsets = [0, 0], sizes = [2, 64], strides = [1, 1]} : vector<16x64xf32> to vector<2x64xf32>
    %601 = vector.broadcast %599 : vector<2x1xf32> to vector<2x64xf32>
    %602 = arith.mulf %601, %600 : vector<2x64xf32>
    %603 = arith.addf %598, %602 : vector<2x64xf32>
    %604 = arith.mulf %576, %597 : vector<2x1xf32>
    %605 = vector.extract_strided_slice %549 {offsets = [2, 0], sizes = [2, 64], strides = [1, 1]} : vector<16x64xf32> to vector<2x64xf32>
    %606 = vector.broadcast %604 : vector<2x1xf32> to vector<2x64xf32>
    %607 = arith.mulf %606, %605 : vector<2x64xf32>
    %608 = arith.addf %603, %607 : vector<2x64xf32>
    %609 = arith.mulf %578, %597 : vector<2x1xf32>
    %610 = vector.extract_strided_slice %549 {offsets = [4, 0], sizes = [2, 64], strides = [1, 1]} : vector<16x64xf32> to vector<2x64xf32>
    %611 = vector.broadcast %609 : vector<2x1xf32> to vector<2x64xf32>
    %612 = arith.mulf %611, %610 : vector<2x64xf32>
    %613 = arith.addf %608, %612 : vector<2x64xf32>
    %614 = arith.mulf %580, %597 : vector<2x1xf32>
    %615 = vector.extract_strided_slice %549 {offsets = [6, 0], sizes = [2, 64], strides = [1, 1]} : vector<16x64xf32> to vector<2x64xf32>
    %616 = vector.broadcast %614 : vector<2x1xf32> to vector<2x64xf32>
    %617 = arith.mulf %616, %615 : vector<2x64xf32>
    %618 = arith.addf %613, %617 : vector<2x64xf32>
    %619 = arith.mulf %582, %597 : vector<2x1xf32>
    %620 = vector.extract_strided_slice %549 {offsets = [8, 0], sizes = [2, 64], strides = [1, 1]} : vector<16x64xf32> to vector<2x64xf32>
    %621 = vector.broadcast %619 : vector<2x1xf32> to vector<2x64xf32>
    %622 = arith.mulf %621, %620 : vector<2x64xf32>
    %623 = arith.addf %618, %622 : vector<2x64xf32>
    %624 = arith.mulf %584, %597 : vector<2x1xf32>
    %625 = vector.extract_strided_slice %549 {offsets = [10, 0], sizes = [2, 64], strides = [1, 1]} : vector<16x64xf32> to vector<2x64xf32>
    %626 = vector.broadcast %624 : vector<2x1xf32> to vector<2x64xf32>
    %627 = arith.mulf %626, %625 : vector<2x64xf32>
    %628 = arith.addf %623, %627 : vector<2x64xf32>
    %629 = arith.mulf %586, %597 : vector<2x1xf32>
    %630 = vector.extract_strided_slice %549 {offsets = [12, 0], sizes = [2, 64], strides = [1, 1]} : vector<16x64xf32> to vector<2x64xf32>
    %631 = vector.broadcast %629 : vector<2x1xf32> to vector<2x64xf32>
    %632 = arith.mulf %631, %630 : vector<2x64xf32>
    %633 = arith.addf %628, %632 : vector<2x64xf32>
    %634 = arith.mulf %588, %597 : vector<2x1xf32>
    %635 = vector.extract_strided_slice %549 {offsets = [14, 0], sizes = [2, 64], strides = [1, 1]} : vector<16x64xf32> to vector<2x64xf32>
    %636 = vector.broadcast %634 : vector<2x1xf32> to vector<2x64xf32>
    %637 = arith.mulf %636, %635 : vector<2x64xf32>
    %638 = arith.addf %633, %637 : vector<2x64xf32>
    %c0_138 = arith.constant 0 : index
    %c0_139 = arith.constant 0 : index
    %639 = vector.load %arg12[%c0_138, %c0_139] : memref<2x64xf32, #tpu.memory_space<vmem>>, vector<2x64xf32>
    tpu.vector_store %arg12[%c0_138, %c0_139], %638 {strides = array<i32>} : memref<2x64xf32, #tpu.memory_space<vmem>>, vector<2x64xf32>,
    %640 = tpu.concatenate %599, %604, %609, %614, %619, %624, %629, %634 in 1 : vector<2x1xf32>, vector<2x1xf32>, vector<2x1xf32>, vector<2x1xf32>, vector<2x1xf32>, vector<2x1xf32>, vector<2x1xf32>, vector<2x1xf32> -> vector<2x8xf32>
    %c0_140 = arith.constant 0 : index
    %c0_141 = arith.constant 0 : index
    %641 = vector.load %arg13[%c0_140, %c0_141] : memref<2x8xf32, #tpu.memory_space<vmem>>, vector<2x8xf32>
    tpu.vector_store %arg13[%c0_140, %c0_141], %640 {strides = array<i32>} : memref<2x8xf32, #tpu.memory_space<vmem>>, vector<2x8xf32>,
    return
  }
  func.func @transform_0(%arg0: i32) -> (i32, i32) {
    %c0_i32 = arith.constant 0 : i32
    %c0_i32_0 = arith.constant 0 : i32
    %c0_i32_1 = arith.constant 0 : i32
    return %c0_i32, %c0_i32_0 : i32, i32
  }
  func.func @transform_1(%arg0: i32) -> (i32, i32) {
    %c0_i32 = arith.constant 0 : i32
    %c0_i32_0 = arith.constant 0 : i32
    %c0_i32_1 = arith.constant 0 : i32
    return %c0_i32, %c0_i32_0 : i32, i32
  }
  func.func @transform_2(%arg0: i32) -> (i32, i32) {
    %c0_i32 = arith.constant 0 : i32
    %c0_i32_0 = arith.constant 0 : i32
    %c0_i32_1 = arith.constant 0 : i32
    return %c0_i32, %c0_i32_0 : i32, i32
  }
  func.func @transform_3(%arg0: i32) -> (i32, i32) {
    %c0_i32 = arith.constant 0 : i32
    %c0_i32_0 = arith.constant 0 : i32
    %c0_i32_1 = arith.constant 0 : i32
    return %c0_i32, %c0_i32_0 : i32, i32
  }
  func.func @transform_4(%arg0: i32) -> (i32, i32) {
    %c0_i32 = arith.constant 0 : i32
    %c0_i32_0 = arith.constant 0 : i32
    %c0_i32_1 = arith.constant 0 : i32
    return %c0_i32, %c0_i32_0 : i32, i32
  }
  func.func @transform_5(%arg0: i32) -> (i32, i32) {
    %c0_i32 = arith.constant 0 : i32
    %c0_i32_0 = arith.constant 0 : i32
    %c0_i32_1 = arith.constant 0 : i32
    return %c0_i32, %c0_i32_0 : i32, i32
  }
  func.func @transform_6(%arg0: i32) -> (i32, i32) {
    %c0_i32 = arith.constant 0 : i32
    %c0_i32_0 = arith.constant 0 : i32
    %c0_i32_1 = arith.constant 0 : i32
    return %c0_i32, %c0_i32_0 : i32, i32
  }
  func.func @transform_7(%arg0: i32) -> (i32, i32) {
    %c0_i32 = arith.constant 0 : i32
    %c0_i32_0 = arith.constant 0 : i32
    %c0_i32_1 = arith.constant 0 : i32
    return %c0_i32, %c0_i32_0 : i32, i32
  }
  func.func @transform_8(%arg0: i32) -> (i32, i32) {
    %c0_i32 = arith.constant 0 : i32
    %c0_i32_0 = arith.constant 0 : i32
    %c0_i32_1 = arith.constant 0 : i32
    return %c0_i32, %c0_i32_0 : i32, i32
  }
  func.func @transform_9(%arg0: i32) -> (i32, i32) {
    %c0_i32 = arith.constant 0 : i32
    %c0_i32_0 = arith.constant 0 : i32
    %c0_i32_1 = arith.constant 0 : i32
    return %c0_i32, %c0_i32_0 : i32, i32
  }
  func.func @transform_10(%arg0: i32) -> (i32, i32) {
    %c0_i32 = arith.constant 0 : i32
    %c0_i32_0 = arith.constant 0 : i32
    %c0_i32_1 = arith.constant 0 : i32
    return %c0_i32, %c0_i32_0 : i32, i32
  }
  func.func @transform_11(%arg0: i32) -> (i32, i32) {
    %c0_i32 = arith.constant 0 : i32
    %c0_i32_0 = arith.constant 0 : i32
    %c0_i32_1 = arith.constant 0 : i32
    return %c0_i32, %c0_i32_0 : i32, i32
  }
  func.func @transform_12(%arg0: i32) -> (i32, i32) {
    %c0_i32 = arith.constant 0 : i32
    %c0_i32_0 = arith.constant 0 : i32
    %c0_i32_1 = arith.constant 0 : i32
    return %c0_i32, %c0_i32_0 : i32, i32
  }
}

</mosaic_0001>

<bundles_post_ra>
// kernel: temporal_encoder_forward.1
= control target key start
LH: loop header
LB: loop body
LE: loop exit
PB: predicated region body
PF: predicated region fallthrough
CT: control target
= control target key end

     0   :  { %s3656_s0 = inlined_call_operand.vmem [shape: f32[16,16], index: 0, kind: input, shape index: {}]   ;;  %s3657_s1 = inlined_call_operand.vmem [shape: f32[16,192], index: 1, kind: input, shape index: {}]   ;;  %s3658_s2 = inlined_call_operand.hbm [shape: f32[64,192], index: 2, kind: input, shape index: {}]   ;;  %s3659_s3 = inlined_call_operand.vmem [shape: f32[1,192], index: 3, kind: input, shape index: {}]   ;;  %s3660_s4 = inlined_call_operand.vmem [shape: f32[1,64], index: 4, kind: input, shape index: {}]   ;;  %s3661_s5 = inlined_call_operand.hbm [shape: f32[64,192], index: 5, kind: input, shape index: {}]   ;;  %s3662_s6 = inlined_call_operand.hbm [shape: f32[64,192], index: 6, kind: input, shape index: {}]   ;;  %s3663_s7 = inlined_call_operand.vmem [shape: f32[1,192], index: 7, kind: input, shape index: {}]   ;;  %s3664_s8 = inlined_call_operand.vmem [shape: f32[1,64], index: 8, kind: input, shape index: {}]   ;;  %s3665_s9 = inlined_call_operand.vmem [shape: f32[1,64], index: 9, kind: input, shape index: {}]   ;;  %s3666_s10 = inlined_call_operand.<no memory space> [shape: f32[1,1], index: 10, kind: input, shape index: {}]   ;;  %s3667_s11 = inlined_call_operand.hbm [shape: f32[2,64], index: 11, kind: output, shape index: {0}]   ;;  %s3668_s12 = inlined_call_operand.hbm [shape: f32[2,8], index: 12, kind: output, shape index: {1}]  }
   0x1   :  { %v18_v0 = vstv %s3666_s10 }
   0x2   :  { %19 = vst [vmem:[#allocation3] sm:$0x1] %v18_v0 }
   0x3   :  { %20 = vsyncpa [#allocation5], 0 }
   0x4   :  { %21 = vsyncpa [#allocation8], 0 }
   0x5   :  { %22 = vsyncpa [#allocation6], 0 }
   0x6   :  { %23 = vsyncpa [#allocation12], 0  ;;  %s2973_s23 = smov [#allocation7]   ;;  %s2974_s25 = smov [#allocation4]  }
   0x7   :  { %s49_s24 = sshll.u32 %s2973_s23, 4  ;;  %s33_s26 = sshll.u32 %s2974_s25, 4  ;;  %s50_s24 = int_to_ptr.vmem [resolvable:$true] %s49_s24  ;;  %s3058_s26 = int_to_ptr.vmem [resolvable:$true] %s33_s26 }
   0x8   :  { %s2855_s29 = scalar_lea.hbm %s3661_s5, 2048 }
   0x9   :  { %p2856_p0 = scmp.ne.s32.totalorder %s3661_s5, %s2855_s29  ;;  %p2859_p1 = scmp.lt.u32.totalorder %s2855_s29, %s3661_s5 }
   0xb   :  { %p2861_p2 = pnand %p2859_p1, %p2856_p0 }
   0xd   :  { %2864 = shalt.err (!%p2861_p2)
}
   0xe   :  { %s2865_s15 = scalar_lea.vmem %s50_s24, 2048  ;;  %p2870_p4 = scmp.lt.s32.totalorder %s50_s24, %s50_s24 }
   0xf   :  { %p2866_p3 = scmp.ne.s32.totalorder %s50_s24, %s2865_s15  ;;  %p2871_p5 = scmp.lt.s32.totalorder %s2865_s15, %s2865_s15 }
  0x11   :  { %p2872_p6 = por %p2871_p5, %p2870_p4 }
  0x13   :  { %p2873_p7 = pnand %p2872_p6, %p2866_p3 }
  0x15   :  { %2876 = shalt.err (!%p2873_p7)
}
  0x16   :  { %s2975_s16 = smov 256   ;;  %s2976_s17 = smov 16  }
  0x17   :  { %55 = dma.hbm_to_vmem [thread:$0]  %s3661_s5, 2048, %s50_s24, [#allocation8], %s2975_s16, %s2975_s16, %s2976_s17  }
  0x18   :  { %s2877_s22 = scalar_lea.hbm %s3658_s2, 2048 }
  0x19   :  { %p2878_p8 = scmp.ne.s32.totalorder %s3658_s2, %s2877_s22  ;;  %p2881_p9 = scmp.lt.u32.totalorder %s2877_s22, %s3658_s2 }
  0x1b   :  { %p2883_p10 = pnand %p2881_p9, %p2878_p8 }
  0x1d   :  { %2886 = shalt.err (!%p2883_p10)
}
  0x1e   :  { %s2887_s29 = scalar_lea.vmem %s3058_s26, 2048  ;;  %p2892_p12 = scmp.lt.s32.totalorder %s3058_s26, %s3058_s26 }
  0x1f   :  { %p2888_p11 = scmp.ne.s32.totalorder %s3058_s26, %s2887_s29  ;;  %p2893_p13 = scmp.lt.s32.totalorder %s2887_s29, %s2887_s29 }
  0x21   :  { %p2894_p0 = por %p2893_p13, %p2892_p12 }
  0x23   :  { %p2895_p1 = pnand %p2894_p0, %p2888_p11 }
  0x25   :  { %2898 = shalt.err (!%p2895_p1)
}
  0x26   :  { %39 = dma.hbm_to_vmem [thread:$0]  %s3658_s2, 2048, %s3058_s26, [#allocation5], %s2975_s16, %s2975_s16, %s2976_s17  }
  0x27   :  { %s2977_s30 = smov [#allocation9]   ;;  %s2899_s15 = scalar_lea.hbm %s3662_s6, 2048 }
  0x28   :  { %s61_s13 = sshll.u32 %s2977_s30, 4  ;;  %p2900_p2 = scmp.ne.s32.totalorder %s3662_s6, %s2899_s15  ;;  %s62_s13 = int_to_ptr.vmem [resolvable:$true] %s61_s13 }
  0x29   :  { %p2903_p3 = scmp.lt.u32.totalorder %s2899_s15, %s3662_s6 }
  0x2b   :  { %p2905_p4 = pnand %p2903_p3, %p2900_p2 }
  0x2d   :  { %2908 = shalt.err (!%p2905_p4)
}
  0x2e   :  { %s2909_s22 = scalar_lea.vmem %s62_s13, 2048  ;;  %p2914_p6 = scmp.lt.s32.totalorder %s62_s13, %s62_s13 }
  0x2f   :  { %p2910_p5 = scmp.ne.s32.totalorder %s62_s13, %s2909_s22  ;;  %p2915_p7 = scmp.lt.s32.totalorder %s2909_s22, %s2909_s22 }
  0x31   :  { %p2916_p8 = por %p2915_p7, %p2914_p6 }
  0x33   :  { %p2917_p9 = pnand %p2916_p8, %p2910_p5 }
  0x35   :  { %2920 = shalt.err (!%p2917_p9)
}
  0x36   :  { %67 = dma.hbm_to_vmem [thread:$0]  %s3662_s6, 2048, %s62_s13, [#allocation8], %s2975_s16, %s2975_s16, %s2976_s17  }
  0x37   :  { %2965 = dma.done.wait [#allocation5], 2048  }
  0x38   :  { %2966 = vsyncadd [#allocation5], 4294965248 }
  0x39   :  { %2967 = dma.done.wait [#allocation8], 4096  }
  0x3a   :  { %2968 = vsyncadd [#allocation8], 4294963200  ;;  %v2978_v1 = vmov 0.0   ;;  %v134_v2 = vld [vmem:[%s3657_s1 + $0x8] sm:$0xff]  ;;  %v136_v3 = vld [vmem:[%s3657_s1 + $0x18] sm:$0xff]  ;;  %vm149_vm0 = vcmask 130048   ;;  %v85_v34 = vlaneseq }
  0x3b   :  { %220 = vmatprep.mubr.f32.mxu0 %v2978_v1  ;;  %313 = vmatprep.mubr.f32.mxu1 %v2978_v1  ;;  %v117_v4 = vld [vmem:[#allocation4 + $0x8] sm:$0xff]  ;;  %v2446_v5 = vpack.c.bf16 %v136_v3, %v134_v2  ;;  %v119_v6 = vld [vmem:[#allocation4 + $0x18] sm:$0xff]  ;;  %v116_v11 = vld [vmem:[#allocation4] sm:$0xff]  ;;  %s2979_s14 = smov 64   ;;  %vm349_vm3 = vcmask 254976   ;;  %vm351_vm4 = vcmask 517376  }
  0x3c   :  { %v133_v7 = vld [vmem:[%s3657_s1] sm:$0xff]  ;;  %v135_v8 = vld [vmem:[%s3657_s1 + $0x10] sm:$0xff]  ;;  %v3124_v9 = vpack.c.bf16 %v119_v6, %v117_v4  ;;  %v115_v28 = vld [vmem:[%s3656_s0 + $0x8] sm:$0xff]  ;;  %v3178_v35 = vshrl.u32 %v85_v34, 7  ;;  %v86_v36 = vand.u32 127, %v85_v34  ;;  %vm245_vm5 = vcmask 523264  }
  0x3d   :  { %v2448_v10 = vpack.c.bf16 %v135_v8, %v133_v7  ;;  %v118_v12 = vld [vmem:[#allocation4 + $0x10] sm:$0xff]  ;;  %2447 = vmatprep.subr.bf16.mxu0 %v2446_v5  ;;  %v121_v14 = vld [vmem:[#allocation4 + $0x28] sm:$0xff]  ;;  %v123_v15 = vld [vmem:[#allocation4 + $0x38] sm:$0xff]  ;;  %vm463_vm6 = vcmask 257026   ;;  %vm465_vm7 = vcmask 519426   ;;  %vm685_vm8 = vcmask 261126  }
  0x3e   :  { %v3126_v13 = vpack.c.bf16 %v118_v12, %v116_v11  ;;  %v120_v16 = vld [vmem:[#allocation4 + $0x20] sm:$0xff]  ;;  %2451 = vmatprep.subr.bf16.mxu1 %v3124_v9  ;;  %v114_v17 = vld [vmem:[%s3656_s0] sm:$0xff]  ;;  %v3132_v18 = vpack.c.bf16 %v123_v15, %v121_v14  ;;  %v127_v22 = vld [vmem:[#allocation4 + $0x58] sm:$0xff]  ;;  %v141_v37 = vsub.s32 0, %v3178_v35  ;;  %v145_v39 = vsub.s32 1, %v3178_v35  ;;  %s2982_s20 = smov 3  }
  0x3f   :  { %2449 = vmatpush1.bf16.msra.mxu0 %v2448_v10  ;;  %v122_v19 = vld [vmem:[#allocation4 + $0x30] sm:$0xff]  ;;  %v125_v20 = vld [vmem:[#allocation4 + $0x48] sm:$0xff]  ;;  %v124_v24 = vld [vmem:[#allocation4 + $0x40] sm:$0xff]  ;;  %v87_v40 = vadd.s32 128, %v86_v36  ;;  %v92_v43 = vand.u32 63, %v86_v36  ;;  %vm687_vm9 = vcmask 523526  }
  0x40   :  { %2453 = vmatpush1.bf16.msra.mxu1 %v3126_v13  ;;  %v3135_v21 = vpack.c.bf16 %v122_v19, %v120_v16  ;;  %2467 = vmatprep.subr.bf16.mxu0 %v3124_v9  ;;  %v3139_v23 = vpack.c.bf16 %v127_v22, %v125_v20  ;;  %v126_v25 = vld [vmem:[#allocation4 + $0x50] sm:$0xff]  ;;  %v129_v26 = vld [vmem:[#allocation4 + $0x68] sm:$0xff]  ;;  %v131_v27 = vld [vmem:[#allocation4 + $0x78] sm:$0xff]  ;;  %vm574_vm10 = vcmask 259076   ;;  %vm576_vm11 = vcmask 521476   ;;  %s2983_s21 = smov 5  }
  0x41   :  { %2455 = vmatprep.subr.bf16.mxu1 %v3132_v18  ;;  %v3148_v29 = vpack.c.bf16 %v126_v25, %v124_v24  ;;  %v3152_v30 = vpack.c.bf16 %v131_v27, %v129_v26  ;;  %v128_v31 = vld [vmem:[#allocation4 + $0x60] sm:$0xff]  ;;  %v130_v32 = vld [vmem:[#allocation4 + $0x70] sm:$0xff]  ;;  %v99_v45 = vand.u32 63, %v87_v40  ;;  %vm3189_vm1 = vcmp.lt.s32.totalorder %v92_v43, 32  ;;  %v3233_v16 = vld [vmem:[%s3660_s4] ss:$0 sm:$0xff] }
  0x42   :  { %2408 = vmatmul.mubr.msk.f32.vlgmr.msra.gmra.mrb[0].mxu0 %vm149_vm0, %v114_v17  ;;  %v3158_v33 = vpack.c.bf16 %v130_v32, %v128_v31  ;;  %v137_v38 = vld [vmem:[%s3659_s3] sm:$0x3]  ;;  %s2984_s22 = smov 7   ;;  %s2985_s2 = smov 4   ;;  %vm2333_vm12 = vcmask 517120   ;;  %vm2362_vm13 = vcmask 7168  }
  0x43   :  { %226 = vmatprep.mubr.f32.mxu0 %v2978_v1  ;;  %2469 = vmatpush1.bf16.msra.mxu0 %v3126_v13  ;;  %v142_v41 = vrot.slane %v137_v38, %v141_v37  ;;  %v146_v42 = vrot.slane %v137_v38, %v145_v39  ;;  %vm3193_vm2 = vcmp.lt.s32.totalorder %v99_v45, 32  ;;  %v3470_v51 = vld [vmem:[%s3664_s8] ss:$0 sm:$0xff]  ;;  %s2986_s26 = smov 2   ;;  %s2987_s23 = smov 6   ;;  %vm2364_vm14 = vcmask 15360  }
  0x44   :  { %2457 = vmatpush1.bf16.msra.mxu1 %v3135_v21  ;;  %2471 = vmatprep.subr.bf16.mxu0 %v3132_v18  ;;  %s2988_s25 = smov [#allocation10]   ;;  %vm2366_vm15 = vcmask 23552  }
  0x45   :  { %2459 = vmatprep.subr.bf16.mxu1 %v3139_v23  ;;  %s2384_s27 = sshll.u32 %s2988_s25, 4  ;;  %s2385_s27 = int_to_ptr.vmem [resolvable:$true] %s2384_s27 }
  0x46   :  { %2409 = vmatmul.mubr.msk.f32.gmra.mrb[2].mxu0 %vm149_vm0, %v115_v28  ;;  %vm2368_vm0 = vcmask 31744   ;;  %s2921_s28 = scalar_lea.vmem %s2385_s27, 32  ;;  %p2926_p11 = scmp.lt.s32.totalorder %s2385_s27, %s2385_s27 }
  0x47   :  { %2473 = vmatpush1.bf16.msra.mxu0 %v3135_v21  ;;  %425 = vmatprep.mubr.f32.mxu0 %v2978_v1  ;;  %p2922_p10 = scmp.ne.s32.totalorder %s2385_s27, %s2921_s28  ;;  %p2927_p12 = scmp.lt.s32.totalorder %s2921_s28, %s2921_s28 }
  0x48   :  { %2461 = vmatpush1.bf16.msra.mxu1 %v3148_v29  ;;  %2475 = vmatprep.subr.bf16.mxu0 %v3139_v23 }
  0x49   :  { %2463 = vmatprep.subr.bf16.mxu1 %v3152_v30  ;;  %p2928_p13 = por %p2927_p12, %p2926_p11 }
  0x4b   :  { %2477 = vmatpush1.bf16.msra.mxu0 %v3148_v29  ;;  %p2929_p0 = pnand %p2928_p13, %p2922_p10 }
  0x4c   :  { %2465 = vmatpush1.bf16.msra.mxu1 %v3158_v33  ;;  %2479 = vmatprep.subr.bf16.mxu0 %v3152_v30 }
  0x4d   :  { %2483 = vmatprep.subr.bf16.mxu1 %v3124_v9 }
  0x4f   :  { %314 = vmatmul.mubr.f32.vlgmr.msra.gmra.mrb[0].mxu1 %v2978_v1  ;;  %2481 = vmatpush1.bf16.msra.mxu0 %v3158_v33 }
  0x50   :  { %2485 = vmatpush1.bf16.msra.mxu1 %v3126_v13  ;;  %536 = vmatprep.mubr.f32.mxu1 %v2978_v1 }
  0x51   :  { %2487 = vmatprep.subr.bf16.mxu1 %v3132_v18  ;;  %2499 = vmatprep.subr.bf16.mxu0 %v3124_v9 }
  0x54   :  { %2489 = vmatpush1.bf16.msra.mxu1 %v3135_v21 }
  0x55   :  { %2491 = vmatprep.subr.bf16.mxu1 %v3139_v23 }
  0x58   :  { %2493 = vmatpush1.bf16.msra.mxu1 %v3148_v29 }
  0x59   :  { %2495 = vmatprep.subr.bf16.mxu1 %v3152_v30 }
  0x5c   :  { %2497 = vmatpush1.bf16.msra.mxu1 %v3158_v33 }
  0x5d   :  { %2515 = vmatprep.subr.bf16.mxu1 %v3124_v9 }
 0x115   :  { %v222_v44 = vpop.f32.mrb[0].mxu0 }
 0x116   :  { %v223_v46 = vadd.f32 %v222_v44, %v142_v41  ;;  %v224_v47 = vpop.f32.mrb[1].mxu0 }
 0x117   :  { %v225_v48 = vadd.f32 %v224_v47, %v146_v42 }
 0x118   :  { %v691_v49 = vrot.slane %v223_v46, 6  ;;  %v799_v50 = vrot.slane %v223_v46, 2 }
 0x119   :  { %v692_v52 = vrot.slane %v225_v48, 6  ;;  %v800_v53 = vrot.slane %v225_v48, 2  ;;  %v228_v54 = vpop.f32.mrb[2].mxu0 }
 0x11a   :  { %v229_v56 = vadd.f32 %v228_v54, %v142_v41  ;;  %v230_v57 = vpop.f32.mrb[3].mxu0 }
 0x11b   :  { %v231_v58 = vadd.f32 %v230_v57, %v146_v42 }
 0x11c   :  { %v239_v59 = vrot.slane %v229_v56, 6  ;;  %v353_v60 = vrot.slane %v229_v56, 2  ;;  %v3199_v61 = vsel %vm3189_vm1, %v229_v56, %v691_v49  ;;  %v3203_v62 = vsel %vm3189_vm1, %v229_v56, %v799_v50 }
 0x11d   :  { %v240_v63 = vrot.slane %v231_v58, 6  ;;  %v354_v0 = vrot.slane %v231_v58, 2  ;;  %v3207_v2 = vsel %vm3193_vm2, %v231_v58, %v692_v52  ;;  %v3211_v3 = vsel %vm3193_vm2, %v231_v58, %v800_v53 }
 0x11e   :  { %v3215_v4 = vsel %vm3189_vm1, %v223_v46, %v239_v59  ;;  %v3219_v5 = vsel %vm3189_vm1, %v223_v46, %v353_v60 }
 0x11f   :  { %v3223_v6 = vsel %vm3193_vm2, %v225_v48, %v240_v63  ;;  %v3227_v7 = vsel %vm3193_vm2, %v225_v48, %v354_v0 }
 0x122   :  { %v315_v8 = vpop.f32.mrb[0].mxu1 }
 0x123   :  { %v320_v10 = vadd.f32 %v315_v8, %v3215_v4  ;;  %v317_v11 = vpop.f32.mrb[1].mxu1 }
 0x124   :  { %v333_v17 = vadd.f32 %v3233_v16, %v317_v11 }
 0x125   :  { %v2410_v12 = vmul.f32 -1.442695, %v320_v10 }
 0x127   :  { %2741 = vpow2.f32 %v2410_v12 }
 0x131   :  { %v2742_v14 = vpop.eup %2741 }
 0x132   :  { %v324_v15 = vadd.f32 1.0, %v2742_v14 }
 0x134   :  { %2743 = vrcp.f32 %v324_v15 }
 0x13e   :  { %v2744_v19 = vpop.eup %2743 }
 0x13f   :  { %v334_v20 = vmul.f32 %v2744_v19, %v333_v17  ;;  %v337_v25 = vsub.f32 1.0, %v2744_v19  ;;  %v343_v27 = vmul.f32 0.0, %v2744_v19 }
 0x141   :  { %v335_v22 = vadd.f32 %v334_v20, %v3223_v6 }
 0x143   :  { %2745 = vtanh.f32 %v335_v22 }
 0x14d   :  { %v2746_v24 = vpop.eup %2745 }
 0x14e   :  { %339 = vrot.lane.b32.xlu0 %v2746_v24, %s2979_s14 }
 0x1c0   :  { %v340_v26 = vpop.permute.xlu0 %339 }
 0x1c1   :  { %v342_v28 = vmul.f32 %v340_v26, %v337_v25 }
 0x1c3   :  { %v344_v31 = vadd.f32 %v343_v27, %v342_v28 }
 0x1c5   :  { %346 = vrot.lane.b32.xlu0 %v344_v31, %s2979_s14  ;;  %v455_v45 = vrot.slane %v344_v31, 6 }
 0x237   :  { %v347_v32 = vpop.permute.xlu0 %346 }
 0x238   :  { %350 = vst.msk [vmem:[#allocation2] sm:$0x3] %vm349_vm3, %v347_v32  ;;  %2412 = vmatmul.mubr.msk.f32.vlgmr.msra.gmra.mrb[4].mxu0 %vm245_vm5, %v347_v32 }
 0x239   :  { %352 = vst.msk [vmem:[#allocation2 + $0xe] sm:$0x3] %vm351_vm4, %v347_v32  ;;  %2501 = vmatpush1.bf16.msra.mxu0 %v3126_v13  ;;  %647 = vmatprep.mubr.f32.mxu0 %v2978_v1 }
 0x23a   :  { %2503 = vmatprep.subr.bf16.mxu0 %v3132_v18 }
 0x23d   :  { %2505 = vmatpush1.bf16.msra.mxu0 %v3135_v21 }
 0x23e   :  { %2507 = vmatprep.subr.bf16.mxu0 %v3139_v23 }
 0x241   :  { %2509 = vmatpush1.bf16.msra.mxu0 %v3148_v29 }
 0x242   :  { %2511 = vmatprep.subr.bf16.mxu0 %v3152_v30 }
 0x245   :  { %2513 = vmatpush1.bf16.msra.mxu0 %v3158_v33 }
 0x246   :  { %2531 = vmatprep.subr.bf16.mxu0 %v3124_v9 }
 0x30b   :  { %v427_v34 = vpop.f32.mrb[4].mxu0 }
 0x30c   :  { %v433_v36 = vrot.slane %v427_v34, 6  ;;  %v429_v38 = vpop.f32.mrb[5].mxu0 }
 0x30d   :  { %v442_v44 = vadd.f32 %v3233_v16, %v429_v38 }
 0x30e   :  { %v435_v40 = vadd.f32 %v433_v36, %v3219_v5 }
 0x30f   :  { %v444_v46 = vrot.slane %v442_v44, 6 }
 0x310   :  { %v2413_v41 = vmul.f32 -1.442695, %v435_v40 }
 0x312   :  { %2747 = vpow2.f32 %v2413_v41 }
 0x31c   :  { %v2748_v42 = vpop.eup %2747 }
 0x31d   :  { %v439_v43 = vadd.f32 1.0, %v2748_v42 }
 0x31f   :  { %2749 = vrcp.f32 %v439_v43 }
 0x329   :  { %v2750_v47 = vpop.eup %2749 }
 0x32a   :  { %v446_v48 = vmul.f32 %v2750_v47, %v444_v46  ;;  %v457_v49 = vmul.f32 %v2750_v47, %v455_v45  ;;  %v449_v53 = vsub.f32 1.0, %v2750_v47 }
 0x32c   :  { %v447_v50 = vadd.f32 %v446_v48, %v3227_v7 }
 0x32e   :  { %2751 = vtanh.f32 %v447_v50 }
 0x338   :  { %v2752_v52 = vpop.eup %2751 }
 0x339   :  { %451 = vrot.lane.b32.xlu1 %v2752_v52, %s2979_s14 }
 0x3ab   :  { %v452_v54 = vpop.permute.xlu1 %451 }
 0x3ac   :  { %v454_v56 = vmul.f32 %v452_v54, %v449_v53 }
 0x3ae   :  { %v3255_v57 = vadd.f32 %v457_v49, %v454_v56 }
 0x3b0   :  { %v467_v58 = vrot.slane %v3255_v57, 2  ;;  %v566_v25 = vrot.slane %v3255_v57, 6 }
 0x3b2   :  { %468 = vrot.lane.b32.xlu1 %v467_v58, %s2979_s14 }
 0x424   :  { %v469_v59 = vpop.permute.xlu1 %468 }
 0x425   :  { %2414 = vmatmul.mubr.msk.f32.vlgmr.msra.gmra.mrb[2].mxu1 %vm245_vm5, %v469_v59 }
 0x426   :  { %2517 = vmatpush1.bf16.msra.mxu1 %v3126_v13  ;;  %766 = vmatprep.mubr.f32.mxu1 %v2978_v1 }
 0x427   :  { %2519 = vmatprep.subr.bf16.mxu1 %v3132_v18 }
 0x42a   :  { %2521 = vmatpush1.bf16.msra.mxu1 %v3135_v21 }
 0x42b   :  { %2523 = vmatprep.subr.bf16.mxu1 %v3139_v23 }
 0x42e   :  { %2525 = vmatpush1.bf16.msra.mxu1 %v3148_v29 }
 0x42f   :  { %2527 = vmatprep.subr.bf16.mxu1 %v3152_v30 }
 0x432   :  { %2529 = vmatpush1.bf16.msra.mxu1 %v3158_v33 }
 0x433   :  { %2547 = vmatprep.subr.bf16.mxu1 %v3124_v9 }
 0x4f8   :  { %v538_v60 = vpop.f32.mrb[2].mxu1 }
 0x4f9   :  { %v544_v63 = vrot.slane %v538_v60, 4  ;;  %v540_v0 = vpop.f32.mrb[3].mxu1 }
 0x4fa   :  { %v553_v14 = vadd.f32 %v3233_v16, %v540_v0 }
 0x4fb   :  { %v546_v8 = vadd.f32 %v544_v63, %v3215_v4 }
 0x4fc   :  { %v555_v15 = vrot.slane %v553_v14, 4 }
 0x4fd   :  { %v2415_v10 = vmul.f32 -1.442695, %v546_v8 }
 0x4ff   :  { %2753 = vpow2.f32 %v2415_v10 }
 0x509   :  { %v2754_v11 = vpop.eup %2753 }
 0x50a   :  { %v550_v12 = vadd.f32 1.0, %v2754_v11 }
 0x50c   :  { %2755 = vrcp.f32 %v550_v12 }
 0x516   :  { %v2756_v17 = vpop.eup %2755 }
 0x517   :  { %v557_v19 = vmul.f32 %v2756_v17, %v555_v15  ;;  %v560_v24 = vsub.f32 1.0, %v2756_v17  ;;  %v568_v26 = vmul.f32 %v2756_v17, %v566_v25 }
 0x519   :  { %v558_v20 = vadd.f32 %v557_v19, %v3223_v6 }
 0x51b   :  { %2757 = vtanh.f32 %v558_v20 }
 0x525   :  { %v2758_v22 = vpop.eup %2757 }
 0x526   :  { %562 = vrot.lane.b32.xlu0 %v2758_v22, %s2979_s14 }
 0x598   :  { %v563_v4 = vpop.permute.xlu0 %562 }
 0x599   :  { %v565_v27 = vmul.f32 %v563_v4, %v560_v24 }
 0x59b   :  { %v3274_v28 = vadd.f32 %v568_v26, %v565_v27 }
 0x59d   :  { %v578_v31 = vrot.slane %v3274_v28, 4  ;;  %v677_v49 = vrot.slane %v3274_v28, 6 }
 0x59f   :  { %579 = vrot.lane.b32.xlu1 %v578_v31, %s2979_s14 }
 0x611   :  { %v580_v32 = vpop.permute.xlu1 %579 }
 0x612   :  { %2416 = vmatmul.mubr.msk.f32.vlgmr.msra.gmra.mrb[6].mxu0 %vm245_vm5, %v580_v32 }
 0x613   :  { %2533 = vmatpush1.bf16.msra.mxu0 %v3126_v13  ;;  %871 = vmatprep.mubr.f32.mxu0 %v2978_v1 }
 0x614   :  { %2535 = vmatprep.subr.bf16.mxu0 %v3132_v18 }
 0x617   :  { %2537 = vmatpush1.bf16.msra.mxu0 %v3135_v21 }
 0x618   :  { %2539 = vmatprep.subr.bf16.mxu0 %v3139_v23 }
 0x61b   :  { %2541 = vmatpush1.bf16.msra.mxu0 %v3148_v29 }
 0x61c   :  { %2543 = vmatprep.subr.bf16.mxu0 %v3152_v30 }
 0x61f   :  { %2545 = vmatpush1.bf16.msra.mxu0 %v3158_v33 }
 0x620   :  { %2563 = vmatprep.subr.bf16.mxu0 %v3124_v9 }
 0x6e5   :  { %v649_v6 = vpop.f32.mrb[6].mxu0 }
 0x6e6   :  { %v655_v34 = vrot.slane %v649_v6, 2  ;;  %v651_v36 = vpop.f32.mrb[7].mxu0 }
 0x6e7   :  { %v664_v43 = vadd.f32 %v3233_v16, %v651_v36 }
 0x6e8   :  { %v657_v38 = vadd.f32 %v655_v34, %v3219_v5 }
 0x6e9   :  { %v666_v44 = vrot.slane %v664_v43, 2 }
 0x6ea   :  { %v2417_v40 = vmul.f32 -1.442695, %v657_v38 }
 0x6ec   :  { %2759 = vpow2.f32 %v2417_v40 }
 0x6f6   :  { %v2760_v41 = vpop.eup %2759 }
 0x6f7   :  { %v661_v42 = vadd.f32 1.0, %v2760_v41 }
 0x6f9   :  { %2761 = vrcp.f32 %v661_v42 }
 0x703   :  { %v2762_v45 = vpop.eup %2761 }
 0x704   :  { %v668_v46 = vmul.f32 %v2762_v45, %v666_v44  ;;  %v671_v9 = vsub.f32 1.0, %v2762_v45  ;;  %v679_v50 = vmul.f32 %v2762_v45, %v677_v49 }
 0x706   :  { %v669_v47 = vadd.f32 %v668_v46, %v3227_v7 }
 0x708   :  { %2763 = vtanh.f32 %v669_v47 }
 0x712   :  { %v2764_v48 = vpop.eup %2763 }
 0x713   :  { %673 = vrot.lane.b32.xlu0 %v2764_v48, %s2979_s14 }
 0x785   :  { %v674_v5 = vpop.permute.xlu0 %673 }
 0x786   :  { %v676_v52 = vmul.f32 %v674_v5, %v671_v9 }
 0x788   :  { %v3293_v53 = vadd.f32 %v679_v50, %v676_v52 }
 0x78a   :  { %v697_v54 = vrot.slane %v3293_v53, 6 }
 0x78c   :  { %698 = vrot.lane.b32.xlu1 %v697_v54, %s2979_s14 }
 0x7fe   :  { %v699_v56 = vpop.permute.xlu1 %698 }
 0x7ff   :  { %2418 = vmatmul.mubr.msk.f32.vlgmr.msra.gmra.mrb[4].mxu1 %vm245_vm5, %v699_v56 }
 0x800   :  { %2549 = vmatpush1.bf16.msra.mxu1 %v3126_v13  ;;  %980 = vmatprep.mubr.f32.mxu1 %v2978_v1 }
 0x801   :  { %2551 = vmatprep.subr.bf16.mxu1 %v3132_v18 }
 0x804   :  { %2553 = vmatpush1.bf16.msra.mxu1 %v3135_v21 }
 0x805   :  { %2555 = vmatprep.subr.bf16.mxu1 %v3139_v23 }
 0x808   :  { %2557 = vmatpush1.bf16.msra.mxu1 %v3148_v29 }
 0x809   :  { %2559 = vmatprep.subr.bf16.mxu1 %v3152_v30 }
 0x80c   :  { %2561 = vmatpush1.bf16.msra.mxu1 %v3158_v33 }
 0x8d2   :  { %v768_v7 = vpop.f32.mrb[4].mxu1 }
 0x8d3   :  { %v773_v58 = vadd.f32 %v768_v7, %v3199_v61  ;;  %v770_v59 = vpop.f32.mrb[5].mxu1 }
 0x8d4   :  { %v780_v8 = vadd.f32 %v3233_v16, %v770_v59 }
 0x8d5   :  { %v2419_v60 = vmul.f32 -1.442695, %v773_v58 }
 0x8d7   :  { %2765 = vpow2.f32 %v2419_v60 }
 0x8e1   :  { %v2766_v63 = vpop.eup %2765 }
 0x8e2   :  { %v777_v0 = vadd.f32 1.0, %v2766_v63 }
 0x8e4   :  { %2767 = vrcp.f32 %v777_v0 }
 0x8ee   :  { %v2768_v10 = vpop.eup %2767 }
 0x8ef   :  { %v781_v11 = vmul.f32 %v2768_v10, %v780_v8  ;;  %v784_v15 = vsub.f32 1.0, %v2768_v10  ;;  %v791_v19 = vmul.f32 %v2768_v10, %v697_v54 }
 0x8f1   :  { %v782_v12 = vadd.f32 %v781_v11, %v3207_v2 }
 0x8f3   :  { %2769 = vtanh.f32 %v782_v12 }
 0x8fd   :  { %v2770_v14 = vpop.eup %2769 }
 0x8fe   :  { %786 = vrot.lane.b32.xlu0 %v2770_v14, %s2979_s14 }
 0x970   :  { %v787_v17 = vpop.permute.xlu0 %786 }
 0x971   :  { %v789_v20 = vmul.f32 %v787_v17, %v784_v15 }
 0x973   :  { %v792_v22 = vadd.f32 %v791_v19, %v789_v20 }
 0x975   :  { %794 = vrot.lane.b32.xlu1 %v792_v22, %s2979_s14 }
 0x9e7   :  { %v3311_v24 = vpop.permute.xlu1 %794 }
 0x9e8   :  { %2420 = vmatmul.mubr.msk.f32.vlgmr.msra.gmra.mrb[8].mxu0 %vm245_vm5, %v3311_v24 }
 0x9e9   :  { %2565 = vmatpush1.bf16.msra.mxu0 %v3126_v13  ;;  %1089 = vmatprep.mubr.f32.mxu0 %v2978_v1 }
 0x9ea   :  { %2567 = vmatprep.subr.bf16.mxu0 %v3132_v18 }
 0x9ed   :  { %2569 = vmatpush1.bf16.msra.mxu0 %v3135_v21  ;;  %v901_v21 = vrot.slane %v792_v22, 6 }
 0x9ee   :  { %2571 = vmatprep.subr.bf16.mxu0 %v3139_v23 }
 0x9f1   :  { %2573 = vmatpush1.bf16.msra.mxu0 %v3148_v29 }
 0x9f2   :  { %2575 = vmatprep.subr.bf16.mxu0 %v3152_v30 }
 0x9f5   :  { %2577 = vmatpush1.bf16.msra.mxu0 %v3158_v33 }
 0xabb   :  { %v873_v25 = vpop.f32.mrb[8].mxu0 }
 0xabc   :  { %v879_v4 = vrot.slane %v873_v25, 6  ;;  %v875_v26 = vpop.f32.mrb[9].mxu0 }
 0xabd   :  { %v888_v18 = vadd.f32 %v3233_v16, %v875_v26 }
 0xabe   :  { %v881_v27 = vadd.f32 %v879_v4, %v3203_v62 }
 0xabf   :  { %v890_v23 = vrot.slane %v888_v18, 6 }
 0xac0   :  { %v2421_v13 = vmul.f32 -1.442695, %v881_v27 }
 0xac2   :  { %2771 = vpow2.f32 %v2421_v13 }
 0xacc   :  { %v2772_v31 = vpop.eup %2771 }
 0xacd   :  { %v885_v32 = vadd.f32 1.0, %v2772_v31  ;;  %v1151_v31 = vld [vmem:[#allocation7 + $0x18] sm:$0xff] }
 0xacf   :  { %2773 = vrcp.f32 %v885_v32  ;;  %v1148_v32 = vld [vmem:[#allocation7] sm:$0xff] }
 0xad9   :  { %v2774_v6 = vpop.eup %2773 }
 0xada   :  { %v892_v29 = vmul.f32 %v2774_v6, %v890_v23  ;;  %v903_v34 = vmul.f32 %v2774_v6, %v901_v21  ;;  %v895_v36 = vsub.f32 1.0, %v2774_v6  ;;  %v1150_v21 = vld [vmem:[#allocation7 + $0x10] sm:$0xff]  ;;  %v1153_v23 = vld [vmem:[#allocation7 + $0x28] sm:$0xff]  ;;  %v1155_v6 = vld [vmem:[#allocation7 + $0x38] sm:$0xff] }
 0xadc   :  { %v893_v30 = vadd.f32 %v892_v29, %v3211_v3  ;;  %v2582_v29 = vpack.c.bf16 %v1155_v6, %v1153_v23 }
 0xade   :  { %2775 = vtanh.f32 %v893_v30  ;;  %v1154_v30 = vld [vmem:[#allocation7 + $0x30] sm:$0xff] }
 0xae8   :  { %v2776_v33 = vpop.eup %2775 }
 0xae9   :  { %897 = vrot.lane.b32.xlu0 %v2776_v33, %s2979_s14 }
 0xb5b   :  { %v898_v38 = vpop.permute.xlu0 %897 }
 0xb5c   :  { %v900_v40 = vmul.f32 %v898_v38, %v895_v36  ;;  %v1159_v38 = vld [vmem:[#allocation7 + $0x58] sm:$0xff] }
 0xb5e   :  { %v3327_v41 = vadd.f32 %v903_v34, %v900_v40  ;;  %v1152_v34 = vld [vmem:[#allocation7 + $0x20] sm:$0xff]  ;;  %v1132_v40 = vld [vmem:[#allocation9 + $0x8] sm:$0xff] }
 0xb5f   :  { %v2584_v36 = vpack.c.bf16 %v1154_v30, %v1152_v34 }
 0xb60   :  { %v911_v42 = vrot.slane %v3327_v41, 2  ;;  %v1010_v59 = vrot.slane %v3327_v41, 6 }
 0xb62   :  { %912 = vrot.lane.b32.xlu1 %v911_v42, %s2979_s14 }
 0xbd4   :  { %v913_v43 = vpop.permute.xlu1 %912 }
 0xbd5   :  { %2422 = vmatmul.mubr.msk.f32.vlgmr.msra.gmra.mrb[6].mxu1 %vm245_vm5, %v913_v43  ;;  %v1134_v43 = vld [vmem:[#allocation9 + $0x18] sm:$0xff] }
 0xbd6   :  { %1246 = vmatprep.mubr.f32.mxu1 %v2978_v1 }
 0xca8   :  { %v982_v44 = vpop.f32.mrb[6].mxu1 }
 0xca9   :  { %v988_v45 = vrot.slane %v982_v44, 4  ;;  %v984_v46 = vpop.f32.mrb[7].mxu1  ;;  %v1156_v44 = vld [vmem:[#allocation7 + $0x40] sm:$0xff] }
 0xcaa   :  { %v997_v5 = vadd.f32 %v3233_v16, %v984_v46  ;;  %v3370_v46 = vpack.c.bf16 %v1134_v43, %v1132_v40 }
 0xcab   :  { %v990_v47 = vadd.f32 %v988_v45, %v3199_v61  ;;  %v1158_v45 = vld [vmem:[#allocation7 + $0x50] sm:$0xff] }
 0xcac   :  { %v999_v50 = vrot.slane %v997_v5, 4  ;;  %v1161_v5 = vld [vmem:[#allocation7 + $0x68] sm:$0xff]  ;;  %2595 = vmatprep.subr.bf16.mxu0 %v3370_v46 }
 0xcad   :  { %v2423_v48 = vmul.f32 -1.442695, %v990_v47  ;;  %v2588_v47 = vpack.c.bf16 %v1158_v45, %v1156_v44 }
 0xcaf   :  { %2777 = vpow2.f32 %v2423_v48  ;;  %v1131_v48 = vld [vmem:[#allocation9] sm:$0xff] }
 0xcb9   :  { %v2778_v9 = vpop.eup %2777 }
 0xcba   :  { %v994_v49 = vadd.f32 1.0, %v2778_v9  ;;  %v1133_v9 = vld [vmem:[#allocation9 + $0x10] sm:$0xff] }
 0xcbc   :  { %2779 = vrcp.f32 %v994_v49  ;;  %v3372_v49 = vpack.c.bf16 %v1133_v9, %v1131_v48 }
 0xcc6   :  { %v2780_v52 = vpop.eup %2779 }
 0xcc7   :  { %v1001_v54 = vmul.f32 %v2780_v52, %v999_v50  ;;  %v1004_v58 = vsub.f32 1.0, %v2780_v52  ;;  %v1012_v60 = vmul.f32 %v2780_v52, %v1010_v59  ;;  %v1136_v50 = vld [vmem:[#allocation9 + $0x28] sm:$0xff]  ;;  %v1138_v52 = vld [vmem:[#allocation9 + $0x38] sm:$0xff]  ;;  %v1135_v59 = vld [vmem:[#allocation9 + $0x20] sm:$0xff] }
 0xcc9   :  { %v1002_v56 = vadd.f32 %v1001_v54, %v3207_v2  ;;  %v1160_v54 = vld [vmem:[#allocation7 + $0x60] sm:$0xff] }
 0xccb   :  { %2781 = vtanh.f32 %v1002_v56  ;;  %v1162_v56 = vld [vmem:[#allocation7 + $0x70] sm:$0xff] }
 0xcd5   :  { %v2782_v7 = vpop.eup %2781 }
 0xcd6   :  { %1006 = vrot.lane.b32.xlu0 %v2782_v7, %s2979_s14  ;;  %v3376_v7 = vpack.c.bf16 %v1138_v52, %v1136_v50 }
 0xd48   :  { %v1007_v61 = vpop.permute.xlu0 %1006 }
 0xd49   :  { %v1009_v63 = vmul.f32 %v1007_v61, %v1004_v58  ;;  %v2592_v58 = vpack.c.bf16 %v1162_v56, %v1160_v54  ;;  %v1137_v61 = vld [vmem:[#allocation9 + $0x30] sm:$0xff] }
 0xd4b   :  { %v1013_v0 = vadd.f32 %v1012_v60, %v1009_v63  ;;  %v3378_v60 = vpack.c.bf16 %v1137_v61, %v1135_v59  ;;  %v1140_v63 = vld [vmem:[#allocation9 + $0x48] sm:$0xff] }
 0xd4d   :  { %v1020_v8 = vrot.slane %v1013_v0, 4  ;;  %v1119_v25 = vrot.slane %v1013_v0, 6 }
 0xd4f   :  { %1021 = vrot.lane.b32.xlu1 %v1020_v8, %s2979_s14 }
 0xd53   :  { %460 = vrot.lane.b32.xlu1 %v3255_v57, %s2979_s14 }
 0xd57   :  { %682 = vrot.lane.b32.xlu1 %v3293_v53, %s2979_s14 }
 0xd5b   :  { %1015 = vrot.lane.b32.xlu1 %v1013_v0, %s2979_s14  ;;  %v1142_v0 = vld [vmem:[#allocation9 + $0x58] sm:$0xff] }
 0xd5c   :  { %v3382_v8 = vpack.c.bf16 %v1142_v0, %v1140_v63 }
 0xdc1   :  { %v1022_v2 = vpop.permute.xlu1 %1021 }
 0xdc2   :  { %2424 = vmatmul.mubr.msk.f32.vlgmr.msra.gmra.mrb[10].mxu0 %vm245_vm5, %v1022_v2  ;;  %v1139_v2 = vld [vmem:[#allocation9 + $0x40] sm:$0xff] }
 0xdc3   :  { %1331 = vmatprep.mubr.f32.mxu0 %v2978_v1  ;;  %2597 = vmatpush1.bf16.msra.mxu0 %v3372_v49 }
 0xdc4   :  { %2599 = vmatprep.subr.bf16.mxu0 %v3376_v7 }
 0xdc5   :  { %v461_v10 = vpop.permute.xlu1 %460 }
 0xdc6   :  { %464 = vst.msk [vmem:[#allocation2] sm:$0xc] %vm463_vm6, %v461_v10 }
 0xdc7   :  { %466 = vst.msk [vmem:[#allocation2 + $0xa] sm:$0xc] %vm465_vm7, %v461_v10  ;;  %2601 = vmatpush1.bf16.msra.mxu0 %v3378_v60  ;;  %v1141_v10 = vld [vmem:[#allocation9 + $0x50] sm:$0xff] }
 0xdc8   :  { %2603 = vmatprep.subr.bf16.mxu0 %v3382_v8 }
 0xdc9   :  { %v683_v57 = vpop.permute.xlu1 %682 }
 0xdca   :  { %686 = vst.msk [vmem:[#allocation2] sm:$0xc0] %vm685_vm8, %v683_v57 }
 0xdcb   :  { %688 = vst.msk [vmem:[#allocation2 + $0x2] sm:$0xc0] %vm687_vm9, %v683_v57 }
 0xdcc   :  { %797 = vst.msk [vmem:[#allocation2 + $0x8] sm:$0x3] %vm349_vm3, %v3311_v24 }
 0xdcd   :  { %798 = vst.msk [vmem:[#allocation2 + $0x6] sm:$0x3] %vm351_vm4, %v3311_v24  ;;  %v1016_v53 = vpop.permute.xlu1 %1015 }
 0xdce   :  { %1018 = vst.msk [vmem:[#allocation2 + $0x8] sm:$0x30] %vm574_vm10, %v1016_v53 }
 0xdcf   :  { %1019 = vst.msk [vmem:[#allocation2 - $0x2] sm:$0x30] %vm576_vm11, %v1016_v53  ;;  %v3386_v53 = vpack.c.bf16 %v1141_v10, %v1139_v2 }
 0xdd1   :  { %2605 = vmatpush1.bf16.msra.mxu0 %v3386_v53 }
 0xe95   :  { %v1091_v11 = vpop.f32.mrb[10].mxu0 }
 0xe96   :  { %v1097_v12 = vrot.slane %v1091_v11, 2  ;;  %v1093_v14 = vpop.f32.mrb[11].mxu0 }
 0xe97   :  { %v1106_v22 = vadd.f32 %v3233_v16, %v1093_v14  ;;  %v2580_v16 = vpack.c.bf16 %v1150_v21, %v1148_v32  ;;  %v1144_v14 = vld [vmem:[#allocation9 + $0x68] sm:$0xff] }
 0xe98   :  { %v1099_v15 = vadd.f32 %v1097_v12, %v3203_v62  ;;  %v1149_v62 = vld [vmem:[#allocation7 + $0x8] sm:$0xff] }
 0xe99   :  { %v1108_v24 = vrot.slane %v1106_v22, 2  ;;  %v2578_v18 = vpack.c.bf16 %v1151_v31, %v1149_v62  ;;  %v1164_v32 = vld [vmem:[%s3663_s7] sm:$0x3] }
 0xe9a   :  { %v2425_v17 = vmul.f32 -1.442695, %v1099_v15  ;;  %v1146_v15 = vld [vmem:[#allocation9 + $0x78] sm:$0xff]  ;;  %v1173_v21 = vrot.slane %v1164_v32, %v145_v39 }
 0xe9b   :  { %2579 = vmatprep.subr.bf16.mxu1 %v2578_v18  ;;  %v1169_v18 = vrot.slane %v1164_v32, %v141_v37 }
 0xe9c   :  { %2783 = vpow2.f32 %v2425_v17  ;;  %2581 = vmatpush1.bf16.msra.mxu1 %v2580_v16  ;;  %v3390_v17 = vpack.c.bf16 %v1146_v15, %v1144_v14 }
 0xe9d   :  { %2583 = vmatprep.subr.bf16.mxu1 %v2582_v29 }
 0xe9e   :  { %2607 = vmatprep.subr.bf16.mxu0 %v3390_v17 }
 0xea0   :  { %2585 = vmatpush1.bf16.msra.mxu1 %v2584_v36 }
 0xea6   :  { %v2784_v19 = vpop.eup %2783 }
 0xea7   :  { %v1103_v20 = vadd.f32 1.0, %v2784_v19  ;;  %v1143_v19 = vld [vmem:[#allocation9 + $0x60] sm:$0xff] }
 0xea9   :  { %2785 = vrcp.f32 %v1103_v20  ;;  %v1145_v20 = vld [vmem:[#allocation9 + $0x70] sm:$0xff] }
 0xeb3   :  { %v3358_v4 = vpop.eup %2785 }
 0xeb4   :  { %v1110_v26 = vmul.f32 %v3358_v4, %v1108_v24  ;;  %v3362_v27 = vmul.f32 %v3358_v4, %v1119_v25  ;;  %v1113_v57 = vsub.f32 1.0, %v3358_v4  ;;  %v3393_v24 = vpack.c.bf16 %v1145_v20, %v1143_v19 }
 0xeb6   :  { %v1111_v13 = vadd.f32 %v1110_v26, %v3211_v3  ;;  %v1157_v3 = vld [vmem:[#allocation7 + $0x48] sm:$0xff]  ;;  %2609 = vmatpush1.bf16.msra.mxu0 %v3393_v24 }
 0xeb7   :  { %v2586_v42 = vpack.c.bf16 %v1159_v38, %v1157_v3  ;;  %2627 = vmatprep.subr.bf16.mxu0 %v3370_v46 }
 0xeb8   :  { %2787 = vtanh.f32 %v1111_v13 }
 0xeb9   :  { %2587 = vmatprep.subr.bf16.mxu1 %v2586_v42  ;;  %1332 = vmatmul.mubr.f32.vlgmr.msra.gmra.mrb[12].mxu0 %v2978_v1 }
 0xeba   :  { %2589 = vmatpush1.bf16.msra.mxu1 %v2588_v47  ;;  %2629 = vmatpush1.bf16.msra.mxu0 %v3372_v49 }
 0xebb   :  { %1550 = vmatprep.mubr.f32.mxu0 %v2978_v1  ;;  %2631 = vmatprep.subr.bf16.mxu0 %v3376_v7 }
 0xebe   :  { %2633 = vmatpush1.bf16.msra.mxu0 %v3378_v60 }
 0xebf   :  { %2635 = vmatprep.subr.bf16.mxu0 %v3382_v8 }
 0xec2   :  { %v2788_v33 = vpop.eup %2787  ;;  %2637 = vmatpush1.bf16.msra.mxu0 %v3386_v53 }
 0xec3   :  { %1115 = vrot.lane.b32.xlu0 %v2788_v33, %s2979_s14  ;;  %2639 = vmatprep.subr.bf16.mxu0 %v3390_v17 }
 0xec6   :  { %2641 = vmatpush1.bf16.msra.mxu0 %v3393_v24 }
 0xec7   :  { %571 = vrot.lane.b32.xlu0 %v3274_v28, %s2979_s14  ;;  %v1163_v28 = vld [vmem:[#allocation7 + $0x78] sm:$0xff]  ;;  %2659 = vmatprep.subr.bf16.mxu0 %v3370_v46 }
 0xecb   :  { %906 = vrot.lane.b32.xlu0 %v3327_v41, %s2979_s14  ;;  %v2590_v41 = vpack.c.bf16 %v1163_v28, %v1161_v5 }
 0xecd   :  { %2591 = vmatprep.subr.bf16.mxu1 %v2590_v41 }
 0xece   :  { %2593 = vmatpush1.bf16.msra.mxu1 %v2592_v58 }
 0xecf   :  { %2611 = vmatprep.subr.bf16.mxu1 %v3370_v46 }
 0xf35   :  { %v1116_v11 = vpop.permute.xlu0 %1115 }
 0xf36   :  { %v1118_v12 = vmul.f32 %v1116_v11, %v1113_v57 }
 0xf38   :  { %v1122_v22 = vadd.f32 %v3362_v27, %v1118_v12 }
 0xf39   :  { %v572_v25 = vpop.permute.xlu0 %571 }
 0xf3a   :  { %575 = vst.msk [vmem:[#allocation2] sm:$0x30] %vm574_vm10, %v572_v25  ;;  %1124 = vrot.lane.b32.xlu0 %v1122_v22, %s2979_s14 }
 0xf3b   :  { %577 = vst.msk [vmem:[#allocation2 + $0x6] sm:$0x30] %vm576_vm11, %v572_v25 }
 0xf3d   :  { %v907_v4 = vpop.permute.xlu0 %906 }
 0xf3e   :  { %909 = vst.msk [vmem:[#allocation2 + $0x8] sm:$0xc] %vm463_vm6, %v907_v4 }
 0xf3f   :  { %910 = vst.msk [vmem:[#allocation2 + $0x2] sm:$0xc] %vm465_vm7, %v907_v4 }
 0xf8c   :  { %v1333_v62 = vpop.f32.mrb[12].mxu0 }
 0xf8d   :  { %v1335_v31 = vpop.f32.mrb[13].mxu0 }
 0xf8e   :  { %v1351_v58 = vadd.f32 %v3470_v51, %v1335_v31 }
 0xfac   :  { %v1125_v26 = vpop.permute.xlu0 %1124 }
 0xfad   :  { %1127 = vst.msk [vmem:[#allocation2 + $0x8] sm:$0xc0] %vm685_vm8, %v1125_v26 }
 0xfae   :  { %1128 = vst.msk [vmem:[#allocation2 - $0x6] sm:$0xc0] %vm687_vm9, %v1125_v26 }
 0xfb4   :  { %v1130_v13 = vld [vmem:[#allocation2 + $0x8] sm:$0xff] }
 0xfb5   :  { %v1129_v27 = vld [vmem:[#allocation2] sm:$0xff] }
 0xfb6   :  { %2426 = vmatmul.mubr.msk.f32.vlgmr.msra.gmra.mrb[8].mxu1 %vm245_vm5, %v1129_v27 }
 0xfb7   :  { %1252 = vmatprep.mubr.f32.mxu1 %v2978_v1  ;;  %2613 = vmatpush1.bf16.msra.mxu1 %v3372_v49 }
 0xfb8   :  { %2615 = vmatprep.subr.bf16.mxu1 %v3376_v7 }
 0xfba   :  { %2427 = vmatmul.mubr.msk.f32.gmra.mrb[10].mxu1 %vm245_vm5, %v1130_v13 }
 0xfbb   :  { %2617 = vmatpush1.bf16.msra.mxu1 %v3378_v60  ;;  %1441 = vmatprep.mubr.f32.mxu1 %v2978_v1 }
 0xfbc   :  { %2619 = vmatprep.subr.bf16.mxu1 %v3382_v8 }
 0xfbf   :  { %2621 = vmatpush1.bf16.msra.mxu1 %v3386_v53 }
 0xfc0   :  { %2623 = vmatprep.subr.bf16.mxu1 %v3390_v17 }
 0xfc3   :  { %2625 = vmatpush1.bf16.msra.mxu1 %v3393_v24 }
 0xfc4   :  { %2643 = vmatprep.subr.bf16.mxu1 %v3370_v46 }
0x1089   :  { %v1248_v23 = vpop.f32.mrb[8].mxu1 }
0x108a   :  { %v1249_v6 = vadd.f32 %v1248_v23, %v1169_v18  ;;  %v1250_v16 = vpop.f32.mrb[9].mxu1 }
0x108b   :  { %v1251_v29 = vadd.f32 %v1250_v16, %v1173_v21 }
0x108c   :  { %v1701_v36 = vrot.slane %v1249_v6, 6  ;;  %v1809_v3 = vrot.slane %v1249_v6, 2 }
0x108d   :  { %v1254_v34 = vpop.f32.mrb[10].mxu1  ;;  %v1702_v38 = vrot.slane %v1251_v29, 6  ;;  %v1810_v40 = vrot.slane %v1251_v29, 2 }
0x108e   :  { %v1255_v30 = vadd.f32 %v1254_v34, %v1169_v18  ;;  %v1256_v33 = vpop.f32.mrb[11].mxu1 }
0x108f   :  { %v1257_v42 = vadd.f32 %v1256_v33, %v1173_v21 }
0x1090   :  { %v1261_v43 = vrot.slane %v1255_v30, 6  ;;  %v1369_v44 = vrot.slane %v1255_v30, 2  ;;  %v3436_v37 = vsel %vm3189_vm1, %v1255_v30, %v1701_v36  ;;  %v3440_v35 = vsel %vm3189_vm1, %v1255_v30, %v1809_v3 }
0x1091   :  { %v1262_v39 = vrot.slane %v1257_v42, 6  ;;  %v1370_v45 = vrot.slane %v1257_v42, 2  ;;  %v3444_v47 = vsel %vm3193_vm2, %v1257_v42, %v1702_v38  ;;  %v3448_v48 = vsel %vm3193_vm2, %v1257_v42, %v1810_v40 }
0x1092   :  { %v3452_v9 = vsel %vm3189_vm1, %v1249_v6, %v1261_v43  ;;  %v3456_v5 = vsel %vm3189_vm1, %v1249_v6, %v1369_v44 }
0x1093   :  { %v1338_v28 = vadd.f32 %v1333_v62, %v3452_v9  ;;  %v3461_v50 = vsel %vm3193_vm2, %v1251_v29, %v1262_v39  ;;  %v3465_v41 = vsel %vm3193_vm2, %v1251_v29, %v1370_v45 }
0x1095   :  { %v2428_v52 = vmul.f32 -1.442695, %v1338_v28 }
0x1097   :  { %2789 = vpow2.f32 %v2428_v52 }
0x10a1   :  { %v2790_v54 = vpop.eup %2789 }
0x10a2   :  { %v1342_v56 = vadd.f32 1.0, %v2790_v54 }
0x10a4   :  { %2791 = vrcp.f32 %v1342_v56 }
0x10ae   :  { %v2792_v59 = vpop.eup %2791 }
0x10af   :  { %v1352_v61 = vmul.f32 %v2792_v59, %v1351_v58  ;;  %v1355_v0 = vsub.f32 1.0, %v2792_v59  ;;  %v1361_v10 = vmul.f32 0.0, %v2792_v59 }
0x10b1   :  { %v1353_v63 = vadd.f32 %v1352_v61, %v3461_v50 }
0x10b3   :  { %2793 = vtanh.f32 %v1353_v63 }
0x10bd   :  { %v2794_v55 = vpop.eup %2793 }
0x10be   :  { %1357 = vrot.lane.b32.xlu1 %v2794_v55, %s2979_s14 }
0x1130   :  { %v1358_v2 = vpop.permute.xlu1 %1357 }
0x1131   :  { %v1360_v57 = vmul.f32 %v1358_v2, %v1355_v0 }
0x1133   :  { %v1362_v11 = vadd.f32 %v1361_v10, %v1360_v57 }
0x1135   :  { %1364 = vrot.lane.b32.xlu0 %v1362_v11, %s2979_s14  ;;  %v1471_v27 = vrot.slane %v1362_v11, 6 }
0x11a7   :  { %v1365_v12 = vpop.permute.xlu0 %1364 }
0x11a8   :  { %1367 = vst.msk [vmem:[#allocation2] sm:$0x3] %vm349_vm3, %v1365_v12  ;;  %2430 = vmatmul.mubr.msk.f32.vlgmr.msra.gmra.mrb[12].mxu1 %vm245_vm5, %v1365_v12 }
0x11a9   :  { %1368 = vst.msk [vmem:[#allocation2 + $0xe] sm:$0x3] %vm351_vm4, %v1365_v12  ;;  %2645 = vmatpush1.bf16.msra.mxu1 %v3372_v49  ;;  %1659 = vmatprep.mubr.f32.mxu1 %v2978_v1 }
0x11aa   :  { %2647 = vmatprep.subr.bf16.mxu1 %v3376_v7 }
0x11ad   :  { %2649 = vmatpush1.bf16.msra.mxu1 %v3378_v60 }
0x11ae   :  { %2651 = vmatprep.subr.bf16.mxu1 %v3382_v8 }
0x11b1   :  { %2653 = vmatpush1.bf16.msra.mxu1 %v3386_v53 }
0x11b2   :  { %2655 = vmatprep.subr.bf16.mxu1 %v3390_v17 }
0x11b5   :  { %2657 = vmatpush1.bf16.msra.mxu1 %v3393_v24 }
0x11b6   :  { %2675 = vmatprep.subr.bf16.mxu1 %v3370_v46 }
0x127b   :  { %v1443_v14 = vpop.f32.mrb[12].mxu1 }
0x127c   :  { %v1449_v15 = vrot.slane %v1443_v14, 6  ;;  %v1445_v19 = vpop.f32.mrb[13].mxu1 }
0x127d   :  { %v1458_v26 = vadd.f32 %v3470_v51, %v1445_v19 }
0x127e   :  { %v1451_v20 = vadd.f32 %v1449_v15, %v3456_v5 }
0x127f   :  { %v1460_v13 = vrot.slane %v1458_v26, 6 }
0x1280   :  { %v2431_v22 = vmul.f32 -1.442695, %v1451_v20 }
0x1282   :  { %2795 = vpow2.f32 %v2431_v22 }
0x128c   :  { %v2796_v25 = vpop.eup %2795 }
0x128d   :  { %v1455_v4 = vadd.f32 1.0, %v2796_v25 }
0x128f   :  { %2797 = vrcp.f32 %v1455_v4 }
0x1299   :  { %v2798_v62 = vpop.eup %2797 }
0x129a   :  { %v1462_v31 = vmul.f32 %v2798_v62, %v1460_v13  ;;  %v1473_v32 = vmul.f32 %v2798_v62, %v1471_v27  ;;  %v1465_v23 = vsub.f32 1.0, %v2798_v62 }
0x129c   :  { %v1463_v18 = vadd.f32 %v1462_v31, %v3465_v41 }
0x129e   :  { %2799 = vtanh.f32 %v1463_v18 }
0x12a8   :  { %v2800_v21 = vpop.eup %2799 }
0x12a9   :  { %1467 = vrot.lane.b32.xlu1 %v2800_v21, %s2979_s14 }
0x131b   :  { %v1468_v6 = vpop.permute.xlu1 %1467 }
0x131c   :  { %v1470_v16 = vmul.f32 %v1468_v6, %v1465_v23 }
0x131e   :  { %v3492_v29 = vadd.f32 %v1473_v32, %v1470_v16 }
0x1320   :  { %v1481_v34 = vrot.slane %v3492_v29, 2  ;;  %v1580_v58 = vrot.slane %v3492_v29, 6 }
0x1322   :  { %1482 = vrot.lane.b32.xlu0 %v1481_v34, %s2979_s14 }
0x1394   :  { %v1483_v30 = vpop.permute.xlu0 %1482 }
0x1395   :  { %2432 = vmatmul.mubr.msk.f32.vlgmr.msra.gmra.mrb[14].mxu0 %vm245_vm5, %v1483_v30 }
0x1396   :  { %2661 = vmatpush1.bf16.msra.mxu0 %v3372_v49  ;;  %1776 = vmatprep.mubr.f32.mxu0 %v2978_v1 }
0x1397   :  { %2663 = vmatprep.subr.bf16.mxu0 %v3376_v7 }
0x139a   :  { %2665 = vmatpush1.bf16.msra.mxu0 %v3378_v60 }
0x139b   :  { %2667 = vmatprep.subr.bf16.mxu0 %v3382_v8 }
0x139e   :  { %2669 = vmatpush1.bf16.msra.mxu0 %v3386_v53 }
0x139f   :  { %2671 = vmatprep.subr.bf16.mxu0 %v3390_v17 }
0x13a2   :  { %2673 = vmatpush1.bf16.msra.mxu0 %v3393_v24 }
0x13a3   :  { %2691 = vmatprep.subr.bf16.mxu0 %v3370_v46 }
0x1468   :  { %v1552_v33 = vpop.f32.mrb[14].mxu0 }
0x1469   :  { %v1558_v36 = vrot.slane %v1552_v33, 4  ;;  %v1554_v3 = vpop.f32.mrb[15].mxu0 }
0x146a   :  { %v1567_v44 = vadd.f32 %v3470_v51, %v1554_v3 }
0x146b   :  { %v1560_v38 = vadd.f32 %v1558_v36, %v3452_v9 }
0x146c   :  { %v1569_v39 = vrot.slane %v1567_v44, 4 }
0x146d   :  { %v2433_v40 = vmul.f32 -1.442695, %v1560_v38 }
0x146f   :  { %2801 = vpow2.f32 %v2433_v40 }
0x1479   :  { %v2802_v42 = vpop.eup %2801 }
0x147a   :  { %v1564_v43 = vadd.f32 1.0, %v2802_v42 }
0x147c   :  { %2803 = vrcp.f32 %v1564_v43 }
0x1486   :  { %v2804_v45 = vpop.eup %2803 }
0x1487   :  { %v1571_v28 = vmul.f32 %v2804_v45, %v1569_v39  ;;  %v1574_v56 = vsub.f32 1.0, %v2804_v45  ;;  %v1582_v59 = vmul.f32 %v2804_v45, %v1580_v58 }
0x1489   :  { %v1572_v52 = vadd.f32 %v1571_v28, %v3461_v50 }
0x148b   :  { %2805 = vtanh.f32 %v1572_v52 }
0x1495   :  { %v2806_v54 = vpop.eup %2805 }
0x1496   :  { %1576 = vrot.lane.b32.xlu1 %v2806_v54, %s2979_s14 }
0x1508   :  { %v1577_v9 = vpop.permute.xlu1 %1576 }
0x1509   :  { %v1579_v61 = vmul.f32 %v1577_v9, %v1574_v56 }
0x150b   :  { %v3511_v63 = vadd.f32 %v1582_v59, %v1579_v61 }
0x150d   :  { %v1590_v55 = vrot.slane %v3511_v63, 4  ;;  %v1689_v26 = vrot.slane %v3511_v63, 6 }
0x150f   :  { %1591 = vrot.lane.b32.xlu0 %v1590_v55, %s2979_s14 }
0x1581   :  { %v1592_v0 = vpop.permute.xlu0 %1591 }
0x1582   :  { %2434 = vmatmul.mubr.msk.f32.vlgmr.msra.gmra.mrb[14].mxu1 %vm245_vm5, %v1592_v0 }
0x1583   :  { %2677 = vmatpush1.bf16.msra.mxu1 %v3372_v49  ;;  %1881 = vmatprep.mubr.f32.mxu1 %v2978_v1 }
0x1584   :  { %2679 = vmatprep.subr.bf16.mxu1 %v3376_v7 }
0x1587   :  { %2681 = vmatpush1.bf16.msra.mxu1 %v3378_v60 }
0x1588   :  { %2683 = vmatprep.subr.bf16.mxu1 %v3382_v8 }
0x158b   :  { %2685 = vmatpush1.bf16.msra.mxu1 %v3386_v53 }
0x158c   :  { %2687 = vmatprep.subr.bf16.mxu1 %v3390_v17 }
0x158f   :  { %2689 = vmatpush1.bf16.msra.mxu1 %v3393_v24 }
0x1590   :  { %2707 = vmatprep.subr.bf16.mxu1 %v3370_v46 }
0x1655   :  { %v1661_v50 = vpop.f32.mrb[14].mxu1 }
0x1656   :  { %v1667_v2 = vrot.slane %v1661_v50, 2  ;;  %v1663_v10 = vpop.f32.mrb[15].mxu1 }
0x1657   :  { %v1676_v15 = vadd.f32 %v3470_v51, %v1663_v10 }
0x1658   :  { %v1669_v57 = vadd.f32 %v1667_v2, %v3456_v5 }
0x1659   :  { %v1678_v19 = vrot.slane %v1676_v15, 2 }
0x165a   :  { %v2435_v11 = vmul.f32 -1.442695, %v1669_v57 }
0x165c   :  { %2807 = vpow2.f32 %v2435_v11 }
0x1666   :  { %v2808_v12 = vpop.eup %2807 }
0x1667   :  { %v1673_v14 = vadd.f32 1.0, %v2808_v12 }
0x1669   :  { %2809 = vrcp.f32 %v1673_v14 }
0x1673   :  { %v2810_v20 = vpop.eup %2809 }
0x1674   :  { %v1680_v22 = vmul.f32 %v2810_v20, %v1678_v19  ;;  %v1683_v46 = vsub.f32 1.0, %v2810_v20  ;;  %v1691_v27 = vmul.f32 %v2810_v20, %v1689_v26 }
0x1676   :  { %v1681_v25 = vadd.f32 %v1680_v22, %v3465_v41 }
0x1678   :  { %2811 = vtanh.f32 %v1681_v25 }
0x1682   :  { %v2812_v4 = vpop.eup %2811 }
0x1683   :  { %1685 = vrot.lane.b32.xlu1 %v2812_v4, %s2979_s14 }
0x16f5   :  { %v1686_v5 = vpop.permute.xlu1 %1685 }
0x16f6   :  { %v1688_v13 = vmul.f32 %v1686_v5, %v1683_v46 }
0x16f8   :  { %v3530_v62 = vadd.f32 %v1691_v27, %v1688_v13 }
0x16fa   :  { %v1707_v31 = vrot.slane %v3530_v62, 6 }
0x16fc   :  { %1708 = vrot.lane.b32.xlu0 %v1707_v31, %s2979_s14 }
0x176e   :  { %v1709_v32 = vpop.permute.xlu0 %1708 }
0x176f   :  { %2436 = vmatmul.mubr.msk.f32.vlgmr.msra.gmra.mrb[16].mxu0 %vm245_vm5, %v1709_v32 }
0x1770   :  { %2693 = vmatpush1.bf16.msra.mxu0 %v3372_v49  ;;  %1990 = vmatprep.mubr.f32.mxu0 %v2978_v1 }
0x1771   :  { %2695 = vmatprep.subr.bf16.mxu0 %v3376_v7 }
0x1774   :  { %2697 = vmatpush1.bf16.msra.mxu0 %v3378_v60 }
0x1775   :  { %2699 = vmatprep.subr.bf16.mxu0 %v3382_v8 }
0x1778   :  { %2701 = vmatpush1.bf16.msra.mxu0 %v3386_v53 }
0x1779   :  { %2703 = vmatprep.subr.bf16.mxu0 %v3390_v17 }
0x177c   :  { %2705 = vmatpush1.bf16.msra.mxu0 %v3393_v24 }
0x1842   :  { %v1778_v41 = vpop.f32.mrb[16].mxu0 }
0x1843   :  { %v1783_v18 = vadd.f32 %v1778_v41, %v3436_v37  ;;  %v1780_v21 = vpop.f32.mrb[17].mxu0 }
0x1844   :  { %v1790_v34 = vadd.f32 %v3470_v51, %v1780_v21 }
0x1845   :  { %v2437_v23 = vmul.f32 -1.442695, %v1783_v18 }
0x1847   :  { %2813 = vpow2.f32 %v2437_v23 }
0x1851   :  { %v2814_v6 = vpop.eup %2813 }
0x1852   :  { %v1787_v16 = vadd.f32 1.0, %v2814_v6 }
0x1854   :  { %2815 = vrcp.f32 %v1787_v16 }
0x185e   :  { %v2816_v30 = vpop.eup %2815 }
0x185f   :  { %v1791_v33 = vmul.f32 %v2816_v30, %v1790_v34  ;;  %v1794_v38 = vsub.f32 1.0, %v2816_v30  ;;  %v1801_v42 = vmul.f32 %v2816_v30, %v1707_v31 }
0x1861   :  { %v1792_v36 = vadd.f32 %v1791_v33, %v3444_v47 }
0x1863   :  { %2817 = vtanh.f32 %v1792_v36 }
0x186d   :  { %v2818_v3 = vpop.eup %2817 }
0x186e   :  { %1796 = vrot.lane.b32.xlu1 %v2818_v3, %s2979_s14 }
0x18e0   :  { %v1797_v40 = vpop.permute.xlu1 %1796 }
0x18e1   :  { %v1799_v43 = vmul.f32 %v1797_v40, %v1794_v38 }
0x18e3   :  { %v1802_v44 = vadd.f32 %v1801_v42, %v1799_v43 }
0x18e5   :  { %1804 = vrot.lane.b32.xlu0 %v1802_v44, %s2979_s14 }
0x1957   :  { %v3548_v39 = vpop.permute.xlu0 %1804 }
0x1958   :  { %2438 = vmatmul.mubr.msk.f32.vlgmr.msra.gmra.mrb[16].mxu1 %vm245_vm5, %v3548_v39 }
0x1959   :  { %2709 = vmatpush1.bf16.msra.mxu1 %v3372_v49  ;;  %2099 = vmatprep.mubr.f32.mxu1 %v2978_v1 }
0x195a   :  { %2711 = vmatprep.subr.bf16.mxu1 %v3376_v7 }
0x195d   :  { %2713 = vmatpush1.bf16.msra.mxu1 %v3378_v60  ;;  %v1911_v60 = vrot.slane %v1802_v44, 6 }
0x195e   :  { %2715 = vmatprep.subr.bf16.mxu1 %v3382_v8 }
0x1961   :  { %2717 = vmatpush1.bf16.msra.mxu1 %v3386_v53 }
0x1962   :  { %2719 = vmatprep.subr.bf16.mxu1 %v3390_v17 }
0x1965   :  { %2721 = vmatpush1.bf16.msra.mxu1 %v3393_v24 }
0x1a2b   :  { %v1883_v45 = vpop.f32.mrb[16].mxu1 }
0x1a2c   :  { %v1889_v28 = vrot.slane %v1883_v45, 6  ;;  %v1885_v52 = vpop.f32.mrb[17].mxu1 }
0x1a2d   :  { %v1898_v7 = vadd.f32 %v3470_v51, %v1885_v52 }
0x1a2e   :  { %v1891_v54 = vadd.f32 %v1889_v28, %v3440_v35 }
0x1a2f   :  { %v1900_v8 = vrot.slane %v1898_v7, 6 }
0x1a30   :  { %v2439_v49 = vmul.f32 -1.442695, %v1891_v54  ;;  %v2444_v54 = vld [vmem:[%s3665_s9] ss:$0 sm:$0xff]  ;;  %s2981_s9 = smov 1  }
0x1a32   :  { %2819 = vpow2.f32 %v2439_v49 }
0x1a3c   :  { %v2820_v1 = vpop.eup %2819 }
0x1a3d   :  { %v1895_v56 = vadd.f32 1.0, %v2820_v1 }
0x1a3f   :  { %2821 = vrcp.f32 %v1895_v56 }
0x1a49   :  { %v2822_v58 = vpop.eup %2821 }
0x1a4a   :  { %v1902_v53 = vmul.f32 %v2822_v58, %v1900_v8  ;;  %v1913_v9 = vmul.f32 %v2822_v58, %v1911_v60  ;;  %v1905_v59 = vsub.f32 1.0, %v2822_v58  ;;  %v2980_v58 = vmov 0  }
0x1a4b   :  { %2740 = vset.pattern.permute.xlu1 %v2980_v58  ;;  %2739 = vset.pattern.permute.xlu0 %v2980_v58 }
0x1a4c   :  { %v1903_v17 = vadd.f32 %v1902_v53, %v3448_v48  ;;  %v2445_v53 = vld [vmem:[#allocation3] ss:$0 sm:$0xff] }
0x1a4e   :  { %2823 = vtanh.f32 %v1903_v17 }
0x1a58   :  { %v2824_v24 = vpop.eup %2823 }
0x1a59   :  { %1907 = vrot.lane.b32.xlu1 %v2824_v24, %s2979_s14 }
0x1acb   :  { %v1908_v61 = vpop.permute.xlu1 %1907 }
0x1acc   :  { %v1910_v55 = vmul.f32 %v1908_v61, %v1905_v59 }
0x1ace   :  { %v3564_v0 = vadd.f32 %v1913_v9, %v1910_v55 }
0x1ad0   :  { %v1921_v50 = vrot.slane %v3564_v0, 2  ;;  %v2020_v27 = vrot.slane %v3564_v0, 6 }
0x1ad2   :  { %1922 = vrot.lane.b32.xlu0 %v1921_v50, %s2979_s14 }
0x1b44   :  { %v1923_v2 = vpop.permute.xlu0 %1922 }
0x1b45   :  { %2440 = vmatmul.mubr.msk.f32.vlgmr.msra.gmra.mrb[18].mxu0 %vm245_vm5, %v1923_v2 }
0x1c18   :  { %v1992_v10 = vpop.f32.mrb[18].mxu0 }
0x1c19   :  { %v1998_v57 = vrot.slane %v1992_v10, 4  ;;  %v1994_v11 = vpop.f32.mrb[19].mxu0 }
0x1c1a   :  { %v2007_v20 = vadd.f32 %v3470_v51, %v1994_v11 }
0x1c1b   :  { %v2000_v12 = vadd.f32 %v1998_v57, %v3436_v37 }
0x1c1c   :  { %v2009_v22 = vrot.slane %v2007_v20, 4 }
0x1c1d   :  { %v2441_v14 = vmul.f32 -1.442695, %v2000_v12 }
0x1c1f   :  { %2825 = vpow2.f32 %v2441_v14 }
0x1c29   :  { %v2826_v15 = vpop.eup %2825 }
0x1c2a   :  { %v2004_v19 = vadd.f32 1.0, %v2826_v15 }
0x1c2c   :  { %2827 = vrcp.f32 %v2004_v19 }
0x1c36   :  { %v2828_v25 = vpop.eup %2827 }
0x1c37   :  { %v2011_v4 = vmul.f32 %v2828_v25, %v2009_v22  ;;  %v2014_v5 = vsub.f32 1.0, %v2828_v25  ;;  %v2022_v13 = vmul.f32 %v2828_v25, %v2020_v27 }
0x1c39   :  { %v2012_v46 = vadd.f32 %v2011_v4, %v3444_v47 }
0x1c3b   :  { %2829 = vtanh.f32 %v2012_v46 }
0x1c45   :  { %v2830_v26 = vpop.eup %2829 }
0x1c46   :  { %2016 = vrot.lane.b32.xlu1 %v2830_v26, %s2979_s14 }
0x1cb8   :  { %v2017_v37 = vpop.permute.xlu1 %2016 }
0x1cb9   :  { %v2019_v31 = vmul.f32 %v2017_v37, %v2014_v5 }
0x1cbb   :  { %v2023_v32 = vadd.f32 %v2022_v13, %v2019_v31 }
0x1cbd   :  { %v2030_v41 = vrot.slane %v2023_v32, 4  ;;  %v2129_v38 = vrot.slane %v2023_v32, 6 }
0x1cbf   :  { %2031 = vrot.lane.b32.xlu0 %v2030_v41, %s2979_s14 }
0x1cc3   :  { %1476 = vrot.lane.b32.xlu0 %v3492_v29, %s2979_s14 }
0x1cc7   :  { %1694 = vrot.lane.b32.xlu0 %v3530_v62, %s2979_s14 }
0x1ccb   :  { %2025 = vrot.lane.b32.xlu0 %v2023_v32, %s2979_s14 }
0x1d31   :  { %v2032_v47 = vpop.permute.xlu0 %2031 }
0x1d32   :  { %2442 = vmatmul.mubr.msk.f32.vlgmr.msra.gmra.mrb[18].mxu1 %vm245_vm5, %v2032_v47 }
0x1d35   :  { %v1477_v18 = vpop.permute.xlu0 %1476 }
0x1d36   :  { %1479 = vst.msk [vmem:[#allocation2] sm:$0xc] %vm463_vm6, %v1477_v18 }
0x1d37   :  { %1480 = vst.msk [vmem:[#allocation2 + $0xa] sm:$0xc] %vm465_vm7, %v1477_v18 }
0x1d39   :  { %v1695_v21 = vpop.permute.xlu0 %1694 }
0x1d3a   :  { %1697 = vst.msk [vmem:[#allocation2] sm:$0xc0] %vm685_vm8, %v1695_v21 }
0x1d3b   :  { %1698 = vst.msk [vmem:[#allocation2 + $0x2] sm:$0xc0] %vm687_vm9, %v1695_v21 }
0x1d3c   :  { %1807 = vst.msk [vmem:[#allocation2 + $0x8] sm:$0x3] %vm349_vm3, %v3548_v39 }
0x1d3d   :  { %1808 = vst.msk [vmem:[#allocation2 + $0x6] sm:$0x3] %vm351_vm4, %v3548_v39  ;;  %v2026_v29 = vpop.permute.xlu0 %2025 }
0x1d3e   :  { %2028 = vst.msk [vmem:[#allocation2 + $0x8] sm:$0x30] %vm574_vm10, %v2026_v29 }
0x1d3f   :  { %2029 = vst.msk [vmem:[#allocation2 - $0x2] sm:$0x30] %vm576_vm11, %v2026_v29 }
0x1e05   :  { %v2101_v62 = vpop.f32.mrb[18].mxu1 }
0x1e06   :  { %v2107_v23 = vrot.slane %v2101_v62, 2  ;;  %v2103_v6 = vpop.f32.mrb[19].mxu1 }
0x1e07   :  { %v2116_v36 = vadd.f32 %v3470_v51, %v2103_v6 }
0x1e08   :  { %v2109_v16 = vadd.f32 %v2107_v23, %v3440_v35 }
0x1e09   :  { %v2118_v3 = vrot.slane %v2116_v36, 2 }
0x1e0a   :  { %v2443_v34 = vmul.f32 -1.442695, %v2109_v16 }
0x1e0c   :  { %2831 = vpow2.f32 %v2443_v34 }
0x1e16   :  { %v2832_v30 = vpop.eup %2831 }
0x1e17   :  { %v2113_v33 = vadd.f32 1.0, %v2832_v30 }
0x1e19   :  { %2833 = vrcp.f32 %v2113_v33 }
0x1e23   :  { %v2834_v40 = vpop.eup %2833 }
0x1e24   :  { %v2120_v42 = vmul.f32 %v2834_v40, %v2118_v3  ;;  %v2131_v43 = vmul.f32 %v2834_v40, %v2129_v38  ;;  %v2123_v35 = vsub.f32 1.0, %v2834_v40 }
0x1e26   :  { %v2121_v44 = vadd.f32 %v2120_v42, %v3448_v48 }
0x1e28   :  { %2835 = vtanh.f32 %v2121_v44 }
0x1e32   :  { %v2836_v39 = vpop.eup %2835 }
0x1e33   :  { %2125 = vrot.lane.b32.xlu1 %v2836_v39, %s2979_s14 }
0x1e37   :  { %1585 = vrot.lane.b32.xlu1 %v3511_v63, %s2979_s14 }
0x1e3b   :  { %1916 = vrot.lane.b32.xlu1 %v3564_v0, %s2979_s14 }
0x1ea5   :  { %v2126_v45 = vpop.permute.xlu1 %2125 }
0x1ea6   :  { %v2128_v51 = vmul.f32 %v2126_v45, %v2123_v35 }
0x1ea8   :  { %v2132_v28 = vadd.f32 %v2131_v43, %v2128_v51 }
0x1ea9   :  { %v1586_v52 = vpop.permute.xlu1 %1585 }
0x1eaa   :  { %1588 = vst.msk [vmem:[#allocation2] sm:$0x30] %vm574_vm10, %v1586_v52  ;;  %2134 = vrot.lane.b32.xlu1 %v2132_v28, %s2979_s14 }
0x1eab   :  { %1589 = vst.msk [vmem:[#allocation2 + $0x6] sm:$0x30] %vm576_vm11, %v1586_v52 }
0x1ead   :  { %v1917_v48 = vpop.permute.xlu1 %1916 }
0x1eae   :  { %1919 = vst.msk [vmem:[#allocation2 + $0x8] sm:$0xc] %vm463_vm6, %v1917_v48 }
0x1eaf   :  { %1920 = vst.msk [vmem:[#allocation2 + $0x2] sm:$0xc] %vm465_vm7, %v1917_v48 }
0x1f1c   :  { %v2135_v63 = vpop.permute.xlu1 %2134 }
0x1f1d   :  { %2137 = vst.msk [vmem:[#allocation2 + $0x8] sm:$0xc0] %vm685_vm8, %v2135_v63 }
0x1f1e   :  { %2138 = vst.msk [vmem:[#allocation2 - $0x6] sm:$0xc0] %vm687_vm9, %v2135_v63 }
0x1f24   :  { %v3611_v1 = vld [vmem:[#allocation2 + $0x8] sm:$0xff] }
0x1f25   :  { %v3609_v49 = vld [vmem:[#allocation2] sm:$0xff]  ;;  %v2149_v7 = vmul.f32 %v2444_v54, %v3611_v1 }
0x1f26   :  { %v2148_v56 = vmul.f32 %v2444_v54, %v3609_v49 }
0x1f27   :  { %v2153_v8 = vsel %vm245_vm5, %v2149_v7, 0.0 }
0x1f28   :  { %v2150_v60 = vsel %vm245_vm5, %v2148_v56, 0.0  ;;  %2154 = vadd.xlane.f32.xlu1 %v2153_v8 }
0x1f29   :  { %2151 = vadd.xlane.f32.xlu0 %v2150_v60 }
0x1fb5   :  { %v2155_v59 = vpop.xlane.xlu1 %2154 }
0x1fb6   :  { %v2152_v9 = vpop.xlane.xlu0 %2151  ;;  %v2164_v2 = vadd.f32 %v2445_v53, %v2155_v59 }
0x1fb7   :  { %v2163_v17 = vadd.f32 %v2445_v53, %v2152_v9 }
0x1fb8   :  { %v2177_v11 = vrot.slane %v2164_v2, 2  ;;  %v2180_v14 = vrot.slane %v2164_v2, 4  ;;  %v2183_v19 = vrot.slane %v2164_v2, 6 }
0x1fb9   :  { %v2166_v24 = vrot.slane %v2163_v17, 2  ;;  %v2169_v55 = vrot.slane %v2163_v17, 4  ;;  %v2172_v50 = vrot.slane %v2163_v17, 6 }
0x1fbb   :  { %v2168_v61 = vmax.f32 %v2163_v17, %v2166_v24 }
0x1fbd   :  { %v2171_v0 = vmax.f32 %v2168_v61, %v2169_v55 }
0x1fbf   :  { %v2174_v10 = vmax.f32 %v2171_v0, %v2172_v50 }
0x1fc1   :  { %v2175_v57 = vmax.f32 %v2174_v10, %v2164_v2 }
0x1fc3   :  { %v2179_v12 = vmax.f32 %v2175_v57, %v2177_v11 }
0x1fc5   :  { %v2182_v15 = vmax.f32 %v2179_v12, %v2180_v14 }
0x1fc7   :  { %v2185_v20 = vmax.f32 %v2182_v15, %v2183_v19 }
0x1fc9   :  { %v2186_v22 = vsub.f32 %v2163_v17, %v2185_v20  ;;  %v2190_v25 = vrot.slane %v2185_v20, 6  ;;  %v2195_v4 = vrot.slane %v2185_v20, 4  ;;  %v2200_v46 = vrot.slane %v2185_v20, 2 }
0x1fca   :  { %v2205_v47 = vsub.f32 %v2164_v2, %v2185_v20 }
0x1fcb   :  { %v2187_v26 = vmul.f32 1.442695, %v2186_v22  ;;  %v2192_v5 = vsub.f32 %v2163_v17, %v2190_v25  ;;  %v2197_v27 = vsub.f32 %v2163_v17, %v2195_v4  ;;  %v2202_v37 = vsub.f32 %v2163_v17, %v2200_v46 }
0x1fcc   :  { %v2208_v41 = vsub.f32 %v2164_v2, %v2190_v25  ;;  %v2211_v18 = vsub.f32 %v2164_v2, %v2195_v4  ;;  %v2214_v29 = vsub.f32 %v2164_v2, %v2200_v46  ;;  %v2206_v62 = vmul.f32 1.442695, %v2205_v47 }
0x1fcd   :  { %v2193_v13 = vmul.f32 1.442695, %v2192_v5  ;;  %v2198_v31 = vmul.f32 1.442695, %v2197_v27  ;;  %v2203_v32 = vmul.f32 1.442695, %v2202_v37  ;;  %2837 = vpow2.f32 %v2187_v26 }
0x1fce   :  { %v2209_v21 = vmul.f32 1.442695, %v2208_v41  ;;  %v2212_v23 = vmul.f32 1.442695, %v2211_v18  ;;  %v2215_v6 = vmul.f32 1.442695, %v2214_v29 }
0x1fcf   :  { %2839 = vpow2.f32 %v2193_v13 }
0x1fd0   :  { %2841 = vpow2.f32 %v2198_v31 }
0x1fd1   :  { %2843 = vpow2.f32 %v2203_v32 }
0x1fd2   :  { %2845 = vpow2.f32 %v2209_v21 }
0x1fd3   :  { %2847 = vpow2.f32 %v2206_v62 }
0x1fd4   :  { %2849 = vpow2.f32 %v2212_v23 }
0x1fd5   :  { %2851 = vpow2.f32 %v2215_v6 }
0x1fd7   :  { %v2838_v16 = vpop.eup %2837 }
0x1fd9   :  { %v2840_v34 = vpop.eup %2839 }
0x1fda   :  { %v2842_v30 = vpop.eup %2841  ;;  %v2218_v33 = vrot.slane %v2840_v34, 2 }
0x1fdb   :  { %v2844_v36 = vpop.eup %2843  ;;  %v2222_v38 = vrot.slane %v2842_v30, 4 }
0x1fdc   :  { %v2220_v3 = vadd.f32 %v2838_v16, %v2218_v33  ;;  %v2226_v42 = vrot.slane %v2844_v36, 6  ;;  %v2846_v43 = vpop.eup %2845 }
0x1fdd   :  { %v2848_v44 = vpop.eup %2847  ;;  %v2231_v51 = vrot.slane %v2846_v43, 2 }
0x1fde   :  { %v2224_v40 = vadd.f32 %v2222_v38, %v2220_v3  ;;  %v2850_v35 = vpop.eup %2849 }
0x1fdf   :  { %v2852_v28 = vpop.eup %2851  ;;  %v2235_v48 = vrot.slane %v2850_v35, 4 }
0x1fe0   :  { %v2228_v39 = vadd.f32 %v2226_v42, %v2224_v40  ;;  %v2239_v54 = vrot.slane %v2852_v28, 6 }
0x1fe2   :  { %v2229_v45 = vadd.f32 %v2848_v44, %v2228_v39 }
0x1fe4   :  { %v2233_v52 = vadd.f32 %v2231_v51, %v2229_v45 }
0x1fe6   :  { %v2237_v63 = vadd.f32 %v2235_v48, %v2233_v52 }
0x1fe8   :  { %v2241_v56 = vadd.f32 %v2239_v54, %v2237_v63 }
0x1fea   :  { %2853 = vrcp.f32 %v2241_v56 }
0x1ff4   :  { %v2854_v7 = vpop.eup %2853 }
0x1ff5   :  { %v3617_v60 = vmul.f32 %v2854_v7, %v2838_v16  ;;  %v2253_v8 = vrot.slane %v2854_v7, 6  ;;  %v2279_v53 = vrot.slane %v2854_v7, 2  ;;  %v2292_v9 = vmul.f32 %v2854_v7, %v2848_v44 }
0x1ff6   :  { %v2266_v17 = vrot.slane %v2854_v7, 4 }
0x1ff7   :  { %2247 = vperm.xlu1 %2740, %v3617_v60   ;;  %v2255_v58 = vmul.f32 %v2840_v34, %v2253_v8  ;;  %v2281_v59 = vmul.f32 %v2844_v36, %v2279_v53  ;;  %v2300_v0 = vmul.f32 %v2846_v43, %v2253_v8  ;;  %v2322_v2 = vmul.f32 %v2852_v28, %v2279_v53 }
0x1ff8   :  { %v2268_v61 = vmul.f32 %v2842_v30, %v2266_v17  ;;  %v2311_v57 = vmul.f32 %v2850_v35, %v2266_v17 }
0x1ff9   :  { %2258 = vperm.xlu0 %2739, %v2255_v58   ;;  %v2335_v24 = vrot.slane %v2255_v58, 2  ;;  %v2343_v55 = vrot.slane %v2281_v59, 6  ;;  %v2350_v50 = vrot.slane %v2300_v0, 2  ;;  %v2358_v10 = vrot.slane %v2322_v2, 6 }
0x1ffa   :  { %v2339_v11 = vrot.slane %v2268_v61, 4  ;;  %v2354_v12 = vrot.slane %v2311_v57, 4 }
0x1ffb   :  { %2295 = vperm.xlu1 %2740, %v2292_v9  }
0x1ffd   :  { %2336 = vrot.lane.b32.xlu0 %v2335_v24, %s2981_s9 }
0x1fff   :  { %2271 = vperm.xlu1 %2740, %v2268_v61  }
0x2001   :  { %2344 = vrot.lane.b32.xlu0 %v2343_v55, %s2982_s20 }
0x2003   :  { %2284 = vperm.xlu1 %2740, %v2281_v59  }
0x2005   :  { %2351 = vrot.lane.b32.xlu0 %v2350_v50, %s2983_s21 }
0x2007   :  { %2303 = vperm.xlu1 %2740, %v2300_v0  }
0x2009   :  { %2359 = vrot.lane.b32.xlu0 %v2358_v10, %s2984_s22 }
0x200b   :  { %2314 = vperm.xlu1 %2740, %v2311_v57  }
0x200f   :  { %2325 = vperm.xlu1 %2740, %v2322_v2  }
0x2013   :  { %2347 = vrot.lane.b32.xlu1 %v2292_v9, %s2985_s2 }
0x2017   :  { %2340 = vrot.lane.b32.xlu1 %v2339_v11, %s2986_s26 }
0x201b   :  { %2355 = vrot.lane.b32.xlu1 %v2354_v12, %s2987_s23 }
0x2076   :  { %v2248_v14 = vpop.permute.xlu1 %2247 }
0x2077   :  { %v2250_v46 = vmul.f32 %v2248_v14, %v3609_v49 }
0x2078   :  { %v2259_v15 = vpop.permute.xlu0 %2258 }
0x2079   :  { %v2261_v20 = vmul.f32 %v2259_v15, %v3609_v49 }
0x207a   :  { %v2296_v19 = vpop.permute.xlu1 %2295 }
0x207b   :  { %v2263_v25 = vrot.slane %v2261_v20, 2  ;;  %v2298_v18 = vmul.f32 %v2296_v19, %v3611_v1 }
0x207c   :  { %v2337_v21 = vpop.permute.xlu0 %2336 }
0x207d   :  { %v2265_v27 = vadd.f32 %v2263_v25, %v2250_v46  ;;  %v2363_v43 = vsel %vm2362_vm13, %v3617_v60, %v2337_v21 }
0x207e   :  { %v2272_v22 = vpop.permute.xlu1 %2271 }
0x207f   :  { %v2274_v4 = vmul.f32 %v2272_v22, %v3609_v49 }
0x2080   :  { %v2345_v30 = vpop.permute.xlu0 %2344 }
0x2081   :  { %v2276_v26 = vrot.slane %v2274_v4, 4 }
0x2082   :  { %v2285_v5 = vpop.permute.xlu1 %2284 }
0x2083   :  { %v2287_v37 = vmul.f32 %v2285_v5, %v3609_v49  ;;  %v2278_v13 = vadd.f32 %v2276_v26, %v2265_v27 }
0x2084   :  { %v2352_v42 = vpop.permute.xlu0 %2351 }
0x2085   :  { %v2289_v31 = vrot.slane %v2287_v37, 6 }
0x2086   :  { %v2304_v32 = vpop.permute.xlu1 %2303 }
0x2087   :  { %v2291_v41 = vadd.f32 %v2289_v31, %v2278_v13  ;;  %v2306_v47 = vmul.f32 %v2304_v32, %v3611_v1 }
0x2089   :  { %v2299_v62 = vadd.f32 %v2298_v18, %v2291_v41  ;;  %v2308_v23 = vrot.slane %v2306_v47, 2 }
0x208a   :  { %v2315_v29 = vpop.permute.xlu1 %2314 }
0x208b   :  { %v2317_v6 = vmul.f32 %v2315_v29, %v3611_v1  ;;  %v2310_v33 = vadd.f32 %v2308_v23, %v2299_v62 }
0x208d   :  { %v2319_v16 = vrot.slane %v2317_v6, 4 }
0x208e   :  { %v2326_v34 = vpop.permute.xlu1 %2325 }
0x208f   :  { %v2328_v49 = vmul.f32 %v2326_v34, %v3611_v1  ;;  %v2321_v36 = vadd.f32 %v2319_v16, %v2310_v33 }
0x2091   :  { %v2330_v3 = vrot.slane %v2328_v49, 6 }
0x2092   :  { %v2348_v38 = vpop.permute.xlu1 %2347 }
0x2093   :  { %v2332_v40 = vadd.f32 %v2330_v3, %v2321_v36 }
0x2095   :  { %2334 = vst.msk [vmem:[#allocation10] sm:$0x3] %vm2333_vm12, %v2332_v40 }
0x2096   :  { %v2341_v44 = vpop.permute.xlu1 %2340 }
0x2097   :  { %2932 = shalt.err (!%p2929_p0)
}
0x2098   :  { %s2933_s17 = scalar_lea.hbm %s3667_s11, 32 }
0x2099   :  { %p2934_p1 = scmp.ne.s32.totalorder %s3667_s11, %s2933_s17  ;;  %p2937_p2 = scmp.lt.u32.totalorder %s2933_s17, %s3667_s11 }
0x209b   :  { %p2939_p3 = pnand %p2937_p2, %p2934_p1 }
0x209d   :  { %2942 = shalt.err (!%p2939_p3)
}
0x209e   :  { %2387 = dma.vmem_to_hbm [thread:$0]  %s2385_s27, 32, %s3667_s11, [#allocation6]   ;;  %v2365_v1 = vsel %vm2364_vm14, %v2363_v43, %v2341_v44  ;;  %vm2370_vm1 = vcmask 39936   ;;  %vm2372_vm2 = vcmask 48128   ;;  %vm2374_vm3 = vcmask 56320   ;;  %v2356_v45 = vpop.permute.xlu1 %2355  ;;  %v2360_v28 = vpop.permute.xlu0 %2359 }
0x209f   :  { %v2367_v39 = vsel %vm2366_vm15, %v2365_v1, %v2345_v30  ;;  %s2989_s13 = smov [#allocation11]   ;;  %vm2376_vm4 = vcmask 58368  }
0x20a0   :  { %s2394_s3 = sshll.u32 %s2989_s13, 4  ;;  %v2369_v35 = vsel %vm2368_vm0, %v2367_v39, %v2348_v38  ;;  %s2395_s3 = int_to_ptr.vmem [resolvable:$true] %s2394_s3 }
0x20a1   :  { %v2371_v51 = vsel %vm2370_vm1, %v2369_v35, %v2352_v42  ;;  %s2943_s11 = scalar_lea.vmem %s2395_s3, 32  ;;  %p2948_p5 = scmp.lt.s32.totalorder %s2395_s3, %s2395_s3 }
0x20a2   :  { %v2373_v52 = vsel %vm2372_vm2, %v2371_v51, %v2356_v45  ;;  %p2944_p4 = scmp.ne.s32.totalorder %s2395_s3, %s2943_s11  ;;  %p2949_p6 = scmp.lt.s32.totalorder %s2943_s11, %s2943_s11 }
0x20a3   :  { %v2375_v48 = vsel %vm2374_vm3, %v2373_v52, %v2360_v28 }
0x20a4   :  { %2377 = vst.msk [vmem:[#allocation11] sm:$0x3] %vm2376_vm4, %v2375_v48  ;;  %p2950_p7 = por %p2949_p6, %p2948_p5 }
0x20a6   :  { %p2951_p8 = pnand %p2950_p7, %p2944_p4 }
0x20a8   :  { %2954 = shalt.err (!%p2951_p8)
}
0x20a9   :  { %s2955_s4 = scalar_lea.hbm %s3668_s12, 32 }
0x20aa   :  { %p2956_p9 = scmp.ne.s32.totalorder %s3668_s12, %s2955_s4  ;;  %p2959_p10 = scmp.lt.u32.totalorder %s2955_s4, %s3668_s12 }
0x20ac   :  { %p2961_p11 = pnand %p2959_p10, %p2956_p9 }
0x20ae   :  { %2964 = shalt.err (!%p2961_p11)
}
0x20af   :  { %2397 = dma.vmem_to_hbm [thread:$0]  %s2395_s3, 32, %s3668_s12, [#allocation12]  }
0x20b0   :  { %2969 = dma.done.wait [#allocation6], 32  }
0x20b1   :  { %2970 = vsyncadd [#allocation6], 4294967264 }
0x20b2   :  { %2971 = dma.done.wait [#allocation12], 32  }
0x20b3   :  { %2972 = vsyncadd [#allocation12], 4294967264 }
0x20b4   :  { %2404 = vsyncpa [#allocation5], 1 }
0x20b5   :  { %2405 = vsyncpa [#allocation8], 1 }
0x20b6   :  { %2406 = vsyncpa [#allocation6], 1 }
0x20b7   :  { %2407 = vsyncpa [#allocation12], 1 }

</bundles_post_ra>
